<compile_context>
chip_gen: v6e
topology: v6e:2x2x1
jax: 0.10.0
libtpu: 0.0.40
codegen_flags: <defaults>
</compile_context>

<pallas_src>
import jax
import jax.numpy as jnp
from jax.experimental import pallas as pl
from jax.experimental.pallas import tpu as pltpu

NEG_SLOPE = 0.01  # torch.nn.LeakyReLU default


def _leaky_relu(x):
    # For 0 < slope < 1 this is exactly LeakyReLU: max(x, slope*x).
    return jnp.maximum(x, NEG_SLOPE * x)


def generator_kernel(z_ref,
                     w1_ref, b1_ref,
                     w2_ref, b2_ref,
                     w3_ref, b3_ref,
                     w4_ref, b4_ref,
                     out_ref):
    # One batch tile per grid step; weights/biases use constant block indices
    # so they are DMA'd once and stay VMEM-resident across grid steps.
    # All matmuls run with bf16 operands on the MXU and f32 accumulation;
    # bias add, activation and tanh are done in f32 on the VPU/EUP.
    h = z_ref[...].astype(jnp.bfloat16)

    h = jnp.dot(h, w1_ref[...], preferred_element_type=jnp.float32) + b1_ref[...]
    h = _leaky_relu(h).astype(jnp.bfloat16)

    h = jnp.dot(h, w2_ref[...], preferred_element_type=jnp.float32) + b2_ref[...]
    h = _leaky_relu(h).astype(jnp.bfloat16)

    h = jnp.dot(h, w3_ref[...], preferred_element_type=jnp.float32) + b3_ref[...]
    h = _leaky_relu(h).astype(jnp.bfloat16)

    h = jnp.dot(h, w4_ref[...], preferred_element_type=jnp.float32) + b4_ref[...]
    out_ref[...] = jnp.tanh(h)


def init_generator_params(key, latent_dim, signal_length, channels):
    """Deterministic init mimicking torch.nn.Linear (U[-1/sqrt(fan_in), ...]).

    Weights stored as (in_features, out_features) so the kernel does x @ W + b.
    Biases stored as (1, out_features) for TPU-friendly 2-D layout.
    """
    dims = [latent_dim, 256, 512, 1024, signal_length * channels]
    params = []
    for i in range(4):
        key, kw, kb = jax.random.split(key, 3)
        fan_in, fan_out = dims[i], dims[i + 1]
        bound = 1.0 / (fan_in ** 0.5)
        w = jax.random.uniform(kw, (fan_in, fan_out), jnp.float32, -bound, bound)
        b = jax.random.uniform(kb, (1, fan_out), jnp.float32, -bound, bound)
        params.append((w, b))
    return params


# Tile candidates: multiples of 16 (bf16 sublane packing), capped at 512.
_TILE_CANDIDATES = (512, 384, 256, 192, 128, 96, 64, 48, 32, 16)


def _choose_batch_tile(batch):
    """Divisor-aware batch-tile selection.

    * Round the batch up to a multiple of 16 (bf16 activation packing).
    * Small batches (<=128) run as a single tile with no padding beyond the
      16-row alignment (demo batch=2 -> TB=16, single grid step).
    * Larger batches: pick the largest candidate that divides the 16-aligned
      batch exactly (zero wasted MXU rows), preferring choices that yield
      >=2 grid steps so both v7x TensorCores get work under "parallel".
    """
    b16 = max(16, ((batch + 15) // 16) * 16)
    if b16 <= 128:
        return b16
    divisors = [t for t in _TILE_CANDIDATES if t <= b16 and b16 % t == 0]
    multi = [t for t in divisors if b16 // t >= 2]
    return multi[0] if multi else divisors[0]


def generator_forward(z, params, signal_length, channels, batch_tile=None):
    (w1, b1), (w2, b2), (w3, b3), (w4, b4) = params
    batch, latent_dim = z.shape
    out_dim = signal_length * channels

    # Cast weights to bf16 once (MXU-native operands, half the DMA/VMEM).
    ws = tuple(w.astype(jnp.bfloat16) for w in (w1, w2, w3, w4))
    bs = (b1, b2, b3, b4)

    tb = batch_tile if batch_tile is not None else _choose_batch_tile(batch)
    num_tiles = pl.cdiv(batch, tb)
    padded = num_tiles * tb

    # Pad batch rows with zeros so every grid tile is full; the padded rows are
    # sliced off after the kernel.  Skipped entirely when the tile divides the
    # batch exactly (the common large-batch case after divisor-aware tiling).
    if padded != batch:
        z_in = jnp.zeros((padded, latent_dim), z.dtype).at[:batch].set(z)
    else:
        z_in = z

    def build_and_run(buffered_weights):
        def const_spec(shape):
            const = lambda i: (0, 0)  # same block every grid step
            if buffered_weights:
                # Single-buffer the never-changing weight/bias blocks.
                return pl.BlockSpec(shape, const, pipeline_mode=pl.Buffered(1))
            return pl.BlockSpec(shape, const)

        in_specs = [pl.BlockSpec((tb, latent_dim), lambda i: (i, 0))]  # z tile
        for w, b in zip(ws, bs):
            in_specs.append(const_spec(w.shape))
            in_specs.append(const_spec(b.shape))

        return pl.pallas_call(
            generator_kernel,
            out_shape=jax.ShapeDtypeStruct((padded, out_dim), jnp.float32),
            grid_spec=pltpu.PrefetchScalarGridSpec(
                num_scalar_prefetch=0,
                grid=(num_tiles,),
                in_specs=in_specs,
                out_specs=pl.BlockSpec((tb, out_dim), lambda i: (i, 0)),
            ),
            compiler_params=pltpu.CompilerParams(
                # Batch tiles are independent -> shard across TCs on v7x
                # (measured no-op on single-TC v5e/v6e, harmless there).
                dimension_semantics=("parallel",),
                # Lift the v5e 16 MiB scoped default; plenty for bf16 weights
                # + f32 activation tiles up to TB=512.
                vmem_limit_bytes=32 * 1024 * 1024,
            ),
        )(z_in, ws[0], bs[0], ws[1], bs[1], ws[2], bs[2], ws[3], bs[3])

    try:
        flat = build_and_run(buffered_weights=True)
    except Exception:
        # Fallback for JAX versions where pipeline_mode=pl.Buffered(1) on a
        # grid-based pallas_call is not supported: default double-buffering.
        flat = build_and_run(buffered_weights=False)

    flat = flat[:batch]
    # PyTorch: x.view(B, channels, signal_length) — pure metadata, stays outside.
    return flat.reshape(batch, channels, signal_length)


def generator_reference(z, params, signal_length, channels):
    """Pure-JAX f32 reference for correctness checking."""
    x = z
    for i, (w, b) in enumerate(params):
        x = x @ w + b
        if i < 3:
            x = jnp.where(x > 0, x, NEG_SLOPE * x)
        else:
            x = jnp.tanh(x)
    return x.reshape(z.shape[0], channels, signal_length)


if __name__ == "__main__":
    batch = 2
    latent_dim = 32
    signal_length = 64
    channels = 2

    key = jax.random.PRNGKey(0)
    key_z, key_p = jax.random.split(key)

    z = jax.random.normal(key_z, (batch, latent_dim), dtype=jnp.float32)
    params = init_generator_params(key_p, latent_dim, signal_length, channels)

    out = generator_forward(z, params, signal_length, channels)
    out = jax.block_until_ready(out)

    ref = generator_reference(z, params, signal_length, channels)
    assert out.shape == (batch, channels, signal_length), out.shape
    # bf16 MXU operands with f32 accumulation -> relaxed tolerance vs f32 ref.
    assert jnp.allclose(out, ref, atol=3e-2, rtol=3e-2), "mismatch vs reference"

    # Also exercise the multi-tile pipelined path (grid > 1) at a larger batch;
    # divisor-aware selection picks TB=192 (2 tiles, zero padding) for 384.
    big_batch = 384
    key_zb = jax.random.fold_in(key_z, 1)
    zb = jax.random.normal(key_zb, (big_batch, latent_dim), dtype=jnp.float32)
    out_b = jax.block_until_ready(
        generator_forward(zb, params, signal_length, channels))
    ref_b = generator_reference(zb, params, signal_length, channels)
    assert out_b.shape == (big_batch, channels, signal_length), out_b.shape
    assert jnp.allclose(out_b, ref_b, atol=3e-2, rtol=3e-2), "mismatch (batched)"

    print("KERNEL_OK")
</pallas_src>

<mosaic_0001>
module attributes {stable_mosaic.version = 11 : i64} {
  func.func @generator_kernel(%arg0: i32, %arg1: memref<16x32xf32, #tpu.memory_space<vmem>>, %arg2: memref<32x256xbf16, #tpu.memory_space<vmem>>, %arg3: memref<1x256xf32, #tpu.memory_space<vmem>>, %arg4: memref<256x512xbf16, #tpu.memory_space<vmem>>, %arg5: memref<1x512xf32, #tpu.memory_space<vmem>>, %arg6: memref<512x1024xbf16, #tpu.memory_space<vmem>>, %arg7: memref<1x1024xf32, #tpu.memory_space<vmem>>, %arg8: memref<1024x128xbf16, #tpu.memory_space<vmem>>, %arg9: memref<1x128xf32, #tpu.memory_space<vmem>>, %arg10: memref<16x128xf32, #tpu.memory_space<vmem>>) attributes {dimension_semantics = [#tpu.dimension_semantics<parallel>], iteration_bounds = array<i64: 1>, scalar_prefetch = 0 : i64, scratch_operands = 0 : i64, tpu.core_type = #tpu.core_type<tc>, window_params = [{transform_indices = @transform_0, window_bounds = array<i64: 16, 32>}, {pipeline_mode = #tpu.pipeline_mode<synchronous>, transform_indices = @transform_1, window_bounds = array<i64: 32, 256>}, {pipeline_mode = #tpu.pipeline_mode<synchronous>, transform_indices = @transform_2, window_bounds = array<i64: 1, 256>}, {pipeline_mode = #tpu.pipeline_mode<synchronous>, transform_indices = @transform_3, window_bounds = array<i64: 256, 512>}, {pipeline_mode = #tpu.pipeline_mode<synchronous>, transform_indices = @transform_4, window_bounds = array<i64: 1, 512>}, {pipeline_mode = #tpu.pipeline_mode<synchronous>, transform_indices = @transform_5, window_bounds = array<i64: 512, 1024>}, {pipeline_mode = #tpu.pipeline_mode<synchronous>, transform_indices = @transform_6, window_bounds = array<i64: 1, 1024>}, {pipeline_mode = #tpu.pipeline_mode<synchronous>, transform_indices = @transform_7, window_bounds = array<i64: 1024, 128>}, {pipeline_mode = #tpu.pipeline_mode<synchronous>, transform_indices = @transform_8, window_bounds = array<i64: 1, 128>}, {transform_indices = @transform_9, window_bounds = array<i64: 16, 128>}]} {
    %c0 = arith.constant 0 : index
    %c0_0 = arith.constant 0 : index
    %0 = vector.load %arg1[%c0, %c0_0] : memref<16x32xf32, #tpu.memory_space<vmem>>, vector<16x32xf32>
    %1 = arith.truncf %0 : vector<16x32xf32> to vector<16x32xbf16>
    %c0_1 = arith.constant 0 : index
    %c0_2 = arith.constant 0 : index
    %2 = vector.load %arg2[%c0_1, %c0_2] : memref<32x256xbf16, #tpu.memory_space<vmem>>, vector<32x256xbf16>
    %cst = arith.constant dense<0.000000e+00> : vector<16x256xf32>
    %3 = tpu.matmul %1, %2, %cst {dimension_numbers = #tpu.dot_dimension_numbers<[1], [0], [0], [1], [0, 0, 1, 1], [], []>} : vector<16x32xbf16>, vector<32x256xbf16>, vector<16x256xf32> -> vector<16x256xf32>
    %c0_3 = arith.constant 0 : index
    %c0_4 = arith.constant 0 : index
    %4 = vector.load %arg3[%c0_3, %c0_4] : memref<1x256xf32, #tpu.memory_space<vmem>>, vector<1x256xf32>
    %5 = vector.broadcast %4 : vector<1x256xf32> to vector<16x256xf32>
    %6 = arith.addf %3, %5 : vector<16x256xf32>
    %cst_5 = arith.constant 0.00999999977 : f32
    %7 = vector.broadcast %cst_5 : f32 to vector<16x256xf32>
    %8 = arith.mulf %7, %6 : vector<16x256xf32>
    %9 = arith.maximumf %6, %8 : vector<16x256xf32>
    %10 = arith.truncf %9 : vector<16x256xf32> to vector<16x256xbf16>
    %c0_6 = arith.constant 0 : index
    %c0_7 = arith.constant 0 : index
    %11 = vector.load %arg4[%c0_6, %c0_7] : memref<256x512xbf16, #tpu.memory_space<vmem>>, vector<256x512xbf16>
    %cst_8 = arith.constant dense<0.000000e+00> : vector<16x512xf32>
    %12 = tpu.matmul %10, %11, %cst_8 {dimension_numbers = #tpu.dot_dimension_numbers<[1], [0], [0], [1], [0, 0, 1, 1], [], []>} : vector<16x256xbf16>, vector<256x512xbf16>, vector<16x512xf32> -> vector<16x512xf32>
    %c0_9 = arith.constant 0 : index
    %c0_10 = arith.constant 0 : index
    %13 = vector.load %arg5[%c0_9, %c0_10] : memref<1x512xf32, #tpu.memory_space<vmem>>, vector<1x512xf32>
    %14 = vector.broadcast %13 : vector<1x512xf32> to vector<16x512xf32>
    %15 = arith.addf %12, %14 : vector<16x512xf32>
    %cst_11 = arith.constant 0.00999999977 : f32
    %16 = vector.broadcast %cst_11 : f32 to vector<16x512xf32>
    %17 = arith.mulf %16, %15 : vector<16x512xf32>
    %18 = arith.maximumf %15, %17 : vector<16x512xf32>
    %19 = arith.truncf %18 : vector<16x512xf32> to vector<16x512xbf16>
    %c0_12 = arith.constant 0 : index
    %c0_13 = arith.constant 0 : index
    %20 = vector.load %arg6[%c0_12, %c0_13] : memref<512x1024xbf16, #tpu.memory_space<vmem>>, vector<512x1024xbf16>
    %cst_14 = arith.constant dense<0.000000e+00> : vector<16x1024xf32>
    %21 = tpu.matmul %19, %20, %cst_14 {dimension_numbers = #tpu.dot_dimension_numbers<[1], [0], [0], [1], [0, 0, 1, 1], [], []>} : vector<16x512xbf16>, vector<512x1024xbf16>, vector<16x1024xf32> -> vector<16x1024xf32>
    %c0_15 = arith.constant 0 : index
    %c0_16 = arith.constant 0 : index
    %22 = vector.load %arg7[%c0_15, %c0_16] : memref<1x1024xf32, #tpu.memory_space<vmem>>, vector<1x1024xf32>
    %23 = vector.broadcast %22 : vector<1x1024xf32> to vector<16x1024xf32>
    %24 = arith.addf %21, %23 : vector<16x1024xf32>
    %cst_17 = arith.constant 0.00999999977 : f32
    %25 = vector.broadcast %cst_17 : f32 to vector<16x1024xf32>
    %26 = arith.mulf %25, %24 : vector<16x1024xf32>
    %27 = arith.maximumf %24, %26 : vector<16x1024xf32>
    %28 = arith.truncf %27 : vector<16x1024xf32> to vector<16x1024xbf16>
    %c0_18 = arith.constant 0 : index
    %c0_19 = arith.constant 0 : index
    %29 = vector.load %arg8[%c0_18, %c0_19] : memref<1024x128xbf16, #tpu.memory_space<vmem>>, vector<1024x128xbf16>
    %cst_20 = arith.constant dense<0.000000e+00> : vector<16x128xf32>
    %30 = tpu.matmul %28, %29, %cst_20 {dimension_numbers = #tpu.dot_dimension_numbers<[1], [0], [0], [1], [0, 0, 1, 1], [], []>} : vector<16x1024xbf16>, vector<1024x128xbf16>, vector<16x128xf32> -> vector<16x128xf32>
    %c0_21 = arith.constant 0 : index
    %c0_22 = arith.constant 0 : index
    %31 = vector.load %arg9[%c0_21, %c0_22] : memref<1x128xf32, #tpu.memory_space<vmem>>, vector<1x128xf32>
    %32 = vector.broadcast %31 : vector<1x128xf32> to vector<16x128xf32>
    %33 = arith.addf %30, %32 : vector<16x128xf32>
    %34 = math.tanh %33 : vector<16x128xf32>
    %c0_23 = arith.constant 0 : index
    %c0_24 = arith.constant 0 : index
    %35 = vector.load %arg10[%c0_23, %c0_24] : memref<16x128xf32, #tpu.memory_space<vmem>>, vector<16x128xf32>
    tpu.vector_store %arg10[%c0_23, %c0_24], %34 {strides = array<i32>} : memref<16x128xf32, #tpu.memory_space<vmem>>, vector<16x128xf32>,
    return
  }
  func.func @transform_0(%arg0: i32) -> (i32, i32) {
    %c0_i32 = arith.constant 0 : i32
    %c0_i32_0 = arith.constant 0 : i32
    return %arg0, %c0_i32 : i32, i32
  }
  func.func @transform_1(%arg0: i32) -> (i32, i32) {
    %c0_i32 = arith.constant 0 : i32
    %c0_i32_0 = arith.constant 0 : i32
    %c0_i32_1 = arith.constant 0 : i32
    return %c0_i32, %c0_i32_0 : i32, i32
  }
  func.func @transform_2(%arg0: i32) -> (i32, i32) {
    %c0_i32 = arith.constant 0 : i32
    %c0_i32_0 = arith.constant 0 : i32
    %c0_i32_1 = arith.constant 0 : i32
    return %c0_i32, %c0_i32_0 : i32, i32
  }
  func.func @transform_3(%arg0: i32) -> (i32, i32) {
    %c0_i32 = arith.constant 0 : i32
    %c0_i32_0 = arith.constant 0 : i32
    %c0_i32_1 = arith.constant 0 : i32
    return %c0_i32, %c0_i32_0 : i32, i32
  }
  func.func @transform_4(%arg0: i32) -> (i32, i32) {
    %c0_i32 = arith.constant 0 : i32
    %c0_i32_0 = arith.constant 0 : i32
    %c0_i32_1 = arith.constant 0 : i32
    return %c0_i32, %c0_i32_0 : i32, i32
  }
  func.func @transform_5(%arg0: i32) -> (i32, i32) {
    %c0_i32 = arith.constant 0 : i32
    %c0_i32_0 = arith.constant 0 : i32
    %c0_i32_1 = arith.constant 0 : i32
    return %c0_i32, %c0_i32_0 : i32, i32
  }
  func.func @transform_6(%arg0: i32) -> (i32, i32) {
    %c0_i32 = arith.constant 0 : i32
    %c0_i32_0 = arith.constant 0 : i32
    %c0_i32_1 = arith.constant 0 : i32
    return %c0_i32, %c0_i32_0 : i32, i32
  }
  func.func @transform_7(%arg0: i32) -> (i32, i32) {
    %c0_i32 = arith.constant 0 : i32
    %c0_i32_0 = arith.constant 0 : i32
    %c0_i32_1 = arith.constant 0 : i32
    return %c0_i32, %c0_i32_0 : i32, i32
  }
  func.func @transform_8(%arg0: i32) -> (i32, i32) {
    %c0_i32 = arith.constant 0 : i32
    %c0_i32_0 = arith.constant 0 : i32
    %c0_i32_1 = arith.constant 0 : i32
    return %c0_i32, %c0_i32_0 : i32, i32
  }
  func.func @transform_9(%arg0: i32) -> (i32, i32) {
    %c0_i32 = arith.constant 0 : i32
    %c0_i32_0 = arith.constant 0 : i32
    return %arg0, %c0_i32 : i32, i32
  }
}

module attributes {stable_mosaic.version = 11 : i64} {
  func.func @generator_kernel(%arg0: i32, %arg1: memref<16x32xf32, #tpu.memory_space<vmem>>, %arg2: memref<32x256xbf16, #tpu.memory_space<vmem>>, %arg3: memref<1x256xf32, #tpu.memory_space<vmem>>, %arg4: memref<256x512xbf16, #tpu.memory_space<vmem>>, %arg5: memref<1x512xf32, #tpu.memory_space<vmem>>, %arg6: memref<512x1024xbf16, #tpu.memory_space<vmem>>, %arg7: memref<1x1024xf32, #tpu.memory_space<vmem>>, %arg8: memref<1024x128xbf16, #tpu.memory_space<vmem>>, %arg9: memref<1x128xf32, #tpu.memory_space<vmem>>, %arg10: memref<16x128xf32, #tpu.memory_space<vmem>>) attributes {dimension_semantics = [#tpu.dimension_semantics<parallel>], iteration_bounds = array<i64: 1>, scalar_prefetch = 0 : i64, scratch_operands = 0 : i64, tpu.core_type = #tpu.core_type<tc>, window_params = [{transform_indices = @transform_0, window_bounds = array<i64: 16, 32>}, {pipeline_mode = #tpu.pipeline_mode<synchronous>, transform_indices = @transform_1, window_bounds = array<i64: 32, 256>}, {pipeline_mode = #tpu.pipeline_mode<synchronous>, transform_indices = @transform_2, window_bounds = array<i64: 1, 256>}, {pipeline_mode = #tpu.pipeline_mode<synchronous>, transform_indices = @transform_3, window_bounds = array<i64: 256, 512>}, {pipeline_mode = #tpu.pipeline_mode<synchronous>, transform_indices = @transform_4, window_bounds = array<i64: 1, 512>}, {pipeline_mode = #tpu.pipeline_mode<synchronous>, transform_indices = @transform_5, window_bounds = array<i64: 512, 1024>}, {pipeline_mode = #tpu.pipeline_mode<synchronous>, transform_indices = @transform_6, window_bounds = array<i64: 1, 1024>}, {pipeline_mode = #tpu.pipeline_mode<synchronous>, transform_indices = @transform_7, window_bounds = array<i64: 1024, 128>}, {pipeline_mode = #tpu.pipeline_mode<synchronous>, transform_indices = @transform_8, window_bounds = array<i64: 1, 128>}, {transform_indices = @transform_9, window_bounds = array<i64: 16, 128>}]} {
    %c0 = arith.constant 0 : index
    %c0_0 = arith.constant 0 : index
    %0 = vector.load %arg1[%c0, %c0_0] : memref<16x32xf32, #tpu.memory_space<vmem>>, vector<16x32xf32>
    %1 = arith.truncf %0 : vector<16x32xf32> to vector<16x32xbf16>
    %c0_1 = arith.constant 0 : index
    %c0_2 = arith.constant 0 : index
    %2 = vector.load %arg2[%c0_1, %c0_2] : memref<32x256xbf16, #tpu.memory_space<vmem>>, vector<32x256xbf16>
    %cst = arith.constant dense<0.000000e+00> : vector<16x256xf32>
    %3 = tpu.matmul %1, %2, %cst {dimension_numbers = #tpu.dot_dimension_numbers<[1], [0], [0], [1], [0, 0, 1, 1], [], []>} : vector<16x32xbf16>, vector<32x256xbf16>, vector<16x256xf32> -> vector<16x256xf32>
    %c0_3 = arith.constant 0 : index
    %c0_4 = arith.constant 0 : index
    %4 = vector.load %arg3[%c0_3, %c0_4] : memref<1x256xf32, #tpu.memory_space<vmem>>, vector<1x256xf32>
    %5 = vector.broadcast %4 : vector<1x256xf32> to vector<16x256xf32>
    %6 = arith.addf %3, %5 : vector<16x256xf32>
    %cst_5 = arith.constant 0.00999999977 : f32
    %7 = vector.broadcast %cst_5 : f32 to vector<16x256xf32>
    %8 = arith.mulf %7, %6 : vector<16x256xf32>
    %9 = arith.maximumf %6, %8 : vector<16x256xf32>
    %10 = arith.truncf %9 : vector<16x256xf32> to vector<16x256xbf16>
    %c0_6 = arith.constant 0 : index
    %c0_7 = arith.constant 0 : index
    %11 = vector.load %arg4[%c0_6, %c0_7] : memref<256x512xbf16, #tpu.memory_space<vmem>>, vector<256x512xbf16>
    %cst_8 = arith.constant dense<0.000000e+00> : vector<16x512xf32>
    %12 = tpu.matmul %10, %11, %cst_8 {dimension_numbers = #tpu.dot_dimension_numbers<[1], [0], [0], [1], [0, 0, 1, 1], [], []>} : vector<16x256xbf16>, vector<256x512xbf16>, vector<16x512xf32> -> vector<16x512xf32>
    %c0_9 = arith.constant 0 : index
    %c0_10 = arith.constant 0 : index
    %13 = vector.load %arg5[%c0_9, %c0_10] : memref<1x512xf32, #tpu.memory_space<vmem>>, vector<1x512xf32>
    %14 = vector.broadcast %13 : vector<1x512xf32> to vector<16x512xf32>
    %15 = arith.addf %12, %14 : vector<16x512xf32>
    %cst_11 = arith.constant 0.00999999977 : f32
    %16 = vector.broadcast %cst_11 : f32 to vector<16x512xf32>
    %17 = arith.mulf %16, %15 : vector<16x512xf32>
    %18 = arith.maximumf %15, %17 : vector<16x512xf32>
    %19 = arith.truncf %18 : vector<16x512xf32> to vector<16x512xbf16>
    %c0_12 = arith.constant 0 : index
    %c0_13 = arith.constant 0 : index
    %20 = vector.load %arg6[%c0_12, %c0_13] : memref<512x1024xbf16, #tpu.memory_space<vmem>>, vector<512x1024xbf16>
    %cst_14 = arith.constant dense<0.000000e+00> : vector<16x1024xf32>
    %21 = tpu.matmul %19, %20, %cst_14 {dimension_numbers = #tpu.dot_dimension_numbers<[1], [0], [0], [1], [0, 0, 1, 1], [], []>} : vector<16x512xbf16>, vector<512x1024xbf16>, vector<16x1024xf32> -> vector<16x1024xf32>
    %c0_15 = arith.constant 0 : index
    %c0_16 = arith.constant 0 : index
    %22 = vector.load %arg7[%c0_15, %c0_16] : memref<1x1024xf32, #tpu.memory_space<vmem>>, vector<1x1024xf32>
    %23 = vector.broadcast %22 : vector<1x1024xf32> to vector<16x1024xf32>
    %24 = arith.addf %21, %23 : vector<16x1024xf32>
    %cst_17 = arith.constant 0.00999999977 : f32
    %25 = vector.broadcast %cst_17 : f32 to vector<16x1024xf32>
    %26 = arith.mulf %25, %24 : vector<16x1024xf32>
    %27 = arith.maximumf %24, %26 : vector<16x1024xf32>
    %28 = arith.truncf %27 : vector<16x1024xf32> to vector<16x1024xbf16>
    %c0_18 = arith.constant 0 : index
    %c0_19 = arith.constant 0 : index
    %29 = vector.load %arg8[%c0_18, %c0_19] : memref<1024x128xbf16, #tpu.memory_space<vmem>>, vector<1024x128xbf16>
    %cst_20 = arith.constant dense<0.000000e+00> : vector<16x128xf32>
    %30 = tpu.matmul %28, %29, %cst_20 {dimension_numbers = #tpu.dot_dimension_numbers<[1], [0], [0], [1], [0, 0, 1, 1], [], []>} : vector<16x1024xbf16>, vector<1024x128xbf16>, vector<16x128xf32> -> vector<16x128xf32>
    %c0_21 = arith.constant 0 : index
    %c0_22 = arith.constant 0 : index
    %31 = vector.load %arg9[%c0_21, %c0_22] : memref<1x128xf32, #tpu.memory_space<vmem>>, vector<1x128xf32>
    %32 = vector.broadcast %31 : vector<1x128xf32> to vector<16x128xf32>
    %33 = arith.addf %30, %32 : vector<16x128xf32>
    %34 = math.tanh %33 : vector<16x128xf32>
    %c0_23 = arith.constant 0 : index
    %c0_24 = arith.constant 0 : index
    %35 = vector.load %arg10[%c0_23, %c0_24] : memref<16x128xf32, #tpu.memory_space<vmem>>, vector<16x128xf32>
    tpu.vector_store %arg10[%c0_23, %c0_24], %34 {strides = array<i32>} : memref<16x128xf32, #tpu.memory_space<vmem>>, vector<16x128xf32>,
    return
  }
  func.func @transform_0(%arg0: i32) -> (i32, i32) {
    %c0_i32 = arith.constant 0 : i32
    %c0_i32_0 = arith.constant 0 : i32
    return %arg0, %c0_i32 : i32, i32
  }
  func.func @transform_1(%arg0: i32) -> (i32, i32) {
    %c0_i32 = arith.constant 0 : i32
    %c0_i32_0 = arith.constant 0 : i32
    %c0_i32_1 = arith.constant 0 : i32
    return %c0_i32, %c0_i32_0 : i32, i32
  }
  func.func @transform_2(%arg0: i32) -> (i32, i32) {
    %c0_i32 = arith.constant 0 : i32
    %c0_i32_0 = arith.constant 0 : i32
    %c0_i32_1 = arith.constant 0 : i32
    return %c0_i32, %c0_i32_0 : i32, i32
  }
  func.func @transform_3(%arg0: i32) -> (i32, i32) {
    %c0_i32 = arith.constant 0 : i32
    %c0_i32_0 = arith.constant 0 : i32
    %c0_i32_1 = arith.constant 0 : i32
    return %c0_i32, %c0_i32_0 : i32, i32
  }
  func.func @transform_4(%arg0: i32) -> (i32, i32) {
    %c0_i32 = arith.constant 0 : i32
    %c0_i32_0 = arith.constant 0 : i32
    %c0_i32_1 = arith.constant 0 : i32
    return %c0_i32, %c0_i32_0 : i32, i32
  }
  func.func @transform_5(%arg0: i32) -> (i32, i32) {
    %c0_i32 = arith.constant 0 : i32
    %c0_i32_0 = arith.constant 0 : i32
    %c0_i32_1 = arith.constant 0 : i32
    return %c0_i32, %c0_i32_0 : i32, i32
  }
  func.func @transform_6(%arg0: i32) -> (i32, i32) {
    %c0_i32 = arith.constant 0 : i32
    %c0_i32_0 = arith.constant 0 : i32
    %c0_i32_1 = arith.constant 0 : i32
    return %c0_i32, %c0_i32_0 : i32, i32
  }
  func.func @transform_7(%arg0: i32) -> (i32, i32) {
    %c0_i32 = arith.constant 0 : i32
    %c0_i32_0 = arith.constant 0 : i32
    %c0_i32_1 = arith.constant 0 : i32
    return %c0_i32, %c0_i32_0 : i32, i32
  }
  func.func @transform_8(%arg0: i32) -> (i32, i32) {
    %c0_i32 = arith.constant 0 : i32
    %c0_i32_0 = arith.constant 0 : i32
    %c0_i32_1 = arith.constant 0 : i32
    return %c0_i32, %c0_i32_0 : i32, i32
  }
  func.func @transform_9(%arg0: i32) -> (i32, i32) {
    %c0_i32 = arith.constant 0 : i32
    %c0_i32_0 = arith.constant 0 : i32
    return %arg0, %c0_i32 : i32, i32
  }
}

</mosaic_0001>

<bundles_post_ra>
// kernel: tpu_custom_call.1
= control target key start
LH: loop header
LB: loop body
LE: loop exit
PB: predicated region body
PF: predicated region fallthrough
CT: control target
= control target key end

     0   :  { %14 = vsyncpa [#allocation3], 0  ;;  %s4388_s0 = inlined_call_operand.hbm [shape: f32[16,32], index: 0, kind: input, shape index: {}]   ;;  %s4389_s1 = inlined_call_operand.hbm [shape: bf16[32,256], index: 1, kind: input, shape index: {}]   ;;  %s4390_s2 = inlined_call_operand.vmem [shape: f32[1,256], index: 2, kind: input, shape index: {}]   ;;  %s4391_s3 = inlined_call_operand.hbm [shape: bf16[256,512], index: 3, kind: input, shape index: {}]   ;;  %s4392_s4 = inlined_call_operand.hbm [shape: f32[1,512], index: 4, kind: input, shape index: {}]   ;;  %s4393_s5 = inlined_call_operand.hbm [shape: bf16[512,1024], index: 5, kind: input, shape index: {}]   ;;  %s4394_s6 = inlined_call_operand.vmem [shape: f32[1,1024], index: 6, kind: input, shape index: {}]   ;;  %s4395_s7 = inlined_call_operand.hbm [shape: bf16[1024,128], index: 7, kind: input, shape index: {}]   ;;  %s4396_s8 = inlined_call_operand.vmem [shape: f32[1,128], index: 8, kind: input, shape index: {}]   ;;  %s4397_s9 = inlined_call_operand.hbm [shape: f32[16,128], index: 9, kind: output, shape index: {}]  }
   0x1   :  { %15 = vsyncpa [#allocation6], 0 }
   0x2   :  { %16 = vsyncpa [#allocation9], 0 }
   0x3   :  { %17 = vsyncpa [#allocation12], 0 }
   0x4   :  { %18 = vsyncpa [#allocation4], 0  ;;  %s4205_s30 = smov [#allocation5]   ;;  %s4206_s11 = smov [#allocation8]  }
   0x5   :  { %s36_s10 = sshll.u32 %s4205_s30, 4  ;;  %s63_s12 = sshll.u32 %s4206_s11, 4  ;;  %s37_s10 = int_to_ptr.vmem [resolvable:$true] %s36_s10  ;;  %s64_s12 = int_to_ptr.vmem [resolvable:$true] %s63_s12 }
   0x6   :  { %s4063_s13 = scalar_lea.vmem %s37_s10, 512  ;;  %p4068_p1 = scmp.lt.s32.totalorder %s37_s10, %s37_s10 }
   0x7   :  { %p4064_p0 = scmp.ne.s32.totalorder %s37_s10, %s4063_s13  ;;  %p4069_p2 = scmp.lt.s32.totalorder %s4063_s13, %s4063_s13 }
   0x9   :  { %p4070_p3 = por %p4069_p2, %p4068_p1 }
   0xb   :  { %p4071_p4 = pnand %p4070_p3, %p4064_p0 }
   0xd   :  { %4074 = shalt.err (!%p4071_p4)
}
   0xe   :  { %s4207_s14 = smov 128   ;;  %s4208_s15 = smov 8  }
   0xf   :  { %42 = dma.hbm_to_vmem [thread:$0]  %s4389_s1, 512, %s37_s10, [#allocation6], %s4207_s14, %s4207_s14, %s4208_s15  }
  0x10   :  { %s4083_s18 = scalar_lea.vmem %s64_s12, 64  ;;  %p4088_p6 = scmp.lt.s32.totalorder %s64_s12, %s64_s12 }
  0x11   :  { %p4084_p5 = scmp.ne.s32.totalorder %s64_s12, %s4083_s18  ;;  %p4089_p7 = scmp.lt.s32.totalorder %s4083_s18, %s4083_s18 }
  0x13   :  { %p4090_p8 = por %p4089_p7, %p4088_p6 }
  0x15   :  { %p4091_p9 = pnand %p4090_p8, %p4084_p5 }
  0x17   :  { %4094 = shalt.err (!%p4091_p9)
}
  0x18   :  { %66 = dma.hbm_to_vmem [thread:$0]  %s4392_s4, 64, %s64_s12, [#allocation9]  }
  0x19   :  { %s4209_s21 = smov [#allocation2]   ;;  %s4210_s23 = smov [#allocation7]  }
  0x1a   :  { %s24_s22 = sshll.u32 %s4209_s21, 4  ;;  %s50_s24 = sshll.u32 %s4210_s23, 4  ;;  %s25_s22 = int_to_ptr.vmem [resolvable:$true] %s24_s22  ;;  %s51_s24 = int_to_ptr.vmem [resolvable:$true] %s50_s24 }
  0x1b   :  { %s4103_s25 = scalar_lea.vmem %s25_s22, 256  ;;  %p4108_p11 = scmp.lt.s32.totalorder %s25_s22, %s25_s22 }
  0x1c   :  { %p4104_p10 = scmp.ne.s32.totalorder %s25_s22, %s4103_s25  ;;  %p4109_p12 = scmp.lt.s32.totalorder %s4103_s25, %s4103_s25 }
  0x1e   :  { %p4110_p13 = por %p4109_p12, %p4108_p11 }
  0x20   :  { %p4111_p0 = pnand %p4110_p13, %p4104_p10 }
  0x22   :  { %4114 = shalt.err (!%p4111_p0)
}
  0x23   :  { %30 = dma.hbm_to_vmem [thread:$0]  %s4388_s0, 256, %s25_s22, [#allocation3], %s4207_s14, %s4207_s14, %s4208_s15  }
  0x24   :  { %s4123_s4 = scalar_lea.vmem %s51_s24, 8192  ;;  %p4128_p2 = scmp.lt.s32.totalorder %s51_s24, %s51_s24 }
  0x25   :  { %p4124_p1 = scmp.ne.s32.totalorder %s51_s24, %s4123_s4  ;;  %p4129_p3 = scmp.lt.s32.totalorder %s4123_s4, %s4123_s4 }
  0x27   :  { %p4130_p4 = por %p4129_p3, %p4128_p2 }
  0x29   :  { %p4131_p5 = pnand %p4130_p4, %p4124_p1 }
  0x2b   :  { %4134 = shalt.err (!%p4131_p5)
}
  0x2c   :  { %s4211_s27 = smov 256   ;;  %s4212_s28 = smov 16  }
  0x2d   :  { %56 = dma.hbm_to_vmem [thread:$0]  %s4391_s3, 8192, %s51_s24, [#allocation6], %s4211_s27, %s4211_s27, %s4212_s28  }
  0x2e   :  { %s4213_s10 = smov [#allocation10]  }
  0x2f   :  { %s72_s11 = sshll.u32 %s4213_s10, 4  ;;  %s73_s11 = int_to_ptr.vmem [resolvable:$true] %s72_s11 }
  0x30   :  { %s4143_s12 = scalar_lea.vmem %s73_s11, 32768  ;;  %p4148_p7 = scmp.lt.s32.totalorder %s73_s11, %s73_s11 }
  0x31   :  { %p4144_p6 = scmp.ne.s32.totalorder %s73_s11, %s4143_s12  ;;  %p4149_p8 = scmp.lt.s32.totalorder %s4143_s12, %s4143_s12 }
  0x33   :  { %p4150_p9 = por %p4149_p8, %p4148_p7 }
  0x35   :  { %p4151_p10 = pnand %p4150_p9, %p4144_p6 }
  0x37   :  { %4154 = shalt.err (!%p4151_p10)
}
  0x38   :  { %s4214_s0 = smov 512   ;;  %s4215_s13 = smov 32  }
  0x39   :  { %78 = dma.hbm_to_vmem [thread:$0]  %s4393_s5, 32768, %s73_s11, [#allocation9], %s4214_s0, %s4214_s0, %s4215_s13  }
  0x3a   :  { %s4216_s18 = smov [#allocation11]  }
  0x3b   :  { %s86_s19 = sshll.u32 %s4216_s18, 4  ;;  %s87_s19 = int_to_ptr.vmem [resolvable:$true] %s86_s19 }
  0x3c   :  { %s4163_s3 = scalar_lea.vmem %s87_s19, 8192  ;;  %p4168_p12 = scmp.lt.s32.totalorder %s87_s19, %s87_s19 }
  0x3d   :  { %p4164_p11 = scmp.ne.s32.totalorder %s87_s19, %s4163_s3  ;;  %p4169_p13 = scmp.lt.s32.totalorder %s4163_s3, %s4163_s3 }
  0x3f   :  { %p4170_p0 = por %p4169_p13, %p4168_p12 }
  0x41   :  { %p4171_p1 = pnand %p4170_p0, %p4164_p11 }
  0x43   :  { %4174 = shalt.err (!%p4171_p1)
}
  0x44   :  { %s4217_s20 = smov 64   ;;  %s4218_s21 = smov 4  }
  0x45   :  { %92 = dma.hbm_to_vmem [thread:$0]  %s4395_s7, 8192, %s87_s19, [#allocation12], %s4217_s20, %s4217_s20, %s4218_s21  }
  0x46   :  { %4195 = dma.done.wait [#allocation3], 256  }
  0x47   :  { %4196 = vsyncadd [#allocation3], 4294967040 }
  0x48   :  { %4197 = dma.done.wait [#allocation6], 8704  }
  0x49   :  { %4198 = vsyncadd [#allocation6], 4294958592 }
  0x4a   :  { %4199 = dma.done.wait [#allocation9], 32832  }
  0x4b   :  { %4200 = vsyncadd [#allocation9], 4294934464 }
  0x4c   :  { %4201 = dma.done.wait [#allocation12], 8192  }
  0x4d   :  { %4202 = vsyncadd [#allocation12], 4294959104  ;;  %v4219_v0 = vmov 0   ;;  %v3885_v1 = vld [vmem:[#allocation5 + $0x14] ss:$8 sps:$4 sm:$0xff]   ;;  %vm153_vm0 = vcmask 261120  }
  0x4e   :  { %189 = vmatprep.mubr.bf16.mxu0 %v4219_v0  ;;  %v3887_v2 = vld [vmem:[#allocation5 + $0x10] ss:$8 sps:$4 sm:$0xff]   ;;  %169 = vmatprep.subr.bf16.mxu0 %v3885_v1  ;;  %v3888_v3 = vld [vmem:[#allocation5 + $0x4] ss:$8 sps:$4 sm:$0xff]   ;;  %v3890_v4 = vld [vmem:[#allocation5] ss:$8 sps:$4 sm:$0xff]  }
  0x4f   :  { %v114_v5 = vld [vmem:[#allocation2] sm:$0xff]  ;;  %170 = vmatpush1.bf16.msra.mxu0 %v3887_v2  ;;  %v115_v6 = vld [vmem:[#allocation2 + $0x8] sm:$0xff] }
  0x50   :  { %171 = vmatprep.subr.bf16.mxu0 %v3888_v3  ;;  %v3891_v7 = vld [vmem:[#allocation7 + $0xe4] ss:$16 sps:$4 sm:$0xff]   ;;  %v3895_v8 = vld [vmem:[#allocation7 + $0xec] ss:$16 sps:$4 sm:$0xff]   ;;  %v3896_v9 = vld [vmem:[#allocation7 + $0xe0] ss:$16 sps:$4 sm:$0xff]   ;;  %v116_v10 = vpack.c.bf16 %v115_v6, %v114_v5 }
  0x51   :  { %616 = vmatprep.subr.bf16.mxu1 %v3891_v7  ;;  %v3897_v11 = vld [vmem:[#allocation7 + $0xc4] ss:$16 sps:$4 sm:$0xff]   ;;  %v3893_v12 = vld [vmem:[#allocation7 + $0xe8] ss:$16 sps:$4 sm:$0xff]   ;;  %v3901_v13 = vld [vmem:[#allocation7 + $0xcc] ss:$16 sps:$4 sm:$0xff]  }
  0x52   :  { %617 = vmatpush1.bf16.msra.mxu1 %v3896_v9  ;;  %v3902_v14 = vld [vmem:[#allocation7 + $0xc0] ss:$16 sps:$4 sm:$0xff]   ;;  %v3903_v15 = vld [vmem:[#allocation7 + $0xa4] ss:$16 sps:$4 sm:$0xff]   ;;  %v3899_v16 = vld [vmem:[#allocation7 + $0xc8] ss:$16 sps:$4 sm:$0xff]  }
  0x53   :  { %172 = vmatpush1.bf16.msra.mxu0 %v3890_v4  ;;  %618 = vmatprep.subr.bf16.mxu1 %v3897_v11  ;;  %v3907_v17 = vld [vmem:[#allocation7 + $0xac] ss:$16 sps:$4 sm:$0xff]   ;;  %v3908_v18 = vld [vmem:[#allocation7 + $0xa0] ss:$16 sps:$4 sm:$0xff]   ;;  %v3909_v19 = vld [vmem:[#allocation7 + $0x84] ss:$16 sps:$4 sm:$0xff]  }
  0x54   :  { %659 = vmatprep.subr.bf16.mxu0 %v3895_v8  ;;  %v3905_v20 = vld [vmem:[#allocation7 + $0xa8] ss:$16 sps:$4 sm:$0xff]   ;;  %v3914_v21 = vld [vmem:[#allocation7 + $0x80] ss:$16 sps:$4 sm:$0xff]   ;;  %v3913_v22 = vld [vmem:[#allocation7 + $0x8c] ss:$16 sps:$4 sm:$0xff]  }
  0x55   :  { %v3915_v23 = vld [vmem:[#allocation7 + $0x64] ss:$16 sps:$4 sm:$0xff]   ;;  %v3911_v24 = vld [vmem:[#allocation7 + $0x88] ss:$16 sps:$4 sm:$0xff]   ;;  %v3919_v25 = vld [vmem:[#allocation7 + $0x6c] ss:$16 sps:$4 sm:$0xff]  }
  0x56   :  { %3395 = vmatmul.mubr.msk.bf16.vlgmr.msra.gmra.mxu0 %vm153_vm0, %v116_v10  ;;  %619 = vmatpush1.bf16.msra.mxu1 %v3902_v14  ;;  %v3920_v26 = vld [vmem:[#allocation7 + $0x60] ss:$16 sps:$4 sm:$0xff]   ;;  %v3921_v27 = vld [vmem:[#allocation7 + $0x44] ss:$16 sps:$4 sm:$0xff]   ;;  %v3917_v28 = vld [vmem:[#allocation7 + $0x68] ss:$16 sps:$4 sm:$0xff]  }
  0x57   :  { %660 = vmatpush1.bf16.msra.mxu0 %v3893_v12  ;;  %620 = vmatprep.subr.bf16.mxu1 %v3903_v15  ;;  %v3926_v29 = vld [vmem:[#allocation7 + $0x40] ss:$16 sps:$4 sm:$0xff]   ;;  %v3925_v30 = vld [vmem:[#allocation7 + $0x4c] ss:$16 sps:$4 sm:$0xff]   ;;  %v3927_v31 = vld [vmem:[#allocation7 + $0x24] ss:$16 sps:$4 sm:$0xff]  }
  0x58   :  { %661 = vmatprep.subr.bf16.mxu0 %v3901_v13  ;;  %v3923_v32 = vld [vmem:[#allocation7 + $0x48] ss:$16 sps:$4 sm:$0xff]   ;;  %v3931_v33 = vld [vmem:[#allocation7 + $0x2c] ss:$16 sps:$4 sm:$0xff]   ;;  %v3932_v34 = vld [vmem:[#allocation7 + $0x20] ss:$16 sps:$4 sm:$0xff]  }
  0x59   :  { %v3933_v35 = vld [vmem:[#allocation7 + $0x4] ss:$16 sps:$4 sm:$0xff]   ;;  %v3929_v36 = vld [vmem:[#allocation7 + $0x28] ss:$16 sps:$4 sm:$0xff]   ;;  %v3938_v37 = vld [vmem:[#allocation7] ss:$16 sps:$4 sm:$0xff]  }
  0x5a   :  { %621 = vmatpush1.bf16.msra.mxu1 %v3908_v18  ;;  %v3937_v38 = vld [vmem:[#allocation7 + $0xc] ss:$16 sps:$4 sm:$0xff]   ;;  %v3939_v39 = vld [vmem:[#allocation7 + $0x1e4] ss:$16 sps:$4 sm:$0xff]   ;;  %v3935_v40 = vld [vmem:[#allocation7 + $0x8] ss:$16 sps:$4 sm:$0xff]  }
  0x5b   :  { %662 = vmatpush1.bf16.msra.mxu0 %v3899_v16  ;;  %622 = vmatprep.subr.bf16.mxu1 %v3909_v19  ;;  %v3943_v41 = vld [vmem:[#allocation7 + $0x1ec] ss:$16 sps:$4 sm:$0xff]   ;;  %v3944_v42 = vld [vmem:[#allocation7 + $0x1e0] ss:$16 sps:$4 sm:$0xff]   ;;  %v3945_v43 = vld [vmem:[#allocation7 + $0x1c4] ss:$16 sps:$4 sm:$0xff]   ;;  %v123_v16 = vlaneseq }
  0x5c   :  { %663 = vmatprep.subr.bf16.mxu0 %v3907_v17  ;;  %v3941_v44 = vld [vmem:[#allocation7 + $0x1e8] ss:$16 sps:$4 sm:$0xff]   ;;  %v3950_v45 = vld [vmem:[#allocation7 + $0x1c0] ss:$16 sps:$4 sm:$0xff]   ;;  %v3949_v46 = vld [vmem:[#allocation7 + $0x1cc] ss:$16 sps:$4 sm:$0xff]  }
  0x5d   :  { %v3951_v47 = vld [vmem:[#allocation7 + $0x1a4] ss:$16 sps:$4 sm:$0xff]   ;;  %v3947_v48 = vld [vmem:[#allocation7 + $0x1c8] ss:$16 sps:$4 sm:$0xff]   ;;  %v3956_v49 = vld [vmem:[#allocation7 + $0x1a0] ss:$16 sps:$4 sm:$0xff]  }
  0x5e   :  { %623 = vmatpush1.bf16.msra.mxu1 %v3914_v21  ;;  %v3955_v50 = vld [vmem:[#allocation7 + $0x1ac] ss:$16 sps:$4 sm:$0xff]   ;;  %v3957_v51 = vld [vmem:[#allocation7 + $0x184] ss:$16 sps:$4 sm:$0xff]   ;;  %v3953_v52 = vld [vmem:[#allocation7 + $0x1a8] ss:$16 sps:$4 sm:$0xff]  }
  0x5f   :  { %664 = vmatpush1.bf16.msra.mxu0 %v3905_v20  ;;  %624 = vmatprep.subr.bf16.mxu1 %v3915_v23  ;;  %v3962_v53 = vld [vmem:[#allocation7 + $0x180] ss:$16 sps:$4 sm:$0xff]   ;;  %v3961_v54 = vld [vmem:[#allocation7 + $0x18c] ss:$16 sps:$4 sm:$0xff]   ;;  %v3959_v55 = vld [vmem:[#allocation7 + $0x188] ss:$16 sps:$4 sm:$0xff]  }
  0x60   :  { %665 = vmatprep.subr.bf16.mxu0 %v3913_v22  ;;  %v3963_v56 = vld [vmem:[#allocation7 + $0x164] ss:$16 sps:$4 sm:$0xff]   ;;  %v3967_v57 = vld [vmem:[#allocation7 + $0x16c] ss:$16 sps:$4 sm:$0xff]   ;;  %v3965_v58 = vld [vmem:[#allocation7 + $0x168] ss:$16 sps:$4 sm:$0xff]  }
  0x61   :  { %v3968_v59 = vld [vmem:[#allocation7 + $0x160] ss:$16 sps:$4 sm:$0xff]   ;;  %v3969_v60 = vld [vmem:[#allocation7 + $0x144] ss:$16 sps:$4 sm:$0xff]   ;;  %v3973_v61 = vld [vmem:[#allocation7 + $0x14c] ss:$16 sps:$4 sm:$0xff]  }
  0x62   :  { %625 = vmatpush1.bf16.msra.mxu1 %v3920_v26  ;;  %v3971_v62 = vld [vmem:[#allocation7 + $0x148] ss:$16 sps:$4 sm:$0xff]   ;;  %v3974_v63 = vld [vmem:[#allocation7 + $0x140] ss:$16 sps:$4 sm:$0xff]   ;;  %v3975_v0 = vld [vmem:[#allocation7 + $0x124] ss:$16 sps:$4 sm:$0xff]  }
  0x63   :  { %666 = vmatpush1.bf16.msra.mxu0 %v3911_v24  ;;  %626 = vmatprep.subr.bf16.mxu1 %v3921_v27  ;;  %v3979_v1 = vld [vmem:[#allocation7 + $0x12c] ss:$16 sps:$4 sm:$0xff]   ;;  %v3977_v2 = vld [vmem:[#allocation7 + $0x128] ss:$16 sps:$4 sm:$0xff]   ;;  %v3980_v3 = vld [vmem:[#allocation7 + $0x120] ss:$16 sps:$4 sm:$0xff]  }
  0x64   :  { %667 = vmatprep.subr.bf16.mxu0 %v3919_v25  ;;  %v3981_v4 = vld [vmem:[#allocation7 + $0x104] ss:$16 sps:$4 sm:$0xff]   ;;  %v3985_v5 = vld [vmem:[#allocation7 + $0x10c] ss:$16 sps:$4 sm:$0xff]   ;;  %v3983_v6 = vld [vmem:[#allocation7 + $0x108] ss:$16 sps:$4 sm:$0xff]  }
  0x65   :  { %v3986_v7 = vld [vmem:[#allocation7 + $0x100] ss:$16 sps:$4 sm:$0xff]   ;;  %v778_v8 = vld [vmem:[#allocation10 + $0x1c0] sm:$0xff]  ;;  %v4295_v17 = vshrl.u32 %v123_v16, 7 }
  0x66   :  { %627 = vmatpush1.bf16.msra.mxu1 %v3926_v29  ;;  %v782_v9 = vld [vmem:[#allocation10 + $0x1e0] sm:$0xff]  ;;  %v121_v20 = vld [vmem:[%s4390_s2] sm:$0x3] }
  0x67   :  { %668 = vmatpush1.bf16.msra.mxu0 %v3917_v28  ;;  %628 = vmatprep.subr.bf16.mxu1 %v3927_v31  ;;  %v906_v10 = vld [vmem:[#allocation10 + $0x5c0] sm:$0xff]  ;;  %v3516_v11 = vcombine.low %v778_v8, %v782_v9  ;;  %v3517_v12 = vcombine.high %v778_v8, %v782_v9  ;;  %v4298_v18 = vsub.s32 1, %v4295_v17  ;;  %v4301_v19 = vsub.s32 0, %v4295_v17 }
  0x68   :  { %669 = vmatprep.subr.bf16.mxu0 %v3925_v30  ;;  %v910_v13 = vld [vmem:[#allocation10 + $0x5e0] sm:$0xff] }
  0x69   :  { %v3644_v14 = vcombine.low %v906_v10, %v910_v13  ;;  %v3645_v15 = vcombine.high %v906_v10, %v910_v13  ;;  %v130_v21 = vrot.slane %v121_v20, %v4298_v18  ;;  %v126_v22 = vrot.slane %v121_v20, %v4301_v19  ;;  %v742_v8 = vld [vmem:[#allocation10 + $0xa0] sm:$0xff] }
  0x6a   :  { %629 = vmatpush1.bf16.msra.mxu1 %v3932_v34  ;;  %v866_v9 = vld [vmem:[#allocation10 + $0x480] sm:$0xff] }
  0x6b   :  { %670 = vmatpush1.bf16.msra.mxu0 %v3923_v32  ;;  %630 = vmatprep.subr.bf16.mxu1 %v3933_v35  ;;  %v870_v10 = vld [vmem:[#allocation10 + $0x4a0] sm:$0xff] }
  0x6c   :  { %671 = vmatprep.subr.bf16.mxu0 %v3931_v33  ;;  %v734_v16 = vld [vmem:[#allocation10 + $0x60] sm:$0xff] }
  0x6d   :  { %v858_v20 = vld [vmem:[#allocation10 + $0x440] sm:$0xff] }
  0x6e   :  { %631 = vmatpush1.bf16.msra.mxu1 %v3938_v37 }
  0x6f   :  { %672 = vmatpush1.bf16.msra.mxu0 %v3929_v36  ;;  %632 = vmatprep.subr.bf16.mxu1 %v3939_v39  ;;  %v770_v36 = vld [vmem:[#allocation10 + $0x180] sm:$0xff] }
  0x70   :  { %673 = vmatprep.subr.bf16.mxu0 %v3937_v38  ;;  %v774_v39 = vld [vmem:[#allocation10 + $0x1a0] sm:$0xff] }
  0x72   :  { %633 = vmatpush2.bf16.msra.mxu1 %v3944_v42 }
  0x73   :  { %674 = vmatpush1.bf16.msra.mxu0 %v3935_v40  ;;  %634 = vmatprep.subr.bf16.mxu1 %v3945_v43  ;;  %v898_v40 = vld [vmem:[#allocation10 + $0x580] sm:$0xff] }
  0x74   :  { %675 = vmatprep.subr.bf16.mxu0 %v3943_v41  ;;  %v902_v41 = vld [vmem:[#allocation10 + $0x5a0] sm:$0xff] }
  0x76   :  { %635 = vmatpush2.bf16.msra.mxu1 %v3950_v45  ;;  %v3509_v45 = vcombine.high %v770_v36, %v774_v39 }
  0x77   :  { %676 = vmatpush2.bf16.msra.mxu0 %v3941_v44  ;;  %636 = vmatprep.subr.bf16.mxu1 %v3951_v47  ;;  %v762_v47 = vld [vmem:[#allocation10 + $0x140] sm:$0xff] }
  0x78   :  { %677 = vmatprep.subr.bf16.mxu0 %v3949_v46  ;;  %v3637_v46 = vcombine.high %v898_v40, %v902_v41 }
  0x7a   :  { %637 = vmatpush2.bf16.msra.mxu1 %v3956_v49  ;;  %v890_v49 = vld [vmem:[#allocation10 + $0x540] sm:$0xff] }
  0x7b   :  { %678 = vmatpush2.bf16.msra.mxu0 %v3947_v48  ;;  %638 = vmatprep.subr.bf16.mxu1 %v3957_v51  ;;  %v766_v48 = vld [vmem:[#allocation10 + $0x160] sm:$0xff]  ;;  %v3508_v51 = vcombine.low %v770_v36, %v774_v39 }
  0x7c   :  { %679 = vmatprep.subr.bf16.mxu0 %v3955_v50  ;;  %v894_v50 = vld [vmem:[#allocation10 + $0x560] sm:$0xff] }
  0x7d   :  { %v970_v36 = vld [vmem:[#allocation10 + $0x7c0] sm:$0xff] }
  0x7e   :  { %639 = vmatpush2.bf16.msra.mxu1 %v3962_v53  ;;  %v3501_v53 = vcombine.high %v762_v47, %v766_v48 }
  0x7f   :  { %680 = vmatpush2.bf16.msra.mxu0 %v3953_v52  ;;  %640 = vmatprep.subr.bf16.mxu1 %v3963_v56  ;;  %v3636_v52 = vcombine.low %v898_v40, %v902_v41  ;;  %v758_v56 = vld [vmem:[#allocation10 + $0x120] sm:$0xff] }
  0x80   :  { %681 = vmatprep.subr.bf16.mxu0 %v3961_v54  ;;  %v3629_v54 = vcombine.high %v890_v49, %v894_v50 }
  0x82   :  { %641 = vmatpush2.bf16.msra.mxu1 %v3968_v59  ;;  %v3500_v59 = vcombine.low %v762_v47, %v766_v48 }
  0x83   :  { %682 = vmatpush2.bf16.msra.mxu0 %v3959_v55  ;;  %642 = vmatprep.subr.bf16.mxu1 %v3969_v60  ;;  %v754_v55 = vld [vmem:[#allocation10 + $0x100] sm:$0xff]  ;;  %v3628_v60 = vcombine.low %v890_v49, %v894_v50 }
  0x84   :  { %683 = vmatprep.subr.bf16.mxu0 %v3967_v57  ;;  %v882_v57 = vld [vmem:[#allocation10 + $0x500] sm:$0xff] }
  0x85   :  { %v826_v50 = vld [vmem:[#allocation10 + $0x340] sm:$0xff] }
  0x86   :  { %643 = vmatpush2.bf16.msra.mxu1 %v3974_v63  ;;  %v746_v63 = vld [vmem:[#allocation10 + $0xc0] sm:$0xff] }
  0x87   :  { %684 = vmatpush2.bf16.msra.mxu0 %v3965_v58  ;;  %644 = vmatprep.subr.bf16.mxu1 %v3975_v0  ;;  %v886_v58 = vld [vmem:[#allocation10 + $0x520] sm:$0xff] }
  0x88   :  { %685 = vmatprep.subr.bf16.mxu0 %v3973_v61  ;;  %v3493_v61 = vcombine.high %v754_v55, %v758_v56  ;;  %v750_v0 = vld [vmem:[#allocation10 + $0xe0] sm:$0xff] }
  0x8a   :  { %645 = vmatpush2.bf16.msra.mxu1 %v3980_v3  ;;  %v3492_v3 = vcombine.low %v754_v55, %v758_v56 }
  0x8b   :  { %686 = vmatpush2.bf16.msra.mxu0 %v3971_v62  ;;  %646 = vmatprep.subr.bf16.mxu1 %v3981_v4  ;;  %v3621_v62 = vcombine.high %v882_v57, %v886_v58  ;;  %v3620_v4 = vcombine.low %v882_v57, %v886_v58  ;;  %v818_v58 = vld [vmem:[#allocation10 + $0x300] sm:$0xff] }
  0x8c   :  { %687 = vmatprep.subr.bf16.mxu0 %v3979_v1  ;;  %v874_v1 = vld [vmem:[#allocation10 + $0x4c0] sm:$0xff] }
  0x8e   :  { %647 = vmatpush2.bf16.msra.mxu1 %v3986_v7  ;;  %v738_v7 = vld [vmem:[#allocation10 + $0x80] sm:$0xff] }
  0x8f   :  { %688 = vmatpush2.bf16.msra.mxu0 %v3977_v2  ;;  %2300 = vmatprep.subr.bf16.mxu1 %v3517_v12  ;;  %v878_v2 = vld [vmem:[#allocation10 + $0x4e0] sm:$0xff]  ;;  %v3477_v13 = vcombine.high %v738_v7, %v742_v8 }
  0x90   :  { %689 = vmatprep.subr.bf16.mxu0 %v3985_v5  ;;  %v3485_v5 = vcombine.high %v746_v63, %v750_v0  ;;  %v3612_v12 = vcombine.low %v874_v1, %v878_v2 }
  0x93   :  { %690 = vmatpush2.bf16.msra.mxu0 %v3983_v6  ;;  %v3613_v6 = vcombine.high %v874_v1, %v878_v2  ;;  %v810_v2 = vld [vmem:[#allocation10 + $0x2c0] sm:$0xff] }
  0x94   :  { %2343 = vmatprep.subr.bf16.mxu0 %v3645_v15  ;;  %v730_v15 = vld [vmem:[#allocation10 + $0x40] sm:$0xff] }
 0x116   :  { %v191_v23 = vpop.f32.mrf.mxu0 }
 0x117   :  { %v192_v26 = vadd.f32 %v191_v23, %v126_v22  ;;  %v3604_v23 = vcombine.low %v866_v9, %v870_v10 }
 0x118   :  { %v193_v24 = vpop.f32.mrf.mxu0 }
 0x119   :  { %v194_v25 = vadd.f32 %v193_v24, %v130_v21  ;;  %v200_v33 = vmul.f32 0.01, %v192_v26  ;;  %v3469_v24 = vcombine.high %v730_v15, %v734_v16 }
 0x11a   :  { %v195_v27 = vpop.f32.mrf.mxu0 }
 0x11b   :  { %v196_v28 = vadd.f32 %v195_v27, %v126_v22  ;;  %v201_v30 = vmul.f32 0.01, %v194_v25  ;;  %v204_v42 = vmax.f32 %v192_v26, %v200_v33  ;;  %v3476_v22 = vcombine.low %v738_v7, %v742_v8  ;;  %v722_v26 = vld [vmem:[#allocation10] sm:$0xff] }
 0x11c   :  { %v197_v29 = vpop.f32.mrf.mxu0  ;;  %v726_v27 = vld [vmem:[#allocation10 + $0x20] sm:$0xff] }
 0x11d   :  { %v202_v31 = vmul.f32 0.01, %v196_v28  ;;  %v198_v32 = vadd.f32 %v197_v29, %v130_v21  ;;  %v205_v37 = vmax.f32 %v194_v25, %v201_v30  ;;  %v862_v21 = vld [vmem:[#allocation10 + $0x460] sm:$0xff]  ;;  %v3468_v30 = vcombine.low %v730_v15, %v734_v16 }
 0x11e   :  { %v3597_v25 = vcombine.high %v858_v20, %v862_v21  ;;  %v854_v29 = vld [vmem:[#allocation10 + $0x420] sm:$0xff] }
 0x11f   :  { %v203_v34 = vmul.f32 0.01, %v198_v32  ;;  %v206_v35 = vmax.f32 %v196_v28, %v202_v31  ;;  %v850_v28 = vld [vmem:[#allocation10 + $0x400] sm:$0xff]  ;;  %v3596_v31 = vcombine.low %v858_v20, %v862_v21 }
 0x120   :  { %v3589_v33 = vcombine.high %v850_v28, %v854_v29  ;;  %v3588_v39 = vcombine.low %v850_v28, %v854_v29  ;;  %v934_v16 = vld [vmem:[#allocation10 + $0x6a0] sm:$0xff] }
 0x121   :  { %v207_v38 = vmax.f32 %v198_v32, %v203_v34  ;;  %v208_v44 = vpack.c.bf16 %v206_v35, %v204_v42  ;;  %v3461_v32 = vcombine.high %v722_v26, %v726_v27  ;;  %v842_v34 = vld [vmem:[#allocation10 + $0x3c0] sm:$0xff] }
 0x122   :  { %v846_v35 = vld [vmem:[#allocation10 + $0x3e0] sm:$0xff] }
 0x123   :  { %v209_v43 = vpack.c.bf16 %v207_v38, %v205_v37  ;;  %v974_v37 = vld [vmem:[#allocation10 + $0x7e0] sm:$0xff]  ;;  %v3460_v38 = vcombine.low %v722_v26, %v726_v27  ;;  %v3581_v40 = vcombine.high %v842_v34, %v846_v35 }
 0x124   :  { %v3709_v41 = vcombine.high %v970_v36, %v974_v37  ;;  %v834_v42 = vld [vmem:[#allocation10 + $0x380] sm:$0xff]  ;;  %v3708_v47 = vcombine.low %v970_v36, %v974_v37 }
 0x125   :  { %648 = vmatprep.mubr.bf16.mxu1 %v209_v43  ;;  %691 = vmatprep.mubr.bf16.mxu0 %v209_v43  ;;  %v838_v43 = vld [vmem:[#allocation10 + $0x3a0] sm:$0xff] }
 0x126   :  { %649 = vmatmul.mubr.bf16.vlgmr.msra.gmra.mxu1 %v208_v44  ;;  %692 = vmatmul.mubr.bf16.vlgmr.msra.gmra.mxu0 %v208_v44  ;;  %v962_v44 = vld [vmem:[#allocation10 + $0x780] sm:$0xff]  ;;  %v3573_v48 = vcombine.high %v834_v42, %v838_v43 }
 0x127   :  { %2301 = vmatpush1.bf16.msra.mxu1 %v3516_v11  ;;  %2344 = vmatpush1.bf16.msra.mxu0 %v3644_v14  ;;  %v3484_v11 = vcombine.low %v746_v63, %v750_v0  ;;  %v3605_v14 = vcombine.high %v866_v9, %v870_v10  ;;  %v926_v27 = vld [vmem:[#allocation10 + $0x660] sm:$0xff] }
 0x128   :  { %2302 = vmatprep.subr.bf16.mxu1 %v3509_v45  ;;  %2345 = vmatprep.subr.bf16.mxu0 %v3637_v46  ;;  %v966_v45 = vld [vmem:[#allocation10 + $0x7a0] sm:$0xff]  ;;  %v3580_v46 = vcombine.low %v842_v34, %v846_v35 }
 0x129   :  { %v3701_v49 = vcombine.high %v962_v44, %v966_v45  ;;  %v3700_v55 = vcombine.low %v962_v44, %v966_v45  ;;  %v918_v35 = vld [vmem:[#allocation10 + $0x620] sm:$0xff] }
 0x12b   :  { %2303 = vmatpush1.bf16.msra.mxu1 %v3508_v51  ;;  %2346 = vmatpush1.bf16.msra.mxu0 %v3636_v52  ;;  %v830_v51 = vld [vmem:[#allocation10 + $0x360] sm:$0xff] }
 0x12c   :  { %2304 = vmatprep.subr.bf16.mxu1 %v3501_v53  ;;  %2347 = vmatprep.subr.bf16.mxu0 %v3629_v54  ;;  %v954_v52 = vld [vmem:[#allocation10 + $0x740] sm:$0xff]  ;;  %v3572_v54 = vcombine.low %v834_v42, %v838_v43  ;;  %v3565_v56 = vcombine.high %v826_v50, %v830_v51  ;;  %v4316_v43 = vld [vmem:[#allocation10 + $0x5e8] sm:$0xff] }
 0x12d   :  { %v958_v53 = vld [vmem:[#allocation10 + $0x760] sm:$0xff] }
 0x12e   :  { %v3693_v57 = vcombine.high %v954_v52, %v958_v53  ;;  %v3692_v63 = vcombine.low %v954_v52, %v958_v53 }
 0x12f   :  { %2305 = vmatpush1.bf16.msra.mxu1 %v3500_v59  ;;  %2348 = vmatpush1.bf16.msra.mxu0 %v3628_v60  ;;  %v822_v59 = vld [vmem:[#allocation10 + $0x320] sm:$0xff] }
 0x130   :  { %2306 = vmatprep.subr.bf16.mxu1 %v3493_v61  ;;  %2349 = vmatprep.subr.bf16.mxu0 %v3621_v62  ;;  %v946_v60 = vld [vmem:[#allocation10 + $0x700] sm:$0xff]  ;;  %v3564_v62 = vcombine.low %v826_v50, %v830_v51  ;;  %v3557_v0 = vcombine.high %v818_v58, %v822_v59 }
 0x131   :  { %v950_v61 = vld [vmem:[#allocation10 + $0x720] sm:$0xff] }
 0x132   :  { %v3685_v1 = vcombine.high %v946_v60, %v950_v61  ;;  %v3684_v7 = vcombine.low %v946_v60, %v950_v61 }
 0x133   :  { %2307 = vmatpush1.bf16.msra.mxu1 %v3492_v3  ;;  %2350 = vmatpush1.bf16.msra.mxu0 %v3620_v4  ;;  %v814_v3 = vld [vmem:[#allocation10 + $0x2e0] sm:$0xff] }
 0x134   :  { %2308 = vmatprep.subr.bf16.mxu1 %v3485_v5  ;;  %2351 = vmatprep.subr.bf16.mxu0 %v3613_v6  ;;  %v938_v4 = vld [vmem:[#allocation10 + $0x6c0] sm:$0xff]  ;;  %v3556_v6 = vcombine.low %v818_v58, %v822_v59  ;;  %v3549_v8 = vcombine.high %v810_v2, %v814_v3  ;;  %v3548_v10 = vcombine.low %v810_v2, %v814_v3 }
 0x135   :  { %v942_v5 = vld [vmem:[#allocation10 + $0x6e0] sm:$0xff] }
 0x136   :  { %v3677_v9 = vcombine.high %v938_v4, %v942_v5 }
 0x137   :  { %2309 = vmatpush1.bf16.msra.mxu1 %v3484_v11  ;;  %2352 = vmatpush1.bf16.msra.mxu0 %v3612_v12  ;;  %v3676_v11 = vcombine.low %v938_v4, %v942_v5  ;;  %v802_v12 = vld [vmem:[#allocation10 + $0x280] sm:$0xff] }
 0x138   :  { %2310 = vmatprep.subr.bf16.mxu1 %v3477_v13  ;;  %2353 = vmatprep.subr.bf16.mxu0 %v3605_v14  ;;  %v806_v13 = vld [vmem:[#allocation10 + $0x2a0] sm:$0xff] }
 0x139   :  { %v930_v14 = vld [vmem:[#allocation10 + $0x680] sm:$0xff]  ;;  %v3541_v15 = vcombine.high %v802_v12, %v806_v13  ;;  %v3540_v20 = vcombine.low %v802_v12, %v806_v13 }
 0x13a   :  { %v3668_v21 = vcombine.low %v930_v14, %v934_v16 }
 0x13b   :  { %2311 = vmatpush1.bf16.msra.mxu1 %v3476_v22  ;;  %2354 = vmatpush1.bf16.msra.mxu0 %v3604_v23  ;;  %v3669_v22 = vcombine.high %v930_v14, %v934_v16  ;;  %v794_v23 = vld [vmem:[#allocation10 + $0x240] sm:$0xff] }
 0x13c   :  { %2312 = vmatprep.subr.bf16.mxu1 %v3469_v24  ;;  %2355 = vmatprep.subr.bf16.mxu0 %v3597_v25  ;;  %v798_v24 = vld [vmem:[#allocation10 + $0x260] sm:$0xff] }
 0x13d   :  { %v922_v25 = vld [vmem:[#allocation10 + $0x640] sm:$0xff]  ;;  %v3533_v26 = vcombine.high %v794_v23, %v798_v24  ;;  %v3532_v28 = vcombine.low %v794_v23, %v798_v24  ;;  %v771_v23 = vld [vmem:[#allocation10 + $0x188] sm:$0xff] }
 0x13e   :  { %v3660_v29 = vcombine.low %v922_v25, %v926_v27 }
 0x13f   :  { %2313 = vmatpush1.bf16.msra.mxu1 %v3468_v30  ;;  %2356 = vmatpush1.bf16.msra.mxu0 %v3596_v31  ;;  %v3661_v30 = vcombine.high %v922_v25, %v926_v27  ;;  %v786_v31 = vld [vmem:[#allocation10 + $0x200] sm:$0xff]  ;;  %v899_v27 = vld [vmem:[#allocation10 + $0x588] sm:$0xff] }
 0x140   :  { %2314 = vmatprep.subr.bf16.mxu1 %v3461_v32  ;;  %2357 = vmatprep.subr.bf16.mxu0 %v3589_v33  ;;  %v790_v32 = vld [vmem:[#allocation10 + $0x220] sm:$0xff] }
 0x141   :  { %v914_v33 = vld [vmem:[#allocation10 + $0x600] sm:$0xff]  ;;  %v3525_v34 = vcombine.high %v786_v31, %v790_v32  ;;  %v3524_v36 = vcombine.low %v786_v31, %v790_v32 }
 0x142   :  { %v3652_v37 = vcombine.low %v914_v33, %v918_v35 }
 0x143   :  { %2315 = vmatpush1.bf16.msra.mxu1 %v3460_v38  ;;  %2358 = vmatpush1.bf16.msra.mxu0 %v3588_v39  ;;  %v3653_v38 = vcombine.high %v914_v33, %v918_v35  ;;  %v4308_v39 = vld [vmem:[#allocation10 + $0x1c8] sm:$0xff] }
 0x144   :  { %2316 = vmatprep.subr.bf16.mxu1 %v3581_v40  ;;  %2359 = vmatprep.subr.bf16.mxu0 %v3709_v41  ;;  %v4310_v40 = vld [vmem:[#allocation10 + $0x1e8] sm:$0xff] }
 0x145   :  { %v4312_v41 = vld [vmem:[#allocation10 + $0x5c8] sm:$0xff]  ;;  %v3519_v42 = vcombine.high %v4308_v39, %v4310_v40  ;;  %v3518_v44 = vcombine.low %v4308_v39, %v4310_v40 }
 0x146   :  { %v3646_v45 = vcombine.low %v4312_v41, %v4316_v43  ;;  %v763_v33 = vld [vmem:[#allocation10 + $0x148] sm:$0xff] }
 0x147   :  { %2317 = vmatpush2.bf16.msra.mxu1 %v3580_v46  ;;  %2360 = vmatpush2.bf16.msra.mxu0 %v3708_v47  ;;  %v3647_v46 = vcombine.high %v4312_v41, %v4316_v43  ;;  %v274_v47 = vld [vmem:[#allocation8] sm:$0xf]  ;;  %v755_v43 = vld [vmem:[#allocation10 + $0x108] sm:$0xff] }
 0x148   :  { %2318 = vmatprep.subr.bf16.mxu1 %v3573_v48  ;;  %2361 = vmatprep.subr.bf16.mxu0 %v3701_v49  ;;  %v290_v48 = vsub.s32 3, %v4295_v17  ;;  %v286_v49 = vsub.s32 2, %v4295_v17  ;;  %v279_v50 = vrot.slane %v274_v47, %v4301_v19  ;;  %v283_v51 = vrot.slane %v274_v47, %v4298_v18 }
 0x14a   :  { %v291_v52 = vrot.slane %v274_v47, %v290_v48 }
 0x14b   :  { %2319 = vmatpush2.bf16.msra.mxu1 %v3572_v54  ;;  %2362 = vmatpush2.bf16.msra.mxu0 %v3700_v55  ;;  %v287_v54 = vrot.slane %v274_v47, %v286_v49  ;;  %v883_v47 = vld [vmem:[#allocation10 + $0x508] sm:$0xff] }
 0x14c   :  { %2320 = vmatprep.subr.bf16.mxu1 %v3565_v56  ;;  %2363 = vmatprep.subr.bf16.mxu0 %v3693_v57 }
 0x14f   :  { %2321 = vmatpush2.bf16.msra.mxu1 %v3564_v62  ;;  %2364 = vmatpush2.bf16.msra.mxu0 %v3692_v63 }
 0x150   :  { %2322 = vmatprep.subr.bf16.mxu1 %v3557_v0  ;;  %2365 = vmatprep.subr.bf16.mxu0 %v3685_v1 }
 0x153   :  { %2323 = vmatpush2.bf16.msra.mxu1 %v3556_v6  ;;  %2366 = vmatpush2.bf16.msra.mxu0 %v3684_v7 }
 0x154   :  { %2324 = vmatprep.subr.bf16.mxu1 %v3549_v8  ;;  %2367 = vmatprep.subr.bf16.mxu0 %v3677_v9 }
 0x157   :  { %2325 = vmatpush2.bf16.msra.mxu1 %v3548_v10  ;;  %2368 = vmatpush2.bf16.msra.mxu0 %v3676_v11 }
 0x158   :  { %2326 = vmatprep.subr.bf16.mxu1 %v3541_v15  ;;  %2369 = vmatprep.subr.bf16.mxu0 %v3669_v22 }
 0x15b   :  { %2327 = vmatpush2.bf16.msra.mxu1 %v3540_v20  ;;  %2370 = vmatpush2.bf16.msra.mxu0 %v3668_v21 }
 0x15c   :  { %2328 = vmatprep.subr.bf16.mxu1 %v3533_v26  ;;  %2371 = vmatprep.subr.bf16.mxu0 %v3661_v30  ;;  %v775_v26 = vld [vmem:[#allocation10 + $0x1a8] sm:$0xff] }
 0x15d   :  { %v3510_v39 = vcombine.low %v771_v23, %v775_v26 }
 0x15f   :  { %2329 = vmatpush2.bf16.msra.mxu1 %v3532_v28  ;;  %2372 = vmatpush2.bf16.msra.mxu0 %v3660_v29  ;;  %v903_v28 = vld [vmem:[#allocation10 + $0x5a8] sm:$0xff] }
 0x160   :  { %2330 = vmatprep.subr.bf16.mxu1 %v3525_v34  ;;  %2373 = vmatprep.subr.bf16.mxu0 %v3653_v38  ;;  %v3511_v34 = vcombine.high %v771_v23, %v775_v26  ;;  %v3639_v35 = vcombine.high %v899_v27, %v903_v28  ;;  %v895_v38 = vld [vmem:[#allocation10 + $0x568] sm:$0xff]  ;;  %v3638_v40 = vcombine.low %v899_v27, %v903_v28 }
 0x161   :  { %v971_v26 = vld [vmem:[#allocation10 + $0x7c8] sm:$0xff] }
 0x162   :  { %v975_v27 = vld [vmem:[#allocation10 + $0x7e8] sm:$0xff] }
 0x163   :  { %2331 = vmatpush2.bf16.msra.mxu1 %v3524_v36  ;;  %2374 = vmatpush2.bf16.msra.mxu0 %v3652_v37  ;;  %v767_v36 = vld [vmem:[#allocation10 + $0x168] sm:$0xff] }
 0x164   :  { %2386 = vmatprep.subr.bf16.mxu1 %v3519_v42  ;;  %2429 = vmatprep.subr.bf16.mxu0 %v3647_v46  ;;  %v891_v37 = vld [vmem:[#allocation10 + $0x548] sm:$0xff]  ;;  %v3503_v41 = vcombine.high %v763_v33, %v767_v36 }
 0x165   :  { %v3631_v42 = vcombine.high %v891_v37, %v895_v38  ;;  %v759_v46 = vld [vmem:[#allocation10 + $0x128] sm:$0xff] }
 0x1e6   :  { %v650_v53 = vpop.f32.mrf.mxu1  ;;  %v693_v55 = vpop.f32.mrf.mxu0 }
 0x1e7   :  { %v651_v56 = vadd.f32 %v650_v53, %v279_v50  ;;  %v694_v61 = vadd.f32 %v693_v55, %v287_v54  ;;  %v747_v53 = vld [vmem:[#allocation10 + $0xc8] sm:$0xff] }
 0x1e8   :  { %v652_v57 = vpop.f32.mrf.mxu1  ;;  %v695_v58 = vpop.f32.mrf.mxu0  ;;  %v875_v55 = vld [vmem:[#allocation10 + $0x4c8] sm:$0xff] }
 0x1e9   :  { %v653_v59 = vadd.f32 %v652_v57, %v283_v51  ;;  %v696_v60 = vadd.f32 %v695_v58, %v291_v52  ;;  %v702_v0 = vmul.f32 0.01, %v651_v56  ;;  %v704_v9 = vmul.f32 0.01, %v694_v61 }
 0x1ea   :  { %v654_v62 = vpop.f32.mrf.mxu1  ;;  %v697_v63 = vpop.f32.mrf.mxu0  ;;  %v3494_v57 = vcombine.low %v755_v43, %v759_v46 }
 0x1eb   :  { %v655_v1 = vadd.f32 %v654_v62, %v279_v50  ;;  %v698_v2 = vadd.f32 %v697_v63, %v287_v54  ;;  %v703_v5 = vmul.f32 0.01, %v653_v59  ;;  %v705_v6 = vmul.f32 0.01, %v696_v60  ;;  %v887_v50 = vld [vmem:[#allocation10 + $0x528] sm:$0xff] }
 0x1ec   :  { %v656_v3 = vpop.f32.mrf.mxu1  ;;  %v699_v4 = vpop.f32.mrf.mxu0  ;;  %v710_v24 = vmax.f32 %v651_v56, %v702_v0  ;;  %v712_v25 = vmax.f32 %v694_v61, %v704_v9  ;;  %v751_v54 = vld [vmem:[#allocation10 + $0xe8] sm:$0xff]  ;;  %v3622_v58 = vcombine.low %v883_v47, %v887_v50 }
 0x1ed   :  { %v657_v7 = vadd.f32 %v656_v3, %v283_v51  ;;  %v700_v8 = vadd.f32 %v699_v4, %v291_v52  ;;  %v706_v10 = vmul.f32 0.01, %v655_v1  ;;  %v708_v11 = vmul.f32 0.01, %v698_v2  ;;  %v879_v56 = vld [vmem:[#allocation10 + $0x4e8] sm:$0xff] }
 0x1ee   :  { %v711_v16 = vmax.f32 %v653_v59, %v703_v5  ;;  %v713_v20 = vmax.f32 %v696_v60, %v705_v6  ;;  %v3502_v51 = vcombine.low %v763_v33, %v767_v36  ;;  %v3630_v52 = vcombine.low %v891_v37, %v895_v38  ;;  %v739_v61 = vld [vmem:[#allocation10 + $0x88] sm:$0xff] }
 0x1ef   :  { %v707_v12 = vmul.f32 0.01, %v657_v7  ;;  %v709_v13 = vmul.f32 0.01, %v700_v8  ;;  %v714_v14 = vmax.f32 %v655_v1, %v706_v10  ;;  %v716_v15 = vmax.f32 %v698_v2, %v708_v11  ;;  %v743_v62 = vld [vmem:[#allocation10 + $0xa8] sm:$0xff] }
 0x1f0   :  { %v3487_v59 = vcombine.high %v747_v53, %v751_v54  ;;  %v3615_v60 = vcombine.high %v875_v55, %v879_v56  ;;  %v867_v63 = vld [vmem:[#allocation10 + $0x488] sm:$0xff]  ;;  %v3486_v1 = vcombine.low %v747_v53, %v751_v54  ;;  %v3614_v2 = vcombine.low %v875_v55, %v879_v56 }
 0x1f1   :  { %v715_v21 = vmax.f32 %v657_v7, %v707_v12  ;;  %v717_v22 = vmax.f32 %v700_v8, %v709_v13  ;;  %v4336_v31 = vpack.c.bf16 %v714_v14, %v710_v24  ;;  %v4338_v32 = vpack.c.bf16 %v716_v15, %v712_v25  ;;  %v871_v0 = vld [vmem:[#allocation10 + $0x4a8] sm:$0xff] }
 0x1f2   :  { %v3479_v3 = vcombine.high %v739_v61, %v743_v62  ;;  %v3607_v4 = vcombine.high %v867_v63, %v871_v0  ;;  %v731_v5 = vld [vmem:[#allocation10 + $0x48] sm:$0xff]  ;;  %v3478_v9 = vcombine.low %v739_v61, %v743_v62  ;;  %v3606_v10 = vcombine.low %v867_v63, %v871_v0 }
 0x1f3   :  { %v4332_v29 = vpack.c.bf16 %v715_v21, %v711_v16  ;;  %v4334_v30 = vpack.c.bf16 %v717_v22, %v713_v20  ;;  %v735_v6 = vld [vmem:[#allocation10 + $0x68] sm:$0xff] }
 0x1f4   :  { %v859_v7 = vld [vmem:[#allocation10 + $0x448] sm:$0xff]  ;;  %v3471_v11 = vcombine.high %v731_v5, %v735_v6  ;;  %v3470_v20 = vcombine.low %v731_v5, %v735_v6 }
 0x1f5   :  { %2332 = vmatprep.mubr.bf16.mxu1 %v4332_v29  ;;  %2375 = vmatprep.mubr.bf16.mxu0 %v4334_v30  ;;  %v863_v8 = vld [vmem:[#allocation10 + $0x468] sm:$0xff] }
 0x1f6   :  { %2333 = vmatmul.mubr.bf16.vlgmr.msra.gmra.mxu1 %v4336_v31  ;;  %2376 = vmatmul.mubr.bf16.vlgmr.msra.gmra.mxu0 %v4338_v32  ;;  %v3599_v12 = vcombine.high %v859_v7, %v863_v8  ;;  %v723_v13 = vld [vmem:[#allocation10 + $0x8] sm:$0xff]  ;;  %v3598_v21 = vcombine.low %v859_v7, %v863_v8 }
 0x1f7   :  { %2387 = vmatpush1.bf16.msra.mxu1 %v3518_v44  ;;  %2430 = vmatpush1.bf16.msra.mxu0 %v3646_v45  ;;  %v3495_v44 = vcombine.high %v755_v43, %v759_v46  ;;  %v3623_v45 = vcombine.high %v883_v47, %v887_v50  ;;  %v727_v14 = vld [vmem:[#allocation10 + $0x28] sm:$0xff] }
 0x1f8   :  { %2418 = vmatprep.mubr.bf16.mxu1 %v4332_v29  ;;  %2461 = vmatprep.mubr.bf16.mxu0 %v4334_v30  ;;  %v851_v15 = vld [vmem:[#allocation10 + $0x408] sm:$0xff]  ;;  %v3463_v22 = vcombine.high %v723_v13, %v727_v14  ;;  %v3462_v28 = vcombine.low %v723_v13, %v727_v14 }
 0x1f9   :  { %2388 = vmatprep.subr.bf16.mxu1 %v3511_v34  ;;  %2431 = vmatprep.subr.bf16.mxu0 %v3639_v35  ;;  %v855_v16 = vld [vmem:[#allocation10 + $0x428] sm:$0xff]  ;;  %v3711_v35 = vcombine.high %v971_v26, %v975_v27 }
 0x1fa   :  { %v3591_v23 = vcombine.high %v851_v15, %v855_v16  ;;  %v843_v24 = vld [vmem:[#allocation10 + $0x3c8] sm:$0xff]  ;;  %v3590_v33 = vcombine.low %v851_v15, %v855_v16 }
 0x1fb   :  { %2389 = vmatpush1.bf16.msra.mxu1 %v3510_v39  ;;  %2432 = vmatpush1.bf16.msra.mxu0 %v3638_v40  ;;  %v847_v25 = vld [vmem:[#allocation10 + $0x3e8] sm:$0xff] }
 0x1fc   :  { %2390 = vmatprep.subr.bf16.mxu1 %v3503_v41  ;;  %2433 = vmatprep.subr.bf16.mxu0 %v3631_v42  ;;  %v3583_v34 = vcombine.high %v843_v24, %v847_v25  ;;  %v835_v36 = vld [vmem:[#allocation10 + $0x388] sm:$0xff]  ;;  %v3582_v40 = vcombine.low %v843_v24, %v847_v25  ;;  %v3710_v41 = vcombine.low %v971_v26, %v975_v27 }
 0x1fd   :  { %v839_v37 = vld [vmem:[#allocation10 + $0x3a8] sm:$0xff] }
 0x1fe   :  { %v963_v38 = vld [vmem:[#allocation10 + $0x788] sm:$0xff]  ;;  %v3575_v42 = vcombine.high %v835_v36, %v839_v37 }
 0x1ff   :  { %2391 = vmatpush1.bf16.msra.mxu1 %v3502_v51  ;;  %2434 = vmatpush1.bf16.msra.mxu0 %v3630_v52  ;;  %v967_v39 = vld [vmem:[#allocation10 + $0x7a8] sm:$0xff]  ;;  %v3574_v52 = vcombine.low %v835_v36, %v839_v37  ;;  %v780_v37 = vld [vmem:[#allocation10 + $0x1d0] sm:$0xff] }
 0x200   :  { %2392 = vmatprep.subr.bf16.mxu1 %v3495_v44  ;;  %2435 = vmatprep.subr.bf16.mxu0 %v3623_v45  ;;  %v3703_v43 = vcombine.high %v963_v38, %v967_v39  ;;  %v827_v46 = vld [vmem:[#allocation10 + $0x348] sm:$0xff]  ;;  %v3702_v44 = vcombine.low %v963_v38, %v967_v39  ;;  %v784_v38 = vld [vmem:[#allocation10 + $0x1f0] sm:$0xff] }
 0x201   :  { %v831_v47 = vld [vmem:[#allocation10 + $0x368] sm:$0xff]  ;;  %v908_v39 = vld [vmem:[#allocation10 + $0x5d0] sm:$0xff] }
 0x202   :  { %v955_v50 = vld [vmem:[#allocation10 + $0x748] sm:$0xff]  ;;  %v3567_v45 = vcombine.high %v827_v46, %v831_v47 }
 0x203   :  { %2393 = vmatpush1.bf16.msra.mxu1 %v3494_v57  ;;  %2436 = vmatpush1.bf16.msra.mxu0 %v3622_v58  ;;  %v959_v51 = vld [vmem:[#allocation10 + $0x768] sm:$0xff]  ;;  %v3566_v58 = vcombine.low %v827_v46, %v831_v47  ;;  %v772_v47 = vld [vmem:[#allocation10 + $0x190] sm:$0xff] }
 0x204   :  { %2394 = vmatprep.subr.bf16.mxu1 %v3487_v59  ;;  %2437 = vmatprep.subr.bf16.mxu0 %v3615_v60  ;;  %v3695_v53 = vcombine.high %v955_v50, %v959_v51  ;;  %v819_v54 = vld [vmem:[#allocation10 + $0x308] sm:$0xff]  ;;  %v3694_v59 = vcombine.low %v955_v50, %v959_v51  ;;  %v776_v50 = vld [vmem:[#allocation10 + $0x1b0] sm:$0xff] }
 0x205   :  { %v823_v55 = vld [vmem:[#allocation10 + $0x328] sm:$0xff]  ;;  %v900_v51 = vld [vmem:[#allocation10 + $0x590] sm:$0xff] }
 0x206   :  { %v947_v56 = vld [vmem:[#allocation10 + $0x708] sm:$0xff]  ;;  %v3559_v60 = vcombine.high %v819_v54, %v823_v55 }
 0x207   :  { %2395 = vmatpush1.bf16.msra.mxu1 %v3486_v1  ;;  %2438 = vmatpush1.bf16.msra.mxu0 %v3614_v2  ;;  %v951_v57 = vld [vmem:[#allocation10 + $0x728] sm:$0xff]  ;;  %v3558_v2 = vcombine.low %v819_v54, %v823_v55  ;;  %v764_v55 = vld [vmem:[#allocation10 + $0x150] sm:$0xff] }
 0x208   :  { %2396 = vmatprep.subr.bf16.mxu1 %v3479_v3  ;;  %2439 = vmatprep.subr.bf16.mxu0 %v3607_v4  ;;  %v3687_v61 = vcombine.high %v947_v56, %v951_v57  ;;  %v811_v62 = vld [vmem:[#allocation10 + $0x2c8] sm:$0xff]  ;;  %v3686_v3 = vcombine.low %v947_v56, %v951_v57  ;;  %v768_v56 = vld [vmem:[#allocation10 + $0x170] sm:$0xff] }
 0x209   :  { %v815_v63 = vld [vmem:[#allocation10 + $0x2e8] sm:$0xff]  ;;  %v892_v57 = vld [vmem:[#allocation10 + $0x550] sm:$0xff] }
 0x20a   :  { %v939_v0 = vld [vmem:[#allocation10 + $0x6c8] sm:$0xff]  ;;  %v3551_v4 = vcombine.high %v811_v62, %v815_v63 }
 0x20b   :  { %2397 = vmatpush1.bf16.msra.mxu1 %v3478_v9  ;;  %2440 = vmatpush1.bf16.msra.mxu0 %v3606_v10  ;;  %v943_v1 = vld [vmem:[#allocation10 + $0x6e8] sm:$0xff]  ;;  %v3550_v10 = vcombine.low %v811_v62, %v815_v63  ;;  %v756_v63 = vld [vmem:[#allocation10 + $0x110] sm:$0xff] }
 0x20c   :  { %2398 = vmatprep.subr.bf16.mxu1 %v3471_v11  ;;  %2441 = vmatprep.subr.bf16.mxu0 %v3599_v12  ;;  %v3679_v5 = vcombine.high %v939_v0, %v943_v1  ;;  %v803_v6 = vld [vmem:[#allocation10 + $0x288] sm:$0xff]  ;;  %v3678_v11 = vcombine.low %v939_v0, %v943_v1  ;;  %v760_v0 = vld [vmem:[#allocation10 + $0x130] sm:$0xff] }
 0x20d   :  { %v807_v7 = vld [vmem:[#allocation10 + $0x2a8] sm:$0xff]  ;;  %v884_v1 = vld [vmem:[#allocation10 + $0x510] sm:$0xff] }
 0x20e   :  { %v931_v8 = vld [vmem:[#allocation10 + $0x688] sm:$0xff]  ;;  %v3543_v12 = vcombine.high %v803_v6, %v807_v7 }
 0x20f   :  { %2399 = vmatpush1.bf16.msra.mxu1 %v3470_v20  ;;  %2442 = vmatpush1.bf16.msra.mxu0 %v3598_v21  ;;  %v935_v9 = vld [vmem:[#allocation10 + $0x6a8] sm:$0xff]  ;;  %v3542_v21 = vcombine.low %v803_v6, %v807_v7  ;;  %v748_v7 = vld [vmem:[#allocation10 + $0xd0] sm:$0xff] }
 0x210   :  { %2400 = vmatprep.subr.bf16.mxu1 %v3463_v22  ;;  %2443 = vmatprep.subr.bf16.mxu0 %v3591_v23  ;;  %v3671_v13 = vcombine.high %v931_v8, %v935_v9  ;;  %v795_v14 = vld [vmem:[#allocation10 + $0x248] sm:$0xff]  ;;  %v3670_v22 = vcombine.low %v931_v8, %v935_v9  ;;  %v752_v8 = vld [vmem:[#allocation10 + $0xf0] sm:$0xff] }
 0x211   :  { %v799_v15 = vld [vmem:[#allocation10 + $0x268] sm:$0xff]  ;;  %v876_v9 = vld [vmem:[#allocation10 + $0x4d0] sm:$0xff] }
 0x212   :  { %v923_v16 = vld [vmem:[#allocation10 + $0x648] sm:$0xff]  ;;  %v3535_v23 = vcombine.high %v795_v14, %v799_v15 }
 0x213   :  { %2401 = vmatpush1.bf16.msra.mxu1 %v3462_v28  ;;  %2444 = vmatpush1.bf16.msra.mxu0 %v3590_v33  ;;  %v927_v20 = vld [vmem:[#allocation10 + $0x668] sm:$0xff]  ;;  %v3534_v33 = vcombine.low %v795_v14, %v799_v15  ;;  %v740_v15 = vld [vmem:[#allocation10 + $0x90] sm:$0xff] }
 0x214   :  { %2402 = vmatprep.subr.bf16.mxu1 %v3583_v34  ;;  %2445 = vmatprep.subr.bf16.mxu0 %v3711_v35  ;;  %v3663_v24 = vcombine.high %v923_v16, %v927_v20  ;;  %v787_v25 = vld [vmem:[#allocation10 + $0x208] sm:$0xff]  ;;  %v3662_v34 = vcombine.low %v923_v16, %v927_v20  ;;  %v744_v16 = vld [vmem:[#allocation10 + $0xb0] sm:$0xff] }
 0x215   :  { %v791_v26 = vld [vmem:[#allocation10 + $0x228] sm:$0xff]  ;;  %v868_v20 = vld [vmem:[#allocation10 + $0x490] sm:$0xff] }
 0x216   :  { %v915_v27 = vld [vmem:[#allocation10 + $0x608] sm:$0xff]  ;;  %v3527_v35 = vcombine.high %v787_v25, %v791_v26 }
 0x217   :  { %2403 = vmatpush2.bf16.msra.mxu1 %v3582_v40  ;;  %2446 = vmatpush2.bf16.msra.mxu0 %v3710_v41  ;;  %v919_v28 = vld [vmem:[#allocation10 + $0x628] sm:$0xff]  ;;  %v912_v40 = vld [vmem:[#allocation10 + $0x5f0] sm:$0xff]  ;;  %v3526_v41 = vcombine.low %v787_v25, %v791_v26 }
 0x218   :  { %2404 = vmatprep.subr.bf16.mxu1 %v3575_v42  ;;  %2447 = vmatprep.subr.bf16.mxu0 %v3703_v43  ;;  %v3655_v36 = vcombine.high %v915_v27, %v919_v28  ;;  %v3654_v42 = vcombine.low %v915_v27, %v919_v28  ;;  %v3521_v43 = vcombine.high %v780_v37, %v784_v38  ;;  %v732_v26 = vld [vmem:[#allocation10 + $0x50] sm:$0xff] }
 0x219   :  { %v3649_v46 = vcombine.high %v908_v39, %v912_v40  ;;  %v736_v27 = vld [vmem:[#allocation10 + $0x70] sm:$0xff] }
 0x21a   :  { %v860_v28 = vld [vmem:[#allocation10 + $0x450] sm:$0xff] }
 0x21b   :  { %2405 = vmatpush2.bf16.msra.mxu1 %v3574_v52  ;;  %2448 = vmatpush2.bf16.msra.mxu0 %v3702_v44  ;;  %v904_v52 = vld [vmem:[#allocation10 + $0x5b0] sm:$0xff]  ;;  %v3520_v44 = vcombine.low %v780_v37, %v784_v38 }
 0x21c   :  { %2406 = vmatprep.subr.bf16.mxu1 %v3567_v45  ;;  %2449 = vmatprep.subr.bf16.mxu0 %v3695_v53  ;;  %v3648_v45 = vcombine.low %v908_v39, %v912_v40  ;;  %v3513_v53 = vcombine.high %v772_v47, %v776_v50  ;;  %v3641_v54 = vcombine.high %v900_v51, %v904_v52  ;;  %v724_v38 = vld [vmem:[#allocation10 + $0x10] sm:$0xff] }
 0x21d   :  { %v728_v39 = vld [vmem:[#allocation10 + $0x30] sm:$0xff] }
 0x21e   :  { %v852_v40 = vld [vmem:[#allocation10 + $0x410] sm:$0xff] }
 0x21f   :  { %2407 = vmatpush2.bf16.msra.mxu1 %v3566_v58  ;;  %2450 = vmatpush2.bf16.msra.mxu0 %v3694_v59  ;;  %v896_v58 = vld [vmem:[#allocation10 + $0x570] sm:$0xff]  ;;  %v3512_v59 = vcombine.low %v772_v47, %v776_v50 }
 0x220   :  { %2408 = vmatprep.subr.bf16.mxu1 %v3559_v60  ;;  %2451 = vmatprep.subr.bf16.mxu0 %v3687_v61  ;;  %v3640_v60 = vcombine.low %v900_v51, %v904_v52  ;;  %v3505_v61 = vcombine.high %v764_v55, %v768_v56  ;;  %v3633_v62 = vcombine.high %v892_v57, %v896_v58  ;;  %v844_v50 = vld [vmem:[#allocation10 + $0x3d0] sm:$0xff] }
 0x221   :  { %v848_v51 = vld [vmem:[#allocation10 + $0x3f0] sm:$0xff] }
 0x222   :  { %v972_v52 = vld [vmem:[#allocation10 + $0x7d0] sm:$0xff] }
 0x223   :  { %2409 = vmatpush2.bf16.msra.mxu1 %v3558_v2  ;;  %2452 = vmatpush2.bf16.msra.mxu0 %v3686_v3  ;;  %v888_v2 = vld [vmem:[#allocation10 + $0x530] sm:$0xff]  ;;  %v3504_v3 = vcombine.low %v764_v55, %v768_v56 }
 0x224   :  { %2410 = vmatprep.subr.bf16.mxu1 %v3551_v4  ;;  %2453 = vmatprep.subr.bf16.mxu0 %v3679_v5  ;;  %v3632_v4 = vcombine.low %v892_v57, %v896_v58  ;;  %v3497_v5 = vcombine.high %v756_v63, %v760_v0  ;;  %v3625_v6 = vcombine.high %v884_v1, %v888_v2  ;;  %v836_v56 = vld [vmem:[#allocation10 + $0x390] sm:$0xff] }
 0x225   :  { %v840_v57 = vld [vmem:[#allocation10 + $0x3b0] sm:$0xff] }
 0x226   :  { %v964_v58 = vld [vmem:[#allocation10 + $0x790] sm:$0xff] }
 0x227   :  { %2411 = vmatpush2.bf16.msra.mxu1 %v3550_v10  ;;  %2454 = vmatpush2.bf16.msra.mxu0 %v3678_v11  ;;  %v880_v10 = vld [vmem:[#allocation10 + $0x4f0] sm:$0xff]  ;;  %v3496_v11 = vcombine.low %v756_v63, %v760_v0 }
 0x228   :  { %2412 = vmatprep.subr.bf16.mxu1 %v3543_v12  ;;  %2455 = vmatprep.subr.bf16.mxu0 %v3671_v13  ;;  %v3624_v12 = vcombine.low %v884_v1, %v888_v2  ;;  %v3489_v13 = vcombine.high %v748_v7, %v752_v8  ;;  %v3617_v14 = vcombine.high %v876_v9, %v880_v10  ;;  %v828_v0 = vld [vmem:[#allocation10 + $0x350] sm:$0xff] }
 0x229   :  { %v832_v1 = vld [vmem:[#allocation10 + $0x370] sm:$0xff] }
 0x22a   :  { %v956_v2 = vld [vmem:[#allocation10 + $0x750] sm:$0xff] }
 0x22b   :  { %2413 = vmatpush2.bf16.msra.mxu1 %v3542_v21  ;;  %2456 = vmatpush2.bf16.msra.mxu0 %v3670_v22  ;;  %v872_v21 = vld [vmem:[#allocation10 + $0x4b0] sm:$0xff]  ;;  %v3488_v22 = vcombine.low %v748_v7, %v752_v8 }
 0x22c   :  { %2414 = vmatprep.subr.bf16.mxu1 %v3535_v23  ;;  %2457 = vmatprep.subr.bf16.mxu0 %v3663_v24  ;;  %v3616_v23 = vcombine.low %v876_v9, %v880_v10  ;;  %v3481_v24 = vcombine.high %v740_v15, %v744_v16  ;;  %v3609_v25 = vcombine.high %v868_v20, %v872_v21  ;;  %v820_v8 = vld [vmem:[#allocation10 + $0x310] sm:$0xff] }
 0x22d   :  { %v824_v9 = vld [vmem:[#allocation10 + $0x330] sm:$0xff] }
 0x22e   :  { %v948_v10 = vld [vmem:[#allocation10 + $0x710] sm:$0xff] }
 0x22f   :  { %2415 = vmatpush2.bf16.msra.mxu1 %v3534_v33  ;;  %2458 = vmatpush2.bf16.msra.mxu0 %v3662_v34  ;;  %v864_v33 = vld [vmem:[#allocation10 + $0x470] sm:$0xff]  ;;  %v3480_v34 = vcombine.low %v740_v15, %v744_v16 }
 0x230   :  { %2416 = vmatprep.subr.bf16.mxu1 %v3527_v35  ;;  %2459 = vmatprep.subr.bf16.mxu0 %v3655_v36  ;;  %v3608_v35 = vcombine.low %v868_v20, %v872_v21  ;;  %v3473_v36 = vcombine.high %v732_v26, %v736_v27  ;;  %v3601_v37 = vcombine.high %v860_v28, %v864_v33  ;;  %v812_v16 = vld [vmem:[#allocation10 + $0x2d0] sm:$0xff] }
 0x231   :  { %v816_v20 = vld [vmem:[#allocation10 + $0x2f0] sm:$0xff] }
 0x232   :  { %v940_v21 = vld [vmem:[#allocation10 + $0x6d0] sm:$0xff] }
 0x233   :  { %2417 = vmatpush2.bf16.msra.mxu1 %v3526_v41  ;;  %2460 = vmatpush2.bf16.msra.mxu0 %v3654_v42  ;;  %v856_v41 = vld [vmem:[#allocation10 + $0x430] sm:$0xff]  ;;  %v3472_v42 = vcombine.low %v732_v26, %v736_v27 }
 0x234   :  { %2472 = vmatprep.subr.bf16.mxu1 %v3521_v43  ;;  %2515 = vmatprep.subr.bf16.mxu0 %v3649_v46  ;;  %v3600_v43 = vcombine.low %v860_v28, %v864_v33  ;;  %v3465_v46 = vcombine.high %v724_v38, %v728_v39  ;;  %v3593_v47 = vcombine.high %v852_v40, %v856_v41  ;;  %v804_v27 = vld [vmem:[#allocation10 + $0x290] sm:$0xff] }
 0x235   :  { %v808_v28 = vld [vmem:[#allocation10 + $0x2b0] sm:$0xff] }
 0x236   :  { %2419 = vmatmul.mubr.bf16.vlgmr.msra.gmra.mxu1 %v4336_v31  ;;  %2462 = vmatmul.mubr.bf16.vlgmr.msra.gmra.mxu0 %v4338_v32  ;;  %v932_v33 = vld [vmem:[#allocation10 + $0x690] sm:$0xff] }
 0x237   :  { %2473 = vmatpush1.bf16.msra.mxu1 %v3520_v44  ;;  %2504 = vmatprep.mubr.bf16.mxu1 %v4332_v29  ;;  %v976_v44 = vld [vmem:[#allocation10 + $0x7f0] sm:$0xff] }
 0x238   :  { %2516 = vmatpush1.bf16.msra.mxu0 %v3648_v45  ;;  %2547 = vmatprep.mubr.bf16.mxu0 %v4334_v30  ;;  %v3464_v45 = vcombine.low %v724_v38, %v728_v39  ;;  %v3713_v55 = vcombine.high %v972_v52, %v976_v44  ;;  %v796_v39 = vld [vmem:[#allocation10 + $0x250] sm:$0xff] }
 0x239   :  { %2474 = vmatprep.subr.bf16.mxu1 %v3513_v53  ;;  %2517 = vmatprep.subr.bf16.mxu0 %v3641_v54  ;;  %v3592_v53 = vcombine.low %v852_v40, %v856_v41  ;;  %v3585_v54 = vcombine.high %v844_v50, %v848_v51  ;;  %v800_v40 = vld [vmem:[#allocation10 + $0x270] sm:$0xff] }
 0x23a   :  { %v924_v41 = vld [vmem:[#allocation10 + $0x650] sm:$0xff] }
 0x23b   :  { %2475 = vmatpush1.bf16.msra.mxu1 %v3512_v59  ;;  %v968_v59 = vld [vmem:[#allocation10 + $0x7b0] sm:$0xff] }
 0x23c   :  { %2518 = vmatpush1.bf16.msra.mxu0 %v3640_v60  ;;  %2476 = vmatprep.subr.bf16.mxu1 %v3505_v61  ;;  %v3584_v60 = vcombine.low %v844_v50, %v848_v51  ;;  %v3712_v61 = vcombine.low %v972_v52, %v976_v44  ;;  %v3705_v63 = vcombine.high %v964_v58, %v968_v59  ;;  %v788_v51 = vld [vmem:[#allocation10 + $0x210] sm:$0xff] }
 0x23d   :  { %2519 = vmatprep.subr.bf16.mxu0 %v3633_v62  ;;  %v3577_v62 = vcombine.high %v836_v56, %v840_v57  ;;  %v792_v52 = vld [vmem:[#allocation10 + $0x230] sm:$0xff] }
 0x23e   :  { %v916_v44 = vld [vmem:[#allocation10 + $0x610] sm:$0xff] }
 0x23f   :  { %2477 = vmatpush1.bf16.msra.mxu1 %v3504_v3  ;;  %v960_v3 = vld [vmem:[#allocation10 + $0x770] sm:$0xff] }
 0x240   :  { %2520 = vmatpush1.bf16.msra.mxu0 %v3632_v4  ;;  %2478 = vmatprep.subr.bf16.mxu1 %v3497_v5  ;;  %v3576_v4 = vcombine.low %v836_v56, %v840_v57  ;;  %v3704_v5 = vcombine.low %v964_v58, %v968_v59  ;;  %v3697_v7 = vcombine.high %v956_v2, %v960_v3  ;;  %v781_v57 = vld [vmem:[#allocation10 + $0x1d8] sm:$0xff] }
 0x241   :  { %2521 = vmatprep.subr.bf16.mxu0 %v3625_v6  ;;  %v3569_v6 = vcombine.high %v828_v0, %v832_v1  ;;  %v785_v58 = vld [vmem:[#allocation10 + $0x1f8] sm:$0xff] }
 0x242   :  { %v909_v59 = vld [vmem:[#allocation10 + $0x5d8] sm:$0xff] }
 0x243   :  { %2479 = vmatpush1.bf16.msra.mxu1 %v3496_v11  ;;  %v952_v11 = vld [vmem:[#allocation10 + $0x730] sm:$0xff] }
 0x244   :  { %2522 = vmatpush1.bf16.msra.mxu0 %v3624_v12  ;;  %2480 = vmatprep.subr.bf16.mxu1 %v3489_v13  ;;  %v3568_v12 = vcombine.low %v828_v0, %v832_v1  ;;  %v3696_v13 = vcombine.low %v956_v2, %v960_v3  ;;  %v3689_v15 = vcombine.high %v948_v10, %v952_v11  ;;  %v773_v1 = vld [vmem:[#allocation10 + $0x198] sm:$0xff] }
 0x245   :  { %2523 = vmatprep.subr.bf16.mxu0 %v3617_v14  ;;  %v3561_v14 = vcombine.high %v820_v8, %v824_v9  ;;  %v777_v2 = vld [vmem:[#allocation10 + $0x1b8] sm:$0xff]  ;;  %v3522_v3 = vcombine.low %v781_v57, %v785_v58 }
 0x247   :  { %2481 = vmatpush1.bf16.msra.mxu1 %v3488_v22  ;;  %v944_v22 = vld [vmem:[#allocation10 + $0x6f0] sm:$0xff] }
 0x248   :  { %2524 = vmatpush1.bf16.msra.mxu0 %v3616_v23  ;;  %2482 = vmatprep.subr.bf16.mxu1 %v3481_v24  ;;  %v3560_v23 = vcombine.low %v820_v8, %v824_v9  ;;  %v3688_v24 = vcombine.low %v948_v10, %v952_v11  ;;  %v3681_v26 = vcombine.high %v940_v21, %v944_v22  ;;  %v765_v8 = vld [vmem:[#allocation10 + $0x158] sm:$0xff] }
 0x249   :  { %2525 = vmatprep.subr.bf16.mxu0 %v3609_v25  ;;  %v3553_v25 = vcombine.high %v812_v16, %v816_v20  ;;  %v769_v9 = vld [vmem:[#allocation10 + $0x178] sm:$0xff] }
 0x24a   :  { %v893_v11 = vld [vmem:[#allocation10 + $0x558] sm:$0xff] }
 0x24b   :  { %2483 = vmatpush1.bf16.msra.mxu1 %v3480_v34  ;;  %v936_v34 = vld [vmem:[#allocation10 + $0x6b0] sm:$0xff] }
 0x24c   :  { %2526 = vmatpush1.bf16.msra.mxu0 %v3608_v35  ;;  %2484 = vmatprep.subr.bf16.mxu1 %v3473_v36  ;;  %v3552_v35 = vcombine.low %v812_v16, %v816_v20  ;;  %v3680_v36 = vcombine.low %v940_v21, %v944_v22  ;;  %v3673_v38 = vcombine.high %v932_v33, %v936_v34  ;;  %v757_v20 = vld [vmem:[#allocation10 + $0x118] sm:$0xff] }
 0x24d   :  { %2527 = vmatprep.subr.bf16.mxu0 %v3601_v37  ;;  %v3545_v37 = vcombine.high %v804_v27, %v808_v28  ;;  %v761_v21 = vld [vmem:[#allocation10 + $0x138] sm:$0xff] }
 0x24e   :  { %v885_v22 = vld [vmem:[#allocation10 + $0x518] sm:$0xff] }
 0x24f   :  { %2485 = vmatpush1.bf16.msra.mxu1 %v3472_v42  ;;  %v928_v42 = vld [vmem:[#allocation10 + $0x670] sm:$0xff] }
 0x250   :  { %2528 = vmatpush1.bf16.msra.mxu0 %v3600_v43  ;;  %2486 = vmatprep.subr.bf16.mxu1 %v3465_v46  ;;  %v3544_v43 = vcombine.low %v804_v27, %v808_v28  ;;  %v3672_v46 = vcombine.low %v932_v33, %v936_v34  ;;  %v3665_v50 = vcombine.high %v924_v41, %v928_v42  ;;  %v749_v27 = vld [vmem:[#allocation10 + $0xd8] sm:$0xff] }
 0x251   :  { %2529 = vmatprep.subr.bf16.mxu0 %v3593_v47  ;;  %v3537_v47 = vcombine.high %v796_v39, %v800_v40  ;;  %v753_v28 = vld [vmem:[#allocation10 + $0xf8] sm:$0xff] }
 0x252   :  { %v877_v33 = vld [vmem:[#allocation10 + $0x4d8] sm:$0xff] }
 0x253   :  { %2487 = vmatpush1.bf16.msra.mxu1 %v3464_v45  ;;  %v920_v45 = vld [vmem:[#allocation10 + $0x630] sm:$0xff]  ;;  %v881_v34 = vld [vmem:[#allocation10 + $0x4f8] sm:$0xff] }
 0x254   :  { %2530 = vmatpush1.bf16.msra.mxu0 %v3592_v53  ;;  %2488 = vmatprep.subr.bf16.mxu1 %v3585_v54  ;;  %v3536_v53 = vcombine.low %v796_v39, %v800_v40  ;;  %v3664_v54 = vcombine.low %v924_v41, %v928_v42  ;;  %v3657_v56 = vcombine.high %v916_v44, %v920_v45  ;;  %v745_v39 = vld [vmem:[#allocation10 + $0xb8] sm:$0xff] }
 0x255   :  { %2531 = vmatprep.subr.bf16.mxu0 %v3713_v55  ;;  %v3529_v55 = vcombine.high %v788_v51, %v792_v52  ;;  %v869_v40 = vld [vmem:[#allocation10 + $0x498] sm:$0xff]  ;;  %v3490_v42 = vcombine.low %v749_v27, %v753_v28 }
 0x256   :  { %v873_v41 = vld [vmem:[#allocation10 + $0x4b8] sm:$0xff] }
 0x257   :  { %2489 = vmatpush2.bf16.msra.mxu1 %v3584_v60  ;;  %v913_v60 = vld [vmem:[#allocation10 + $0x5f8] sm:$0xff] }
 0x258   :  { %2532 = vmatpush2.bf16.msra.mxu0 %v3712_v61  ;;  %2490 = vmatprep.subr.bf16.mxu1 %v3577_v62  ;;  %v3528_v61 = vcombine.low %v788_v51, %v792_v52  ;;  %v3656_v62 = vcombine.low %v916_v44, %v920_v45  ;;  %v3651_v0 = vcombine.high %v909_v59, %v913_v60  ;;  %v737_v51 = vld [vmem:[#allocation10 + $0x78] sm:$0xff] }
 0x259   :  { %2533 = vmatprep.subr.bf16.mxu0 %v3705_v63  ;;  %v3523_v63 = vcombine.high %v781_v57, %v785_v58  ;;  %v861_v52 = vld [vmem:[#allocation10 + $0x458] sm:$0xff] }
 0x25a   :  { %v865_v44 = vld [vmem:[#allocation10 + $0x478] sm:$0xff] }
 0x25b   :  { %2491 = vmatpush2.bf16.msra.mxu1 %v3576_v4  ;;  %v901_v4 = vld [vmem:[#allocation10 + $0x598] sm:$0xff] }
 0x25c   :  { %2534 = vmatpush2.bf16.msra.mxu0 %v3704_v5  ;;  %2492 = vmatprep.subr.bf16.mxu1 %v3569_v6  ;;  %v905_v5 = vld [vmem:[#allocation10 + $0x5b8] sm:$0xff]  ;;  %v3650_v6 = vcombine.low %v909_v59, %v913_v60 }
 0x25d   :  { %2535 = vmatprep.subr.bf16.mxu0 %v3697_v7  ;;  %v3515_v7 = vcombine.high %v773_v1, %v777_v2  ;;  %v3643_v10 = vcombine.high %v901_v4, %v905_v5  ;;  %v729_v57 = vld [vmem:[#allocation10 + $0x38] sm:$0xff] }
 0x25e   :  { %v853_v58 = vld [vmem:[#allocation10 + $0x418] sm:$0xff] }
 0x25f   :  { %2493 = vmatpush2.bf16.msra.mxu1 %v3568_v12  ;;  %v897_v12 = vld [vmem:[#allocation10 + $0x578] sm:$0xff] }
 0x260   :  { %2536 = vmatpush2.bf16.msra.mxu0 %v3696_v13  ;;  %2494 = vmatprep.subr.bf16.mxu1 %v3561_v14  ;;  %v3514_v13 = vcombine.low %v773_v1, %v777_v2  ;;  %v3642_v14 = vcombine.low %v901_v4, %v905_v5  ;;  %v3635_v16 = vcombine.high %v893_v11, %v897_v12  ;;  %v857_v59 = vld [vmem:[#allocation10 + $0x438] sm:$0xff] }
 0x261   :  { %2537 = vmatprep.subr.bf16.mxu0 %v3689_v15  ;;  %v3507_v15 = vcombine.high %v765_v8, %v769_v9  ;;  %v849_v1 = vld [vmem:[#allocation10 + $0x3f8] sm:$0xff]  ;;  %v3594_v5 = vcombine.low %v853_v58, %v857_v59 }
 0x262   :  { %v973_v2 = vld [vmem:[#allocation10 + $0x7d8] sm:$0xff] }
 0x263   :  { %2495 = vmatpush2.bf16.msra.mxu1 %v3560_v23  ;;  %v889_v23 = vld [vmem:[#allocation10 + $0x538] sm:$0xff] }
 0x264   :  { %2538 = vmatpush2.bf16.msra.mxu0 %v3688_v24  ;;  %2496 = vmatprep.subr.bf16.mxu1 %v3553_v25  ;;  %v3506_v24 = vcombine.low %v765_v8, %v769_v9  ;;  %v3634_v25 = vcombine.low %v893_v11, %v897_v12  ;;  %v837_v8 = vld [vmem:[#allocation10 + $0x398] sm:$0xff] }
 0x265   :  { %2539 = vmatprep.subr.bf16.mxu0 %v3681_v26  ;;  %v3499_v26 = vcombine.high %v757_v20, %v761_v21  ;;  %v841_v9 = vld [vmem:[#allocation10 + $0x3b8] sm:$0xff] }
 0x266   :  { %v969_v11 = vld [vmem:[#allocation10 + $0x7b8] sm:$0xff] }
 0x267   :  { %2497 = vmatpush2.bf16.msra.mxu1 %v3552_v35  ;;  %v3626_v35 = vcombine.low %v885_v22, %v889_v23 }
 0x268   :  { %2540 = vmatpush2.bf16.msra.mxu0 %v3680_v36  ;;  %2498 = vmatprep.subr.bf16.mxu1 %v3545_v37  ;;  %v3491_v36 = vcombine.high %v749_v27, %v753_v28  ;;  %v3619_v37 = vcombine.high %v877_v33, %v881_v34  ;;  %v825_v27 = vld [vmem:[#allocation10 + $0x338] sm:$0xff] }
 0x269   :  { %2541 = vmatprep.subr.bf16.mxu0 %v3673_v38  ;;  %v741_v38 = vld [vmem:[#allocation10 + $0x98] sm:$0xff] }
 0x26a   :  { %v3482_v45 = vcombine.low %v741_v38, %v745_v39  ;;  %v949_v28 = vld [vmem:[#allocation10 + $0x718] sm:$0xff] }
 0x26b   :  { %2499 = vmatpush2.bf16.msra.mxu1 %v3544_v43  ;;  %v3618_v43 = vcombine.low %v877_v33, %v881_v34  ;;  %v953_v33 = vld [vmem:[#allocation10 + $0x738] sm:$0xff] }
 0x26c   :  { %2542 = vmatpush2.bf16.msra.mxu0 %v3672_v46  ;;  %2500 = vmatprep.subr.bf16.mxu1 %v3537_v47  ;;  %v3483_v46 = vcombine.high %v741_v38, %v745_v39  ;;  %v3611_v47 = vcombine.high %v869_v40, %v873_v41  ;;  %v817_v38 = vld [vmem:[#allocation10 + $0x2f8] sm:$0xff] }
 0x26d   :  { %2543 = vmatprep.subr.bf16.mxu0 %v3665_v50  ;;  %v733_v50 = vld [vmem:[#allocation10 + $0x58] sm:$0xff] }
 0x26e   :  { %v3474_v60 = vcombine.low %v733_v50, %v737_v51  ;;  %v941_v39 = vld [vmem:[#allocation10 + $0x6d8] sm:$0xff] }
 0x26f   :  { %2501 = vmatpush2.bf16.msra.mxu1 %v3536_v53  ;;  %v3610_v53 = vcombine.low %v869_v40, %v873_v41  ;;  %v945_v40 = vld [vmem:[#allocation10 + $0x6f8] sm:$0xff] }
 0x270   :  { %2544 = vmatpush2.bf16.msra.mxu0 %v3664_v54  ;;  %2502 = vmatprep.subr.bf16.mxu1 %v3529_v55  ;;  %v3475_v54 = vcombine.high %v733_v50, %v737_v51  ;;  %v3603_v55 = vcombine.high %v861_v52, %v865_v44  ;;  %v809_v50 = vld [vmem:[#allocation10 + $0x2b8] sm:$0xff] }
 0x271   :  { %2545 = vmatprep.subr.bf16.mxu0 %v3657_v56  ;;  %v725_v56 = vld [vmem:[#allocation10 + $0x18] sm:$0xff] }
 0x272   :  { %v3466_v4 = vcombine.low %v725_v56, %v729_v57  ;;  %v933_v51 = vld [vmem:[#allocation10 + $0x698] sm:$0xff] }
 0x273   :  { %2503 = vmatpush2.bf16.msra.mxu1 %v3528_v61  ;;  %v3602_v61 = vcombine.low %v861_v52, %v865_v44  ;;  %v937_v52 = vld [vmem:[#allocation10 + $0x6b8] sm:$0xff] }
 0x274   :  { %2546 = vmatpush2.bf16.msra.mxu0 %v3656_v62  ;;  %2558 = vmatprep.subr.bf16.mxu1 %v3523_v63  ;;  %v3467_v62 = vcombine.high %v725_v56, %v729_v57  ;;  %v3595_v63 = vcombine.high %v853_v58, %v857_v59  ;;  %v801_v56 = vld [vmem:[#allocation10 + $0x278] sm:$0xff] }
 0x275   :  { %2601 = vmatprep.subr.bf16.mxu0 %v3651_v0  ;;  %v845_v0 = vld [vmem:[#allocation10 + $0x3d8] sm:$0xff] }
 0x276   :  { %2505 = vmatmul.mubr.bf16.vlgmr.msra.gmra.mxu1 %v4336_v31  ;;  %v3586_v12 = vcombine.low %v845_v0, %v849_v1  ;;  %v925_v57 = vld [vmem:[#allocation10 + $0x658] sm:$0xff] }
 0x277   :  { %2548 = vmatmul.mubr.bf16.vlgmr.msra.gmra.mxu0 %v4338_v32  ;;  %2559 = vmatpush1.bf16.msra.mxu1 %v3522_v3  ;;  %v977_v3 = vld [vmem:[#allocation10 + $0x7f8] sm:$0xff] }
 0x278   :  { %2590 = vmatprep.mubr.bf16.mxu1 %v4332_v29  ;;  %2602 = vmatpush1.bf16.msra.mxu0 %v3650_v6  ;;  %v3627_v29 = vcombine.high %v885_v22, %v889_v23  ;;  %v3587_v6 = vcombine.high %v845_v0, %v849_v1  ;;  %v961_v22 = vld [vmem:[#allocation10 + $0x778] sm:$0xff]  ;;  %v3578_v23 = vcombine.low %v837_v8, %v841_v9 }
 0x279   :  { %2633 = vmatprep.mubr.bf16.mxu0 %v4334_v30  ;;  %2560 = vmatprep.subr.bf16.mxu1 %v3515_v7  ;;  %v3498_v30 = vcombine.low %v757_v20, %v761_v21  ;;  %v3715_v7 = vcombine.high %v973_v2, %v977_v3  ;;  %v833_v20 = vld [vmem:[#allocation10 + $0x378] sm:$0xff] }
 0x27a   :  { %2603 = vmatprep.subr.bf16.mxu0 %v3643_v10  ;;  %v965_v10 = vld [vmem:[#allocation10 + $0x798] sm:$0xff] }
 0x27b   :  { %2561 = vmatpush1.bf16.msra.mxu1 %v3514_v13  ;;  %v3714_v13 = vcombine.low %v973_v2, %v977_v3  ;;  %v957_v21 = vld [vmem:[#allocation10 + $0x758] sm:$0xff] }
 0x27c   :  { %2604 = vmatpush1.bf16.msra.mxu0 %v3642_v14  ;;  %2562 = vmatprep.subr.bf16.mxu1 %v3507_v15  ;;  %v3579_v14 = vcombine.high %v837_v8, %v841_v9  ;;  %v3707_v15 = vcombine.high %v965_v10, %v969_v11  ;;  %v929_v58 = vld [vmem:[#allocation10 + $0x678] sm:$0xff] }
 0x27d   :  { %2605 = vmatprep.subr.bf16.mxu0 %v3635_v16  ;;  %v829_v16 = vld [vmem:[#allocation10 + $0x358] sm:$0xff] }
 0x27e   :  { %v3570_v34 = vcombine.low %v829_v16, %v833_v20  ;;  %v793_v0 = vld [vmem:[#allocation10 + $0x238] sm:$0xff] }
 0x27f   :  { %2563 = vmatpush1.bf16.msra.mxu1 %v3506_v24  ;;  %v3706_v24 = vcombine.low %v965_v10, %v969_v11  ;;  %v917_v1 = vld [vmem:[#allocation10 + $0x618] sm:$0xff] }
 0x280   :  { %2606 = vmatpush1.bf16.msra.mxu0 %v3634_v25  ;;  %2564 = vmatprep.subr.bf16.mxu1 %v3499_v26  ;;  %v3571_v25 = vcombine.high %v829_v16, %v833_v20  ;;  %v3699_v26 = vcombine.high %v957_v21, %v961_v22  ;;  %v921_v2 = vld [vmem:[#allocation10 + $0x638] sm:$0xff]  ;;  %v4005_v16 = vld [vmem:[#allocation11 + $0xf0] sm:$0xff]  }
 0x281   :  { %2607 = vmatprep.subr.bf16.mxu0 %v3627_v29  ;;  %v821_v29 = vld [vmem:[#allocation10 + $0x318] sm:$0xff]  ;;  %v3658_v8 = vcombine.low %v917_v1, %v921_v2 }
 0x282   :  { %v3562_v41 = vcombine.low %v821_v29, %v825_v27  ;;  %v3987_v9 = vld [vmem:[#allocation11 + $0x78] sm:$0xff]  }
 0x283   :  { %2565 = vmatpush1.bf16.msra.mxu1 %v3498_v30  ;;  %v3698_v30 = vcombine.low %v957_v21, %v961_v22  ;;  %v4003_v10 = vld [vmem:[#allocation11 + $0xf8] sm:$0xff]   ;;  %v3990_v22 = vld [vmem:[#allocation11 + $0x30] sm:$0xff]  }
 0x284   :  { %2608 = vmatpush1.bf16.msra.mxu0 %v3626_v35  ;;  %2566 = vmatprep.subr.bf16.mxu1 %v3491_v36  ;;  %v3563_v35 = vcombine.high %v821_v29, %v825_v27  ;;  %v3691_v36 = vcombine.high %v949_v28, %v953_v33  ;;  %v3988_v11 = vld [vmem:[#allocation11 + $0x38] sm:$0xff]   ;;  %v4007_v27 = vld [vmem:[#allocation11 + $0xe8] sm:$0xff]  }
 0x285   :  { %2609 = vmatprep.subr.bf16.mxu0 %v3619_v37  ;;  %v813_v37 = vld [vmem:[#allocation10 + $0x2d8] sm:$0xff] }
 0x286   :  { %v3554_v44 = vcombine.low %v813_v37, %v817_v38 }
 0x287   :  { %2567 = vmatpush1.bf16.msra.mxu1 %v3490_v42  ;;  %v3690_v42 = vcombine.low %v949_v28, %v953_v33 }
 0x288   :  { %2610 = vmatpush1.bf16.msra.mxu0 %v3618_v43  ;;  %2568 = vmatprep.subr.bf16.mxu1 %v3483_v46  ;;  %v3555_v43 = vcombine.high %v813_v37, %v817_v38  ;;  %v3683_v46 = vcombine.high %v941_v39, %v945_v40 }
 0x289   :  { %2611 = vmatprep.subr.bf16.mxu0 %v3611_v47  ;;  %v805_v47 = vld [vmem:[#allocation10 + $0x298] sm:$0xff] }
 0x28a   :  { %v3546_v59 = vcombine.low %v805_v47, %v809_v50 }
 0x28b   :  { %2569 = vmatpush1.bf16.msra.mxu1 %v3482_v45  ;;  %v3682_v45 = vcombine.low %v941_v39, %v945_v40  ;;  %v3994_v40 = vld [vmem:[#allocation11 + $0x20] sm:$0xff]  }
 0x28c   :  { %2612 = vmatpush1.bf16.msra.mxu0 %v3610_v53  ;;  %2570 = vmatprep.subr.bf16.mxu1 %v3475_v54  ;;  %v3547_v53 = vcombine.high %v805_v47, %v809_v50  ;;  %v3675_v54 = vcombine.high %v933_v51, %v937_v52 }
 0x28d   :  { %2613 = vmatprep.subr.bf16.mxu0 %v3603_v55  ;;  %v797_v55 = vld [vmem:[#allocation10 + $0x258] sm:$0xff] }
 0x28e   :  { %v3538_v3 = vcombine.low %v797_v55, %v801_v56 }
 0x28f   :  { %2571 = vmatpush1.bf16.msra.mxu1 %v3474_v60  ;;  %v3674_v60 = vcombine.low %v933_v51, %v937_v52  ;;  %v3996_v52 = vld [vmem:[#allocation11 + $0x18] sm:$0xff]  }
 0x290   :  { %2614 = vmatpush1.bf16.msra.mxu0 %v3602_v61  ;;  %2572 = vmatprep.subr.bf16.mxu1 %v3467_v62  ;;  %v3539_v61 = vcombine.high %v797_v55, %v801_v56  ;;  %v3667_v62 = vcombine.high %v925_v57, %v929_v58  ;;  %v4013_v55 = vld [vmem:[#allocation11 + $0xd0] sm:$0xff]  }
 0x291   :  { %2615 = vmatprep.subr.bf16.mxu0 %v3595_v63  ;;  %v789_v63 = vld [vmem:[#allocation10 + $0x218] sm:$0xff] }
 0x293   :  { %2573 = vmatpush1.bf16.msra.mxu1 %v3466_v4  ;;  %v3666_v4 = vcombine.low %v925_v57, %v929_v58  ;;  %v3998_v57 = vld [vmem:[#allocation11 + $0x10] sm:$0xff]  }
 0x294   :  { %2616 = vmatpush1.bf16.msra.mxu0 %v3594_v5  ;;  %2574 = vmatprep.subr.bf16.mxu1 %v3587_v6  ;;  %v3531_v5 = vcombine.high %v789_v63, %v793_v0  ;;  %v3659_v6 = vcombine.high %v917_v1, %v921_v2  ;;  %v4016_v1 = vld [vmem:[#allocation11 + $0x88] sm:$0xff]   ;;  %v4017_v2 = vld [vmem:[#allocation11 + $0xc0] sm:$0xff]  }
 0x295   :  { %2617 = vmatprep.subr.bf16.mxu0 %v3715_v7  ;;  %v3530_v7 = vcombine.low %v789_v63, %v793_v0  ;;  %v4001_v0 = vld [vmem:[#allocation11 + $0x40] sm:$0xff]  }
 0x297   :  { %2575 = vmatpush2.bf16.msra.mxu1 %v3586_v12  ;;  %v4357_v12 = vld [vmem:[%s4394_s6] sm:$0xff] }
 0x298   :  { %2618 = vmatpush2.bf16.msra.mxu0 %v3714_v13  ;;  %2576 = vmatprep.subr.bf16.mxu1 %v3579_v14  ;;  %v3989_v13 = vld [vmem:[#allocation11 + $0x70] sm:$0xff]   ;;  %v4004_v14 = vld [vmem:[#allocation11 + $0xb8] sm:$0xff]   ;;  %v983_v47 = vrot.slane %v4357_v12, %v4301_v19 }
 0x299   :  { %2619 = vmatprep.subr.bf16.mxu0 %v3707_v15  ;;  %v987_v15 = vrot.slane %v4357_v12, %v4298_v18  ;;  %v4014_v19 = vld [vmem:[#allocation11 + $0x90] sm:$0xff]  }
 0x29b   :  { %2577 = vmatpush2.bf16.msra.mxu1 %v3578_v23 }
 0x29c   :  { %2620 = vmatpush2.bf16.msra.mxu0 %v3706_v24  ;;  %2578 = vmatprep.subr.bf16.mxu1 %v3571_v25  ;;  %v3991_v25 = vld [vmem:[#allocation11 + $0x68] sm:$0xff]  }
 0x29d   :  { %2621 = vmatprep.subr.bf16.mxu0 %v3699_v26  ;;  %v4006_v26 = vld [vmem:[#allocation11 + $0xb0] sm:$0xff]  }
 0x29f   :  { %2579 = vmatpush2.bf16.msra.mxu1 %v3570_v34 }
 0x2a0   :  { %2622 = vmatpush2.bf16.msra.mxu0 %v3698_v30  ;;  %2580 = vmatprep.subr.bf16.mxu1 %v3563_v35  ;;  %v3993_v30 = vld [vmem:[#allocation11 + $0x60] sm:$0xff]  }
 0x2a1   :  { %2623 = vmatprep.subr.bf16.mxu0 %v3691_v36  ;;  %v4009_v36 = vld [vmem:[#allocation11 + $0xe0] sm:$0xff]  }
 0x2a3   :  { %2581 = vmatpush2.bf16.msra.mxu1 %v3562_v41  ;;  %v3995_v41 = vld [vmem:[#allocation11 + $0x58] sm:$0xff]  }
 0x2a4   :  { %2624 = vmatpush2.bf16.msra.mxu0 %v3690_v42  ;;  %2582 = vmatprep.subr.bf16.mxu1 %v3555_v43  ;;  %v4010_v42 = vld [vmem:[#allocation11 + $0xa0] sm:$0xff]  }
 0x2a5   :  { %2625 = vmatprep.subr.bf16.mxu0 %v3683_v46  ;;  %v4011_v46 = vld [vmem:[#allocation11 + $0xd8] sm:$0xff]  }
 0x2a7   :  { %2583 = vmatpush2.bf16.msra.mxu1 %v3554_v44 }
 0x2a8   :  { %2626 = vmatpush2.bf16.msra.mxu0 %v3682_v45  ;;  %2584 = vmatprep.subr.bf16.mxu1 %v3547_v53  ;;  %v3997_v45 = vld [vmem:[#allocation11 + $0x50] sm:$0xff]   ;;  %v4012_v53 = vld [vmem:[#allocation11 + $0x98] sm:$0xff]  }
 0x2a9   :  { %2627 = vmatprep.subr.bf16.mxu0 %v3675_v54 }
 0x2ab   :  { %2585 = vmatpush2.bf16.msra.mxu1 %v3546_v59  ;;  %v3999_v59 = vld [vmem:[#allocation11 + $0x48] sm:$0xff]  }
 0x2ac   :  { %2628 = vmatpush2.bf16.msra.mxu0 %v3674_v60  ;;  %2586 = vmatprep.subr.bf16.mxu1 %v3539_v61  ;;  %v4015_v60 = vld [vmem:[#allocation11 + $0xc8] sm:$0xff]  }
 0x2ad   :  { %2629 = vmatprep.subr.bf16.mxu0 %v3667_v62  ;;  %v4000_v62 = vld [vmem:[#allocation11 + $0x8] sm:$0xff]  }
 0x2af   :  { %2587 = vmatpush2.bf16.msra.mxu1 %v3538_v3 }
 0x2b0   :  { %2630 = vmatpush2.bf16.msra.mxu0 %v3666_v4  ;;  %2588 = vmatprep.subr.bf16.mxu1 %v3531_v5  ;;  %v4002_v4 = vld [vmem:[#allocation11] sm:$0xff]  }
 0x2b1   :  { %2631 = vmatprep.subr.bf16.mxu0 %v3659_v6  ;;  %v4018_v6 = vld [vmem:[#allocation11 + $0x80] sm:$0xff]  }
 0x2b3   :  { %2589 = vmatpush2.bf16.msra.mxu1 %v3530_v7  ;;  %v4019_v7 = vld [vmem:[#allocation11 + $0x178] sm:$0xff]  }
 0x2b4   :  { %2632 = vmatpush2.bf16.msra.mxu0 %v3658_v8  ;;  %3781 = vmatprep.subr.bf16.mxu1 %v3987_v9  ;;  %v4035_v8 = vld [vmem:[#allocation11 + $0x1f8] sm:$0xff]  }
 0x2b5   :  { %3803 = vmatprep.subr.bf16.mxu0 %v4003_v10  ;;  %v4020_v10 = vld [vmem:[#allocation11 + $0x138] sm:$0xff]  }
 0x2b6   :  { %2591 = vmatmul.mubr.bf16.vlgmr.msra.gmra.mxu1 %v4336_v31  ;;  %v2334_v20 = vpop.f32.mrf.mxu1  ;;  %v2377_v21 = vpop.f32.mrf.mxu0  ;;  %v3992_v31 = vld [vmem:[#allocation11 + $0x28] sm:$0xff]  }
 0x2b7   :  { %2634 = vmatmul.mubr.bf16.vlgmr.msra.gmra.mxu0 %v4338_v32  ;;  %3782 = vmatpush3.bf16.msra.mxu1 %v3988_v11  ;;  %v4008_v32 = vld [vmem:[#allocation11 + $0xa8] sm:$0xff]   ;;  %v2335_v56 = vadd.f32 %v2334_v20, %v983_v47  ;;  %v4025_v20 = vld [vmem:[#allocation11 + $0x160] sm:$0xff]  }
 0x2b8   :  { %v2336_v23 = vpop.f32.mrf.mxu1  ;;  %v2379_v24 = vpop.f32.mrf.mxu0  ;;  %3783 = vmatprep.subr.bf16.mxu1 %v3989_v13  ;;  %3804 = vmatpush3.bf16.msra.mxu0 %v4004_v14  ;;  %v4021_v13 = vld [vmem:[#allocation11 + $0x170] sm:$0xff]  }
 0x2b9   :  { %v2337_v29 = vadd.f32 %v2336_v23, %v987_v15  ;;  %3805 = vmatprep.subr.bf16.mxu0 %v4005_v16  ;;  %v2378_v61 = vadd.f32 %v2377_v21, %v2335_v56  ;;  %v4022_v14 = vld [vmem:[#allocation11 + $0x130] sm:$0xff]   ;;  %v4024_v16 = vld [vmem:[#allocation11 + $0x128] sm:$0xff]   ;;  %v4026_v21 = vld [vmem:[#allocation11 + $0x120] sm:$0xff]  }
 0x2ba   :  { %v2338_v18 = vpop.f32.mrf.mxu1  ;;  %v2381_v28 = vpop.f32.mrf.mxu0  ;;  %v4028_v23 = vld [vmem:[#allocation11 + $0x118] sm:$0xff]  }
 0x2bb   :  { %v2380_v33 = vadd.f32 %v2379_v24, %v2337_v29  ;;  %3784 = vmatpush3.bf16.msra.mxu1 %v3990_v22  ;;  %v2339_v44 = vadd.f32 %v2338_v18, %v983_v47  ;;  %v2644_v3 = vmul.f32 0.01, %v2378_v61  ;;  %v4027_v22 = vld [vmem:[#allocation11 + $0x158] sm:$0xff]   ;;  %v4029_v24 = vld [vmem:[#allocation11 + $0x150] sm:$0xff]   ;;  %v4032_v29 = vld [vmem:[#allocation11 + $0x108] sm:$0xff]  }
 0x2bc   :  { %v2340_v34 = vpop.f32.mrf.mxu1  ;;  %3785 = vmatprep.subr.bf16.mxu1 %v3991_v25  ;;  %3806 = vmatpush3.bf16.msra.mxu0 %v4006_v26  ;;  %v2383_v37 = vpop.f32.mrf.mxu0  ;;  %v4030_v25 = vld [vmem:[#allocation11 + $0x110] sm:$0xff]   ;;  %v4031_v26 = vld [vmem:[#allocation11 + $0x148] sm:$0xff]   ;;  %v4034_v18 = vld [vmem:[#allocation11 + $0x100] sm:$0xff]  }
 0x2bd   :  { %v2341_v35 = vadd.f32 %v2340_v34, %v987_v15  ;;  %3807 = vmatprep.subr.bf16.mxu0 %v4007_v27  ;;  %v2645_v38 = vmul.f32 0.01, %v2380_v33  ;;  %v2382_v58 = vadd.f32 %v2381_v28, %v2339_v44  ;;  %v2660_v9 = vmax.f32 %v2378_v61, %v2644_v3  ;;  %v4023_v15 = vld [vmem:[#allocation11 + $0x168] sm:$0xff]   ;;  %v4033_v27 = vld [vmem:[#allocation11 + $0x140] sm:$0xff]   ;;  %v4036_v56 = vld [vmem:[#allocation11 + $0x1b8] sm:$0xff]  }
 0x2be   :  { %v991_v28 = vrot.slane %v4357_v12, %v286_v49  ;;  %v4041_v61 = vld [vmem:[#allocation11 + $0x1e0] sm:$0xff]   ;;  %v4047_v3 = vld [vmem:[#allocation11 + $0x1c8] sm:$0xff]  }
 0x2bf   :  { %v2384_v39 = vadd.f32 %v2383_v37, %v2341_v35  ;;  %3786 = vmatpush3.bf16.msra.mxu1 %v3992_v31  ;;  %v2661_v50 = vmax.f32 %v2380_v33, %v2645_v38  ;;  %v2652_v63 = vmul.f32 0.01, %v2382_v58  ;;  %v995_v33 = vrot.slane %v4357_v12, %v290_v48 }
 0x2c0   :  { %3787 = vmatprep.subr.bf16.mxu1 %v3993_v30  ;;  %3808 = vmatpush3.bf16.msra.mxu0 %v4008_v32 }
 0x2c1   :  { %v2653_v43 = vmul.f32 0.01, %v2384_v39  ;;  %3809 = vmatprep.subr.bf16.mxu0 %v4009_v36  ;;  %v2668_v5 = vmax.f32 %v2382_v58, %v2652_v63  ;;  %v4037_v58 = vld [vmem:[#allocation11 + $0x1f0] sm:$0xff]   ;;  %v4043_v63 = vld [vmem:[#allocation11 + $0x1d8] sm:$0xff]  }
 0x2c3   :  { %v2669_v51 = vmax.f32 %v2384_v39, %v2653_v43  ;;  %3788 = vmatpush3.bf16.msra.mxu1 %v3994_v40  ;;  %v2676_v11 = vpack.c.bf16 %v2668_v5, %v2660_v9  ;;  %v4049_v5 = vld [vmem:[#allocation11 + $0x1c0] sm:$0xff]  }
 0x2c4   :  { %3789 = vmatprep.subr.bf16.mxu1 %v3995_v41  ;;  %3810 = vmatpush3.bf16.msra.mxu0 %v4010_v42 }
 0x2c5   :  { %v2677_v54 = vpack.c.bf16 %v2669_v51, %v2661_v50  ;;  %3811 = vmatprep.subr.bf16.mxu0 %v4011_v46 }
 0x2c7   :  { %3790 = vmatpush3.bf16.msra.mxu1 %v3996_v52  ;;  %3235 = vmatprep.mubr.bf16.mxu1 %v2677_v54 }
 0x2c8   :  { %3791 = vmatprep.subr.bf16.mxu1 %v3997_v45  ;;  %3812 = vmatpush3.bf16.msra.mxu0 %v4012_v53 }
 0x2c9   :  { %3813 = vmatprep.subr.bf16.mxu0 %v4013_v55 }
 0x2cb   :  { %3792 = vmatpush3.bf16.msra.mxu1 %v3998_v57 }
 0x2cc   :  { %3793 = vmatprep.subr.bf16.mxu1 %v3999_v59  ;;  %3814 = vmatpush3.bf16.msra.mxu0 %v4014_v19  ;;  %v4038_v59 = vld [vmem:[#allocation11 + $0x1b0] sm:$0xff]   ;;  %v4039_v19 = vld [vmem:[#allocation11 + $0x1e8] sm:$0xff]  }
 0x2cd   :  { %3815 = vmatprep.subr.bf16.mxu0 %v4015_v60  ;;  %v4040_v60 = vld [vmem:[#allocation11 + $0x1a8] sm:$0xff]  }
 0x2cf   :  { %3794 = vmatpush3.bf16.msra.mxu1 %v4000_v62  ;;  %v4042_v62 = vld [vmem:[#allocation11 + $0x1a0] sm:$0xff]  }
 0x2d0   :  { %3795 = vmatprep.subr.bf16.mxu1 %v4001_v0  ;;  %3816 = vmatpush3.bf16.msra.mxu0 %v4016_v1  ;;  %v4044_v0 = vld [vmem:[#allocation11 + $0x198] sm:$0xff]   ;;  %v4045_v1 = vld [vmem:[#allocation11 + $0x1d0] sm:$0xff]  }
 0x2d1   :  { %3817 = vmatprep.subr.bf16.mxu0 %v4017_v2  ;;  %v4046_v2 = vld [vmem:[#allocation11 + $0x190] sm:$0xff]  }
 0x2d3   :  { %3796 = vmatpush3.bf16.msra.mxu1 %v4002_v4  ;;  %v4048_v4 = vld [vmem:[#allocation11 + $0x188] sm:$0xff]  }
 0x2d4   :  { %3818 = vmatpush3.bf16.msra.mxu0 %v4018_v6  ;;  %3825 = vmatprep.subr.bf16.mxu1 %v4019_v7  ;;  %v4050_v6 = vld [vmem:[#allocation11 + $0x180] sm:$0xff]   ;;  %v998_v7 = vsub.s32 4, %v4295_v17 }
 0x2d5   :  { %3847 = vmatprep.subr.bf16.mxu0 %v4035_v8  ;;  %v1002_v8 = vsub.s32 5, %v4295_v17 }
 0x2d6   :  { %3236 = vmatmul.mubr.bf16.vlgmr.msra.gmra.mxu1 %v2676_v11  ;;  %v999_v9 = vrot.slane %v4357_v12, %v998_v7 }
 0x2d7   :  { %3826 = vmatpush3.bf16.msra.mxu1 %v4020_v10  ;;  %v1003_v10 = vrot.slane %v4357_v12, %v1002_v8 }
 0x2d8   :  { %3827 = vmatprep.subr.bf16.mxu1 %v4021_v13 }
 0x2db   :  { %3828 = vmatpush3.bf16.msra.mxu1 %v4022_v14 }
 0x2dc   :  { %3829 = vmatprep.subr.bf16.mxu1 %v4023_v15 }
 0x2df   :  { %3830 = vmatpush3.bf16.msra.mxu1 %v4024_v16 }
 0x2e0   :  { %3831 = vmatprep.subr.bf16.mxu1 %v4025_v20 }
 0x2e3   :  { %3832 = vmatpush3.bf16.msra.mxu1 %v4026_v21 }
 0x2e4   :  { %3833 = vmatprep.subr.bf16.mxu1 %v4027_v22 }
 0x2e7   :  { %3834 = vmatpush3.bf16.msra.mxu1 %v4028_v23 }
 0x2e8   :  { %3835 = vmatprep.subr.bf16.mxu1 %v4029_v24 }
 0x2eb   :  { %3836 = vmatpush3.bf16.msra.mxu1 %v4030_v25 }
 0x2ec   :  { %3837 = vmatprep.subr.bf16.mxu1 %v4031_v26 }
 0x2ef   :  { %3838 = vmatpush3.bf16.msra.mxu1 %v4032_v29 }
 0x2f0   :  { %3839 = vmatprep.subr.bf16.mxu1 %v4033_v27 }
 0x2f3   :  { %3840 = vmatpush3.bf16.msra.mxu1 %v4034_v18 }
 0x2f6   :  { %v2420_v31 = vpop.f32.mrf.mxu1  ;;  %v2463_v34 = vpop.f32.mrf.mxu0 }
 0x2f7   :  { %v2421_v30 = vadd.f32 %v2420_v31, %v991_v28 }
 0x2f8   :  { %v2422_v32 = vpop.f32.mrf.mxu1  ;;  %v2465_v35 = vpop.f32.mrf.mxu0 }
 0x2f9   :  { %v2423_v36 = vadd.f32 %v2422_v32, %v995_v33  ;;  %v2464_v41 = vadd.f32 %v2463_v34, %v2421_v30 }
 0x2fa   :  { %v2424_v37 = vpop.f32.mrf.mxu1  ;;  %v2467_v38 = vpop.f32.mrf.mxu0 }
 0x2fb   :  { %v2466_v39 = vadd.f32 %v2465_v35, %v2423_v36  ;;  %v2425_v40 = vadd.f32 %v2424_v37, %v991_v28  ;;  %v2646_v52 = vmul.f32 0.01, %v2464_v41 }
 0x2fc   :  { %v2426_v42 = vpop.f32.mrf.mxu1  ;;  %v2469_v47 = vpop.f32.mrf.mxu0 }
 0x2fd   :  { %v2468_v43 = vadd.f32 %v2467_v38, %v2425_v40  ;;  %v2427_v46 = vadd.f32 %v2426_v42, %v995_v33  ;;  %v2647_v49 = vmul.f32 0.01, %v2466_v39  ;;  %v2662_v54 = vmax.f32 %v2464_v41, %v2646_v52 }
 0x2fe   :  { %v1006_v40 = vsub.s32 6, %v4295_v17  ;;  %v1010_v41 = vsub.s32 7, %v4295_v17 }
 0x2ff   :  { %v2654_v50 = vmul.f32 0.01, %v2468_v43  ;;  %v2470_v51 = vadd.f32 %v2469_v47, %v2427_v46  ;;  %v2663_v45 = vmax.f32 %v2466_v39, %v2647_v49 }
 0x300   :  { %v1007_v42 = vrot.slane %v4357_v12, %v1006_v40 }
 0x301   :  { %v2655_v48 = vmul.f32 0.01, %v2470_v51  ;;  %v2670_v44 = vmax.f32 %v2468_v43, %v2654_v50  ;;  %v1011_v43 = vrot.slane %v4357_v12, %v1010_v41 }
 0x303   :  { %v2671_v53 = vmax.f32 %v2470_v51, %v2655_v48  ;;  %v2678_v57 = vpack.c.bf16 %v2670_v44, %v2662_v54 }
 0x305   :  { %v2679_v55 = vpack.c.bf16 %v2671_v53, %v2663_v45 }
 0x307   :  { %3276 = vmatprep.mubr.bf16.mxu0 %v2679_v55 }
 0x308   :  { %3277 = vmatmul.mubr.bf16.vlgmr.msra.gmra.mxu0 %v2678_v57 }
 0x309   :  { %3848 = vmatpush3.bf16.msra.mxu0 %v4036_v56 }
 0x30a   :  { %3849 = vmatprep.subr.bf16.mxu0 %v4037_v58 }
 0x30d   :  { %3850 = vmatpush3.bf16.msra.mxu0 %v4038_v59 }
 0x30e   :  { %3851 = vmatprep.subr.bf16.mxu0 %v4039_v19 }
 0x311   :  { %3852 = vmatpush3.bf16.msra.mxu0 %v4040_v60 }
 0x312   :  { %3853 = vmatprep.subr.bf16.mxu0 %v4041_v61 }
 0x315   :  { %3854 = vmatpush3.bf16.msra.mxu0 %v4042_v62 }
 0x316   :  { %3855 = vmatprep.subr.bf16.mxu0 %v4043_v63 }
 0x319   :  { %3856 = vmatpush3.bf16.msra.mxu0 %v4044_v0 }
 0x31a   :  { %3857 = vmatprep.subr.bf16.mxu0 %v4045_v1 }
 0x31d   :  { %3858 = vmatpush3.bf16.msra.mxu0 %v4046_v2 }
 0x31e   :  { %3859 = vmatprep.subr.bf16.mxu0 %v4047_v3 }
 0x321   :  { %3860 = vmatpush3.bf16.msra.mxu0 %v4048_v4 }
 0x322   :  { %3861 = vmatprep.subr.bf16.mxu0 %v4049_v5 }
 0x325   :  { %3862 = vmatpush3.bf16.msra.mxu0 %v4050_v6 }
 0x336   :  { %v2506_v11 = vpop.f32.mrf.mxu1 }
 0x337   :  { %v2549_v13 = vpop.f32.mrf.mxu0  ;;  %v2507_v14 = vadd.f32 %v2506_v11, %v999_v9 }
 0x338   :  { %v2508_v15 = vpop.f32.mrf.mxu1 }
 0x339   :  { %v2509_v16 = vadd.f32 %v2508_v15, %v1003_v10  ;;  %v2551_v20 = vpop.f32.mrf.mxu0  ;;  %v2550_v25 = vadd.f32 %v2549_v13, %v2507_v14  ;;  %v3716_v14 = vld [vmem:[%s4396_s8] ss:$0 sm:$0xff]  ;;  %s4220_s8 = smov [#allocation13]  }
 0x33a   :  { %v2510_v21 = vpop.f32.mrf.mxu1  ;;  %s3376_s1 = sshll.u32 %s4220_s8, 4  ;;  %s3377_s1 = int_to_ptr.vmem [resolvable:$true] %s3376_s1 }
 0x33b   :  { %v2552_v22 = vadd.f32 %v2551_v20, %v2509_v16  ;;  %v2511_v23 = vadd.f32 %v2510_v21, %v999_v9  ;;  %v2553_v24 = vpop.f32.mrf.mxu0  ;;  %v2648_v34 = vmul.f32 0.01, %v2550_v25  ;;  %s4175_s26 = scalar_lea.vmem %s3377_s1, 256  ;;  %p4180_p3 = scmp.lt.s32.totalorder %s3377_s1, %s3377_s1 }
 0x33c   :  { %v2512_v26 = vpop.f32.mrf.mxu1  ;;  %p4176_p2 = scmp.ne.s32.totalorder %s3377_s1, %s4175_s26  ;;  %p4181_p4 = scmp.lt.s32.totalorder %s4175_s26, %s4175_s26 }
 0x33d   :  { %v2554_v29 = vadd.f32 %v2553_v24, %v2511_v23  ;;  %v2513_v27 = vadd.f32 %v2512_v26, %v1003_v10  ;;  %v2555_v18 = vpop.f32.mrf.mxu0  ;;  %v2649_v28 = vmul.f32 0.01, %v2552_v22  ;;  %v2664_v37 = vmax.f32 %v2550_v25, %v2648_v34 }
 0x33e   :  { %p4182_p5 = por %p4181_p4, %p4180_p3 }
 0x33f   :  { %v2656_v33 = vmul.f32 0.01, %v2554_v29  ;;  %v2556_v31 = vadd.f32 %v2555_v18, %v2513_v27  ;;  %v2665_v35 = vmax.f32 %v2552_v22, %v2649_v28 }
 0x340   :  { %p4183_p6 = pnand %p4182_p5, %p4176_p2 }
 0x341   :  { %v2657_v30 = vmul.f32 0.01, %v2556_v31  ;;  %v2672_v32 = vmax.f32 %v2554_v29, %v2656_v33 }
 0x343   :  { %v2673_v36 = vmax.f32 %v2556_v31, %v2657_v30  ;;  %v2680_v39 = vpack.c.bf16 %v2672_v32, %v2664_v37 }
 0x345   :  { %v2681_v38 = vpack.c.bf16 %v2673_v36, %v2665_v35 }
 0x347   :  { %3317 = vmatprep.mubr.bf16.mxu1 %v2681_v38 }
 0x348   :  { %3318 = vmatmul.mubr.bf16.vlgmr.msra.gmra.mxu1 %v2680_v39 }
 0x376   :  { %v2592_v46 = vpop.f32.mrf.mxu1 }
 0x377   :  { %v2635_v47 = vpop.f32.mrf.mxu0  ;;  %v2593_v49 = vadd.f32 %v2592_v46, %v1007_v42 }
 0x378   :  { %v2594_v50 = vpop.f32.mrf.mxu1 }
 0x379   :  { %v2595_v51 = vadd.f32 %v2594_v50, %v1011_v43  ;;  %v2637_v52 = vpop.f32.mrf.mxu0  ;;  %v2636_v54 = vadd.f32 %v2635_v47, %v2593_v49 }
 0x37a   :  { %v2596_v48 = vpop.f32.mrf.mxu1 }
 0x37b   :  { %v2638_v44 = vadd.f32 %v2637_v52, %v2595_v51  ;;  %v2597_v45 = vadd.f32 %v2596_v48, %v1007_v42  ;;  %v2639_v53 = vpop.f32.mrf.mxu0  ;;  %v2650_v60 = vmul.f32 0.01, %v2636_v54 }
 0x37c   :  { %v2598_v55 = vpop.f32.mrf.mxu1 }
 0x37d   :  { %v2640_v56 = vadd.f32 %v2639_v53, %v2597_v45  ;;  %v2599_v57 = vadd.f32 %v2598_v55, %v1011_v43  ;;  %v2641_v58 = vpop.f32.mrf.mxu0  ;;  %v2651_v17 = vmul.f32 0.01, %v2638_v44  ;;  %v2666_v0 = vmax.f32 %v2636_v54, %v2650_v60 }
 0x37f   :  { %v2658_v59 = vmul.f32 0.01, %v2640_v56  ;;  %v2642_v19 = vadd.f32 %v2641_v58, %v2599_v57  ;;  %v2667_v62 = vmax.f32 %v2638_v44, %v2651_v17 }
 0x381   :  { %v2659_v12 = vmul.f32 0.01, %v2642_v19  ;;  %v2674_v61 = vmax.f32 %v2640_v56, %v2658_v59 }
 0x383   :  { %v2675_v63 = vmax.f32 %v2642_v19, %v2659_v12  ;;  %v2682_v2 = vpack.c.bf16 %v2674_v61, %v2666_v0 }
 0x385   :  { %v2683_v1 = vpack.c.bf16 %v2675_v63, %v2667_v62 }
 0x387   :  { %3358 = vmatprep.mubr.bf16.mxu0 %v2683_v1 }
 0x388   :  { %3359 = vmatmul.mubr.bf16.vlgmr.msra.gmra.mxu0 %v2682_v2 }
 0x396   :  { %v3797_v3 = vpop.f32.mrf.mxu1 }
 0x398   :  { %v3798_v4 = vpop.f32.mrf.mxu1 }
 0x399   :  { %v3799_v13 = vadd.f32 %v3798_v4, %v3797_v3 }
 0x39a   :  { %v3800_v5 = vpop.f32.mrf.mxu1 }
 0x39b   :  { %v3238_v21 = vadd.f32 %v3799_v13, %v3716_v14 }
 0x39c   :  { %v3801_v6 = vpop.f32.mrf.mxu1 }
 0x39d   :  { %v3802_v22 = vadd.f32 %v3801_v6, %v3800_v5 }
 0x39f   :  { %v3241_v18 = vadd.f32 %v3802_v22, %v3716_v14 }
 0x3c8   :  { %v3819_v7 = vpop.f32.mrf.mxu0 }
 0x3ca   :  { %v3820_v9 = vpop.f32.mrf.mxu0 }
 0x3cb   :  { %v3821_v16 = vadd.f32 %v3820_v9, %v3819_v7 }
 0x3cc   :  { %v3822_v11 = vpop.f32.mrf.mxu0 }
 0x3cd   :  { %v3279_v26 = vadd.f32 %v3821_v16, %v3238_v21 }
 0x3ce   :  { %v3823_v20 = vpop.f32.mrf.mxu0 }
 0x3cf   :  { %v3824_v29 = vadd.f32 %v3823_v20, %v3822_v11 }
 0x3d1   :  { %v3282_v30 = vadd.f32 %v3824_v29, %v3241_v18 }
 0x408   :  { %v3841_v8 = vpop.f32.mrf.mxu1 }
 0x40a   :  { %v3842_v10 = vpop.f32.mrf.mxu1 }
 0x40b   :  { %v3843_v23 = vadd.f32 %v3842_v10, %v3841_v8 }
 0x40c   :  { %v3844_v15 = vpop.f32.mrf.mxu1 }
 0x40d   :  { %v3320_v28 = vadd.f32 %v3843_v23, %v3279_v26 }
 0x40e   :  { %v3845_v24 = vpop.f32.mrf.mxu1 }
 0x40f   :  { %v3846_v33 = vadd.f32 %v3845_v24, %v3844_v15 }
 0x411   :  { %v3323_v36 = vadd.f32 %v3846_v33, %v3282_v30 }
 0x448   :  { %v3863_v25 = vpop.f32.mrf.mxu0 }
 0x44a   :  { %v3864_v27 = vpop.f32.mrf.mxu0 }
 0x44b   :  { %v3865_v31 = vadd.f32 %v3864_v27, %v3863_v25 }
 0x44c   :  { %v3866_v34 = vpop.f32.mrf.mxu0 }
 0x44d   :  { %v3361_v32 = vadd.f32 %v3865_v31, %v3320_v28 }
 0x44e   :  { %v3867_v35 = vpop.f32.mrf.mxu0 }
 0x44f   :  { %4051 = vtanh.f32 %v3361_v32  ;;  %v3868_v37 = vadd.f32 %v3867_v35, %v3866_v34 }
 0x451   :  { %v3364_v38 = vadd.f32 %v3868_v37, %v3323_v36 }
 0x453   :  { %4053 = vtanh.f32 %v3364_v38 }
 0x45c   :  { %v4052_v39 = vpop.eup %4051 }
 0x45d   :  { %3369 = vst [vmem:[#allocation13] sm:$0xff] %v4052_v39 }
 0x460   :  { %v4054_v40 = vpop.eup %4053 }
 0x461   :  { %3370 = vst [vmem:[#allocation13 + $0x8] sm:$0xff] %v4054_v40 }
 0x462   :  { %4186 = shalt.err (!%p4183_p6)
}
 0x463   :  { %3382 = dma.vmem_to_hbm [thread:$0]  %s3377_s1, 256, %s4397_s9, [#allocation4], %s4207_s14, %s4207_s14, %s4208_s15  }
 0x464   :  { %4203 = dma.done.wait [#allocation4], 256  }
 0x465   :  { %4204 = vsyncadd [#allocation4], 4294967040 }
 0x466   :  { %3386 = vsyncpa [#allocation3], 1 }
 0x467   :  { %3387 = vsyncpa [#allocation6], 1 }
 0x468   :  { %3388 = vsyncpa [#allocation9], 1 }
 0x469   :  { %3389 = vsyncpa [#allocation12], 1 }
 0x46a   :  { %3390 = vsyncpa [#allocation4], 1 }

// kernel: tpu_custom_call.1
= control target key start
LH: loop header
LB: loop body
LE: loop exit
PB: predicated region body
PF: predicated region fallthrough
CT: control target
= control target key end

     0   :  { %14 = vsyncpa [#allocation3], 0  ;;  %s4388_s0 = inlined_call_operand.hbm [shape: f32[16,32], index: 0, kind: input, shape index: {}]   ;;  %s4389_s1 = inlined_call_operand.hbm [shape: bf16[32,256], index: 1, kind: input, shape index: {}]   ;;  %s4390_s2 = inlined_call_operand.vmem [shape: f32[1,256], index: 2, kind: input, shape index: {}]   ;;  %s4391_s3 = inlined_call_operand.hbm [shape: bf16[256,512], index: 3, kind: input, shape index: {}]   ;;  %s4392_s4 = inlined_call_operand.hbm [shape: f32[1,512], index: 4, kind: input, shape index: {}]   ;;  %s4393_s5 = inlined_call_operand.hbm [shape: bf16[512,1024], index: 5, kind: input, shape index: {}]   ;;  %s4394_s6 = inlined_call_operand.vmem [shape: f32[1,1024], index: 6, kind: input, shape index: {}]   ;;  %s4395_s7 = inlined_call_operand.hbm [shape: bf16[1024,128], index: 7, kind: input, shape index: {}]   ;;  %s4396_s8 = inlined_call_operand.vmem [shape: f32[1,128], index: 8, kind: input, shape index: {}]   ;;  %s4397_s9 = inlined_call_operand.hbm [shape: f32[16,128], index: 9, kind: output, shape index: {}]  }
   0x1   :  { %15 = vsyncpa [#allocation6], 0 }
   0x2   :  { %16 = vsyncpa [#allocation9], 0 }
   0x3   :  { %17 = vsyncpa [#allocation12], 0 }
   0x4   :  { %18 = vsyncpa [#allocation4], 0  ;;  %s4205_s30 = smov [#allocation5]   ;;  %s4206_s11 = smov [#allocation8]  }
   0x5   :  { %s36_s10 = sshll.u32 %s4205_s30, 4  ;;  %s63_s12 = sshll.u32 %s4206_s11, 4  ;;  %s37_s10 = int_to_ptr.vmem [resolvable:$true] %s36_s10  ;;  %s64_s12 = int_to_ptr.vmem [resolvable:$true] %s63_s12 }
   0x6   :  { %s4063_s13 = scalar_lea.vmem %s37_s10, 512  ;;  %p4068_p1 = scmp.lt.s32.totalorder %s37_s10, %s37_s10 }
   0x7   :  { %p4064_p0 = scmp.ne.s32.totalorder %s37_s10, %s4063_s13  ;;  %p4069_p2 = scmp.lt.s32.totalorder %s4063_s13, %s4063_s13 }
   0x9   :  { %p4070_p3 = por %p4069_p2, %p4068_p1 }
   0xb   :  { %p4071_p4 = pnand %p4070_p3, %p4064_p0 }
   0xd   :  { %4074 = shalt.err (!%p4071_p4)
}
   0xe   :  { %s4207_s14 = smov 128   ;;  %s4208_s15 = smov 8  }
   0xf   :  { %42 = dma.hbm_to_vmem [thread:$0]  %s4389_s1, 512, %s37_s10, [#allocation6], %s4207_s14, %s4207_s14, %s4208_s15  }
  0x10   :  { %s4083_s18 = scalar_lea.vmem %s64_s12, 64  ;;  %p4088_p6 = scmp.lt.s32.totalorder %s64_s12, %s64_s12 }
  0x11   :  { %p4084_p5 = scmp.ne.s32.totalorder %s64_s12, %s4083_s18  ;;  %p4089_p7 = scmp.lt.s32.totalorder %s4083_s18, %s4083_s18 }
  0x13   :  { %p4090_p8 = por %p4089_p7, %p4088_p6 }
  0x15   :  { %p4091_p9 = pnand %p4090_p8, %p4084_p5 }
  0x17   :  { %4094 = shalt.err (!%p4091_p9)
}
  0x18   :  { %66 = dma.hbm_to_vmem [thread:$0]  %s4392_s4, 64, %s64_s12, [#allocation9]  }
  0x19   :  { %s4209_s21 = smov [#allocation2]   ;;  %s4210_s23 = smov [#allocation7]  }
  0x1a   :  { %s24_s22 = sshll.u32 %s4209_s21, 4  ;;  %s50_s24 = sshll.u32 %s4210_s23, 4  ;;  %s25_s22 = int_to_ptr.vmem [resolvable:$true] %s24_s22  ;;  %s51_s24 = int_to_ptr.vmem [resolvable:$true] %s50_s24 }
  0x1b   :  { %s4103_s25 = scalar_lea.vmem %s25_s22, 256  ;;  %p4108_p11 = scmp.lt.s32.totalorder %s25_s22, %s25_s22 }
  0x1c   :  { %p4104_p10 = scmp.ne.s32.totalorder %s25_s22, %s4103_s25  ;;  %p4109_p12 = scmp.lt.s32.totalorder %s4103_s25, %s4103_s25 }
  0x1e   :  { %p4110_p13 = por %p4109_p12, %p4108_p11 }
  0x20   :  { %p4111_p0 = pnand %p4110_p13, %p4104_p10 }
  0x22   :  { %4114 = shalt.err (!%p4111_p0)
}
  0x23   :  { %30 = dma.hbm_to_vmem [thread:$0]  %s4388_s0, 256, %s25_s22, [#allocation3], %s4207_s14, %s4207_s14, %s4208_s15  }
  0x24   :  { %s4123_s4 = scalar_lea.vmem %s51_s24, 8192  ;;  %p4128_p2 = scmp.lt.s32.totalorder %s51_s24, %s51_s24 }
  0x25   :  { %p4124_p1 = scmp.ne.s32.totalorder %s51_s24, %s4123_s4  ;;  %p4129_p3 = scmp.lt.s32.totalorder %s4123_s4, %s4123_s4 }
  0x27   :  { %p4130_p4 = por %p4129_p3, %p4128_p2 }
  0x29   :  { %p4131_p5 = pnand %p4130_p4, %p4124_p1 }
  0x2b   :  { %4134 = shalt.err (!%p4131_p5)
}
  0x2c   :  { %s4211_s27 = smov 256   ;;  %s4212_s28 = smov 16  }
  0x2d   :  { %56 = dma.hbm_to_vmem [thread:$0]  %s4391_s3, 8192, %s51_s24, [#allocation6], %s4211_s27, %s4211_s27, %s4212_s28  }
  0x2e   :  { %s4213_s10 = smov [#allocation10]  }
  0x2f   :  { %s72_s11 = sshll.u32 %s4213_s10, 4  ;;  %s73_s11 = int_to_ptr.vmem [resolvable:$true] %s72_s11 }
  0x30   :  { %s4143_s12 = scalar_lea.vmem %s73_s11, 32768  ;;  %p4148_p7 = scmp.lt.s32.totalorder %s73_s11, %s73_s11 }
  0x31   :  { %p4144_p6 = scmp.ne.s32.totalorder %s73_s11, %s4143_s12  ;;  %p4149_p8 = scmp.lt.s32.totalorder %s4143_s12, %s4143_s12 }
  0x33   :  { %p4150_p9 = por %p4149_p8, %p4148_p7 }
  0x35   :  { %p4151_p10 = pnand %p4150_p9, %p4144_p6 }
  0x37   :  { %4154 = shalt.err (!%p4151_p10)
}
  0x38   :  { %s4214_s0 = smov 512   ;;  %s4215_s13 = smov 32  }
  0x39   :  { %78 = dma.hbm_to_vmem [thread:$0]  %s4393_s5, 32768, %s73_s11, [#allocation9], %s4214_s0, %s4214_s0, %s4215_s13  }
  0x3a   :  { %s4216_s18 = smov [#allocation11]  }
  0x3b   :  { %s86_s19 = sshll.u32 %s4216_s18, 4  ;;  %s87_s19 = int_to_ptr.vmem [resolvable:$true] %s86_s19 }
  0x3c   :  { %s4163_s3 = scalar_lea.vmem %s87_s19, 8192  ;;  %p4168_p12 = scmp.lt.s32.totalorder %s87_s19, %s87_s19 }
  0x3d   :  { %p4164_p11 = scmp.ne.s32.totalorder %s87_s19, %s4163_s3  ;;  %p4169_p13 = scmp.lt.s32.totalorder %s4163_s3, %s4163_s3 }
  0x3f   :  { %p4170_p0 = por %p4169_p13, %p4168_p12 }
  0x41   :  { %p4171_p1 = pnand %p4170_p0, %p4164_p11 }
  0x43   :  { %4174 = shalt.err (!%p4171_p1)
}
  0x44   :  { %s4217_s20 = smov 64   ;;  %s4218_s21 = smov 4  }
  0x45   :  { %92 = dma.hbm_to_vmem [thread:$0]  %s4395_s7, 8192, %s87_s19, [#allocation12], %s4217_s20, %s4217_s20, %s4218_s21  }
  0x46   :  { %4195 = dma.done.wait [#allocation3], 256  }
  0x47   :  { %4196 = vsyncadd [#allocation3], 4294967040 }
  0x48   :  { %4197 = dma.done.wait [#allocation6], 8704  }
  0x49   :  { %4198 = vsyncadd [#allocation6], 4294958592 }
  0x4a   :  { %4199 = dma.done.wait [#allocation9], 32832  }
  0x4b   :  { %4200 = vsyncadd [#allocation9], 4294934464 }
  0x4c   :  { %4201 = dma.done.wait [#allocation12], 8192  }
  0x4d   :  { %4202 = vsyncadd [#allocation12], 4294959104  ;;  %v4219_v0 = vmov 0   ;;  %v3885_v1 = vld [vmem:[#allocation5 + $0x14] ss:$8 sps:$4 sm:$0xff]   ;;  %vm153_vm0 = vcmask 261120  }
  0x4e   :  { %189 = vmatprep.mubr.bf16.mxu0 %v4219_v0  ;;  %v3887_v2 = vld [vmem:[#allocation5 + $0x10] ss:$8 sps:$4 sm:$0xff]   ;;  %169 = vmatprep.subr.bf16.mxu0 %v3885_v1  ;;  %v3888_v3 = vld [vmem:[#allocation5 + $0x4] ss:$8 sps:$4 sm:$0xff]   ;;  %v3890_v4 = vld [vmem:[#allocation5] ss:$8 sps:$4 sm:$0xff]  }
  0x4f   :  { %v114_v5 = vld [vmem:[#allocation2] sm:$0xff]  ;;  %170 = vmatpush1.bf16.msra.mxu0 %v3887_v2  ;;  %v115_v6 = vld [vmem:[#allocation2 + $0x8] sm:$0xff] }
  0x50   :  { %171 = vmatprep.subr.bf16.mxu0 %v3888_v3  ;;  %v3891_v7 = vld [vmem:[#allocation7 + $0xe4] ss:$16 sps:$4 sm:$0xff]   ;;  %v3895_v8 = vld [vmem:[#allocation7 + $0xec] ss:$16 sps:$4 sm:$0xff]   ;;  %v3896_v9 = vld [vmem:[#allocation7 + $0xe0] ss:$16 sps:$4 sm:$0xff]   ;;  %v116_v10 = vpack.c.bf16 %v115_v6, %v114_v5 }
  0x51   :  { %616 = vmatprep.subr.bf16.mxu1 %v3891_v7  ;;  %v3897_v11 = vld [vmem:[#allocation7 + $0xc4] ss:$16 sps:$4 sm:$0xff]   ;;  %v3893_v12 = vld [vmem:[#allocation7 + $0xe8] ss:$16 sps:$4 sm:$0xff]   ;;  %v3901_v13 = vld [vmem:[#allocation7 + $0xcc] ss:$16 sps:$4 sm:$0xff]  }
  0x52   :  { %617 = vmatpush1.bf16.msra.mxu1 %v3896_v9  ;;  %v3902_v14 = vld [vmem:[#allocation7 + $0xc0] ss:$16 sps:$4 sm:$0xff]   ;;  %v3903_v15 = vld [vmem:[#allocation7 + $0xa4] ss:$16 sps:$4 sm:$0xff]   ;;  %v3899_v16 = vld [vmem:[#allocation7 + $0xc8] ss:$16 sps:$4 sm:$0xff]  }
  0x53   :  { %172 = vmatpush1.bf16.msra.mxu0 %v3890_v4  ;;  %618 = vmatprep.subr.bf16.mxu1 %v3897_v11  ;;  %v3907_v17 = vld [vmem:[#allocation7 + $0xac] ss:$16 sps:$4 sm:$0xff]   ;;  %v3908_v18 = vld [vmem:[#allocation7 + $0xa0] ss:$16 sps:$4 sm:$0xff]   ;;  %v3909_v19 = vld [vmem:[#allocation7 + $0x84] ss:$16 sps:$4 sm:$0xff]  }
  0x54   :  { %659 = vmatprep.subr.bf16.mxu0 %v3895_v8  ;;  %v3905_v20 = vld [vmem:[#allocation7 + $0xa8] ss:$16 sps:$4 sm:$0xff]   ;;  %v3914_v21 = vld [vmem:[#allocation7 + $0x80] ss:$16 sps:$4 sm:$0xff]   ;;  %v3913_v22 = vld [vmem:[#allocation7 + $0x8c] ss:$16 sps:$4 sm:$0xff]  }
  0x55   :  { %v3915_v23 = vld [vmem:[#allocation7 + $0x64] ss:$16 sps:$4 sm:$0xff]   ;;  %v3911_v24 = vld [vmem:[#allocation7 + $0x88] ss:$16 sps:$4 sm:$0xff]   ;;  %v3919_v25 = vld [vmem:[#allocation7 + $0x6c] ss:$16 sps:$4 sm:$0xff]  }
  0x56   :  { %3395 = vmatmul.mubr.msk.bf16.vlgmr.msra.gmra.mxu0 %vm153_vm0, %v116_v10  ;;  %619 = vmatpush1.bf16.msra.mxu1 %v3902_v14  ;;  %v3920_v26 = vld [vmem:[#allocation7 + $0x60] ss:$16 sps:$4 sm:$0xff]   ;;  %v3921_v27 = vld [vmem:[#allocation7 + $0x44] ss:$16 sps:$4 sm:$0xff]   ;;  %v3917_v28 = vld [vmem:[#allocation7 + $0x68] ss:$16 sps:$4 sm:$0xff]  }
  0x57   :  { %660 = vmatpush1.bf16.msra.mxu0 %v3893_v12  ;;  %620 = vmatprep.subr.bf16.mxu1 %v3903_v15  ;;  %v3926_v29 = vld [vmem:[#allocation7 + $0x40] ss:$16 sps:$4 sm:$0xff]   ;;  %v3925_v30 = vld [vmem:[#allocation7 + $0x4c] ss:$16 sps:$4 sm:$0xff]   ;;  %v3927_v31 = vld [vmem:[#allocation7 + $0x24] ss:$16 sps:$4 sm:$0xff]  }
  0x58   :  { %661 = vmatprep.subr.bf16.mxu0 %v3901_v13  ;;  %v3923_v32 = vld [vmem:[#allocation7 + $0x48] ss:$16 sps:$4 sm:$0xff]   ;;  %v3931_v33 = vld [vmem:[#allocation7 + $0x2c] ss:$16 sps:$4 sm:$0xff]   ;;  %v3932_v34 = vld [vmem:[#allocation7 + $0x20] ss:$16 sps:$4 sm:$0xff]  }
  0x59   :  { %v3933_v35 = vld [vmem:[#allocation7 + $0x4] ss:$16 sps:$4 sm:$0xff]   ;;  %v3929_v36 = vld [vmem:[#allocation7 + $0x28] ss:$16 sps:$4 sm:$0xff]   ;;  %v3938_v37 = vld [vmem:[#allocation7] ss:$16 sps:$4 sm:$0xff]  }
  0x5a   :  { %621 = vmatpush1.bf16.msra.mxu1 %v3908_v18  ;;  %v3937_v38 = vld [vmem:[#allocation7 + $0xc] ss:$16 sps:$4 sm:$0xff]   ;;  %v3939_v39 = vld [vmem:[#allocation7 + $0x1e4] ss:$16 sps:$4 sm:$0xff]   ;;  %v3935_v40 = vld [vmem:[#allocation7 + $0x8] ss:$16 sps:$4 sm:$0xff]  }
  0x5b   :  { %662 = vmatpush1.bf16.msra.mxu0 %v3899_v16  ;;  %622 = vmatprep.subr.bf16.mxu1 %v3909_v19  ;;  %v3943_v41 = vld [vmem:[#allocation7 + $0x1ec] ss:$16 sps:$4 sm:$0xff]   ;;  %v3944_v42 = vld [vmem:[#allocation7 + $0x1e0] ss:$16 sps:$4 sm:$0xff]   ;;  %v3945_v43 = vld [vmem:[#allocation7 + $0x1c4] ss:$16 sps:$4 sm:$0xff]   ;;  %v123_v16 = vlaneseq }
  0x5c   :  { %663 = vmatprep.subr.bf16.mxu0 %v3907_v17  ;;  %v3941_v44 = vld [vmem:[#allocation7 + $0x1e8] ss:$16 sps:$4 sm:$0xff]   ;;  %v3950_v45 = vld [vmem:[#allocation7 + $0x1c0] ss:$16 sps:$4 sm:$0xff]   ;;  %v3949_v46 = vld [vmem:[#allocation7 + $0x1cc] ss:$16 sps:$4 sm:$0xff]  }
  0x5d   :  { %v3951_v47 = vld [vmem:[#allocation7 + $0x1a4] ss:$16 sps:$4 sm:$0xff]   ;;  %v3947_v48 = vld [vmem:[#allocation7 + $0x1c8] ss:$16 sps:$4 sm:$0xff]   ;;  %v3956_v49 = vld [vmem:[#allocation7 + $0x1a0] ss:$16 sps:$4 sm:$0xff]  }
  0x5e   :  { %623 = vmatpush1.bf16.msra.mxu1 %v3914_v21  ;;  %v3955_v50 = vld [vmem:[#allocation7 + $0x1ac] ss:$16 sps:$4 sm:$0xff]   ;;  %v3957_v51 = vld [vmem:[#allocation7 + $0x184] ss:$16 sps:$4 sm:$0xff]   ;;  %v3953_v52 = vld [vmem:[#allocation7 + $0x1a8] ss:$16 sps:$4 sm:$0xff]  }
  0x5f   :  { %664 = vmatpush1.bf16.msra.mxu0 %v3905_v20  ;;  %624 = vmatprep.subr.bf16.mxu1 %v3915_v23  ;;  %v3962_v53 = vld [vmem:[#allocation7 + $0x180] ss:$16 sps:$4 sm:$0xff]   ;;  %v3961_v54 = vld [vmem:[#allocation7 + $0x18c] ss:$16 sps:$4 sm:$0xff]   ;;  %v3959_v55 = vld [vmem:[#allocation7 + $0x188] ss:$16 sps:$4 sm:$0xff]  }
  0x60   :  { %665 = vmatprep.subr.bf16.mxu0 %v3913_v22  ;;  %v3963_v56 = vld [vmem:[#allocation7 + $0x164] ss:$16 sps:$4 sm:$0xff]   ;;  %v3967_v57 = vld [vmem:[#allocation7 + $0x16c] ss:$16 sps:$4 sm:$0xff]   ;;  %v3965_v58 = vld [vmem:[#allocation7 + $0x168] ss:$16 sps:$4 sm:$0xff]  }
  0x61   :  { %v3968_v59 = vld [vmem:[#allocation7 + $0x160] ss:$16 sps:$4 sm:$0xff]   ;;  %v3969_v60 = vld [vmem:[#allocation7 + $0x144] ss:$16 sps:$4 sm:$0xff]   ;;  %v3973_v61 = vld [vmem:[#allocation7 + $0x14c] ss:$16 sps:$4 sm:$0xff]  }
  0x62   :  { %625 = vmatpush1.bf16.msra.mxu1 %v3920_v26  ;;  %v3971_v62 = vld [vmem:[#allocation7 + $0x148] ss:$16 sps:$4 sm:$0xff]   ;;  %v3974_v63 = vld [vmem:[#allocation7 + $0x140] ss:$16 sps:$4 sm:$0xff]   ;;  %v3975_v0 = vld [vmem:[#allocation7 + $0x124] ss:$16 sps:$4 sm:$0xff]  }
  0x63   :  { %666 = vmatpush1.bf16.msra.mxu0 %v3911_v24  ;;  %626 = vmatprep.subr.bf16.mxu1 %v3921_v27  ;;  %v3979_v1 = vld [vmem:[#allocation7 + $0x12c] ss:$16 sps:$4 sm:$0xff]   ;;  %v3977_v2 = vld [vmem:[#allocation7 + $0x128] ss:$16 sps:$4 sm:$0xff]   ;;  %v3980_v3 = vld [vmem:[#allocation7 + $0x120] ss:$16 sps:$4 sm:$0xff]  }
  0x64   :  { %667 = vmatprep.subr.bf16.mxu0 %v3919_v25  ;;  %v3981_v4 = vld [vmem:[#allocation7 + $0x104] ss:$16 sps:$4 sm:$0xff]   ;;  %v3985_v5 = vld [vmem:[#allocation7 + $0x10c] ss:$16 sps:$4 sm:$0xff]   ;;  %v3983_v6 = vld [vmem:[#allocation7 + $0x108] ss:$16 sps:$4 sm:$0xff]  }
  0x65   :  { %v3986_v7 = vld [vmem:[#allocation7 + $0x100] ss:$16 sps:$4 sm:$0xff]   ;;  %v778_v8 = vld [vmem:[#allocation10 + $0x1c0] sm:$0xff]  ;;  %v4295_v17 = vshrl.u32 %v123_v16, 7 }
  0x66   :  { %627 = vmatpush1.bf16.msra.mxu1 %v3926_v29  ;;  %v782_v9 = vld [vmem:[#allocation10 + $0x1e0] sm:$0xff]  ;;  %v121_v20 = vld [vmem:[%s4390_s2] sm:$0x3] }
  0x67   :  { %668 = vmatpush1.bf16.msra.mxu0 %v3917_v28  ;;  %628 = vmatprep.subr.bf16.mxu1 %v3927_v31  ;;  %v906_v10 = vld [vmem:[#allocation10 + $0x5c0] sm:$0xff]  ;;  %v3516_v11 = vcombine.low %v778_v8, %v782_v9  ;;  %v3517_v12 = vcombine.high %v778_v8, %v782_v9  ;;  %v4298_v18 = vsub.s32 1, %v4295_v17  ;;  %v4301_v19 = vsub.s32 0, %v4295_v17 }
  0x68   :  { %669 = vmatprep.subr.bf16.mxu0 %v3925_v30  ;;  %v910_v13 = vld [vmem:[#allocation10 + $0x5e0] sm:$0xff] }
  0x69   :  { %v3644_v14 = vcombine.low %v906_v10, %v910_v13  ;;  %v3645_v15 = vcombine.high %v906_v10, %v910_v13  ;;  %v130_v21 = vrot.slane %v121_v20, %v4298_v18  ;;  %v126_v22 = vrot.slane %v121_v20, %v4301_v19  ;;  %v742_v8 = vld [vmem:[#allocation10 + $0xa0] sm:$0xff] }
  0x6a   :  { %629 = vmatpush1.bf16.msra.mxu1 %v3932_v34  ;;  %v866_v9 = vld [vmem:[#allocation10 + $0x480] sm:$0xff] }
  0x6b   :  { %670 = vmatpush1.bf16.msra.mxu0 %v3923_v32  ;;  %630 = vmatprep.subr.bf16.mxu1 %v3933_v35  ;;  %v870_v10 = vld [vmem:[#allocation10 + $0x4a0] sm:$0xff] }
  0x6c   :  { %671 = vmatprep.subr.bf16.mxu0 %v3931_v33  ;;  %v734_v16 = vld [vmem:[#allocation10 + $0x60] sm:$0xff] }
  0x6d   :  { %v858_v20 = vld [vmem:[#allocation10 + $0x440] sm:$0xff] }
  0x6e   :  { %631 = vmatpush1.bf16.msra.mxu1 %v3938_v37 }
  0x6f   :  { %672 = vmatpush1.bf16.msra.mxu0 %v3929_v36  ;;  %632 = vmatprep.subr.bf16.mxu1 %v3939_v39  ;;  %v770_v36 = vld [vmem:[#allocation10 + $0x180] sm:$0xff] }
  0x70   :  { %673 = vmatprep.subr.bf16.mxu0 %v3937_v38  ;;  %v774_v39 = vld [vmem:[#allocation10 + $0x1a0] sm:$0xff] }
  0x72   :  { %633 = vmatpush2.bf16.msra.mxu1 %v3944_v42 }
  0x73   :  { %674 = vmatpush1.bf16.msra.mxu0 %v3935_v40  ;;  %634 = vmatprep.subr.bf16.mxu1 %v3945_v43  ;;  %v898_v40 = vld [vmem:[#allocation10 + $0x580] sm:$0xff] }
  0x74   :  { %675 = vmatprep.subr.bf16.mxu0 %v3943_v41  ;;  %v902_v41 = vld [vmem:[#allocation10 + $0x5a0] sm:$0xff] }
  0x76   :  { %635 = vmatpush2.bf16.msra.mxu1 %v3950_v45  ;;  %v3509_v45 = vcombine.high %v770_v36, %v774_v39 }
  0x77   :  { %676 = vmatpush2.bf16.msra.mxu0 %v3941_v44  ;;  %636 = vmatprep.subr.bf16.mxu1 %v3951_v47  ;;  %v762_v47 = vld [vmem:[#allocation10 + $0x140] sm:$0xff] }
  0x78   :  { %677 = vmatprep.subr.bf16.mxu0 %v3949_v46  ;;  %v3637_v46 = vcombine.high %v898_v40, %v902_v41 }
  0x7a   :  { %637 = vmatpush2.bf16.msra.mxu1 %v3956_v49  ;;  %v890_v49 = vld [vmem:[#allocation10 + $0x540] sm:$0xff] }
  0x7b   :  { %678 = vmatpush2.bf16.msra.mxu0 %v3947_v48  ;;  %638 = vmatprep.subr.bf16.mxu1 %v3957_v51  ;;  %v766_v48 = vld [vmem:[#allocation10 + $0x160] sm:$0xff]  ;;  %v3508_v51 = vcombine.low %v770_v36, %v774_v39 }
  0x7c   :  { %679 = vmatprep.subr.bf16.mxu0 %v3955_v50  ;;  %v894_v50 = vld [vmem:[#allocation10 + $0x560] sm:$0xff] }
  0x7d   :  { %v970_v36 = vld [vmem:[#allocation10 + $0x7c0] sm:$0xff] }
  0x7e   :  { %639 = vmatpush2.bf16.msra.mxu1 %v3962_v53  ;;  %v3501_v53 = vcombine.high %v762_v47, %v766_v48 }
  0x7f   :  { %680 = vmatpush2.bf16.msra.mxu0 %v3953_v52  ;;  %640 = vmatprep.subr.bf16.mxu1 %v3963_v56  ;;  %v3636_v52 = vcombine.low %v898_v40, %v902_v41  ;;  %v758_v56 = vld [vmem:[#allocation10 + $0x120] sm:$0xff] }
  0x80   :  { %681 = vmatprep.subr.bf16.mxu0 %v3961_v54  ;;  %v3629_v54 = vcombine.high %v890_v49, %v894_v50 }
  0x82   :  { %641 = vmatpush2.bf16.msra.mxu1 %v3968_v59  ;;  %v3500_v59 = vcombine.low %v762_v47, %v766_v48 }
  0x83   :  { %682 = vmatpush2.bf16.msra.mxu0 %v3959_v55  ;;  %642 = vmatprep.subr.bf16.mxu1 %v3969_v60  ;;  %v754_v55 = vld [vmem:[#allocation10 + $0x100] sm:$0xff]  ;;  %v3628_v60 = vcombine.low %v890_v49, %v894_v50 }
  0x84   :  { %683 = vmatprep.subr.bf16.mxu0 %v3967_v57  ;;  %v882_v57 = vld [vmem:[#allocation10 + $0x500] sm:$0xff] }
  0x85   :  { %v826_v50 = vld [vmem:[#allocation10 + $0x340] sm:$0xff] }
  0x86   :  { %643 = vmatpush2.bf16.msra.mxu1 %v3974_v63  ;;  %v746_v63 = vld [vmem:[#allocation10 + $0xc0] sm:$0xff] }
  0x87   :  { %684 = vmatpush2.bf16.msra.mxu0 %v3965_v58  ;;  %644 = vmatprep.subr.bf16.mxu1 %v3975_v0  ;;  %v886_v58 = vld [vmem:[#allocation10 + $0x520] sm:$0xff] }
  0x88   :  { %685 = vmatprep.subr.bf16.mxu0 %v3973_v61  ;;  %v3493_v61 = vcombine.high %v754_v55, %v758_v56  ;;  %v750_v0 = vld [vmem:[#allocation10 + $0xe0] sm:$0xff] }
  0x8a   :  { %645 = vmatpush2.bf16.msra.mxu1 %v3980_v3  ;;  %v3492_v3 = vcombine.low %v754_v55, %v758_v56 }
  0x8b   :  { %686 = vmatpush2.bf16.msra.mxu0 %v3971_v62  ;;  %646 = vmatprep.subr.bf16.mxu1 %v3981_v4  ;;  %v3621_v62 = vcombine.high %v882_v57, %v886_v58  ;;  %v3620_v4 = vcombine.low %v882_v57, %v886_v58  ;;  %v818_v58 = vld [vmem:[#allocation10 + $0x300] sm:$0xff] }
  0x8c   :  { %687 = vmatprep.subr.bf16.mxu0 %v3979_v1  ;;  %v874_v1 = vld [vmem:[#allocation10 + $0x4c0] sm:$0xff] }
  0x8e   :  { %647 = vmatpush2.bf16.msra.mxu1 %v3986_v7  ;;  %v738_v7 = vld [vmem:[#allocation10 + $0x80] sm:$0xff] }
  0x8f   :  { %688 = vmatpush2.bf16.msra.mxu0 %v3977_v2  ;;  %2300 = vmatprep.subr.bf16.mxu1 %v3517_v12  ;;  %v878_v2 = vld [vmem:[#allocation10 + $0x4e0] sm:$0xff]  ;;  %v3477_v13 = vcombine.high %v738_v7, %v742_v8 }
  0x90   :  { %689 = vmatprep.subr.bf16.mxu0 %v3985_v5  ;;  %v3485_v5 = vcombine.high %v746_v63, %v750_v0  ;;  %v3612_v12 = vcombine.low %v874_v1, %v878_v2 }
  0x93   :  { %690 = vmatpush2.bf16.msra.mxu0 %v3983_v6  ;;  %v3613_v6 = vcombine.high %v874_v1, %v878_v2  ;;  %v810_v2 = vld [vmem:[#allocation10 + $0x2c0] sm:$0xff] }
  0x94   :  { %2343 = vmatprep.subr.bf16.mxu0 %v3645_v15  ;;  %v730_v15 = vld [vmem:[#allocation10 + $0x40] sm:$0xff] }
 0x116   :  { %v191_v23 = vpop.f32.mrf.mxu0 }
 0x117   :  { %v192_v26 = vadd.f32 %v191_v23, %v126_v22  ;;  %v3604_v23 = vcombine.low %v866_v9, %v870_v10 }
 0x118   :  { %v193_v24 = vpop.f32.mrf.mxu0 }
 0x119   :  { %v194_v25 = vadd.f32 %v193_v24, %v130_v21  ;;  %v200_v33 = vmul.f32 0.01, %v192_v26  ;;  %v3469_v24 = vcombine.high %v730_v15, %v734_v16 }
 0x11a   :  { %v195_v27 = vpop.f32.mrf.mxu0 }
 0x11b   :  { %v196_v28 = vadd.f32 %v195_v27, %v126_v22  ;;  %v201_v30 = vmul.f32 0.01, %v194_v25  ;;  %v204_v42 = vmax.f32 %v192_v26, %v200_v33  ;;  %v3476_v22 = vcombine.low %v738_v7, %v742_v8  ;;  %v722_v26 = vld [vmem:[#allocation10] sm:$0xff] }
 0x11c   :  { %v197_v29 = vpop.f32.mrf.mxu0  ;;  %v726_v27 = vld [vmem:[#allocation10 + $0x20] sm:$0xff] }
 0x11d   :  { %v202_v31 = vmul.f32 0.01, %v196_v28  ;;  %v198_v32 = vadd.f32 %v197_v29, %v130_v21  ;;  %v205_v37 = vmax.f32 %v194_v25, %v201_v30  ;;  %v862_v21 = vld [vmem:[#allocation10 + $0x460] sm:$0xff]  ;;  %v3468_v30 = vcombine.low %v730_v15, %v734_v16 }
 0x11e   :  { %v3597_v25 = vcombine.high %v858_v20, %v862_v21  ;;  %v854_v29 = vld [vmem:[#allocation10 + $0x420] sm:$0xff] }
 0x11f   :  { %v203_v34 = vmul.f32 0.01, %v198_v32  ;;  %v206_v35 = vmax.f32 %v196_v28, %v202_v31  ;;  %v850_v28 = vld [vmem:[#allocation10 + $0x400] sm:$0xff]  ;;  %v3596_v31 = vcombine.low %v858_v20, %v862_v21 }
 0x120   :  { %v3589_v33 = vcombine.high %v850_v28, %v854_v29  ;;  %v3588_v39 = vcombine.low %v850_v28, %v854_v29  ;;  %v934_v16 = vld [vmem:[#allocation10 + $0x6a0] sm:$0xff] }
 0x121   :  { %v207_v38 = vmax.f32 %v198_v32, %v203_v34  ;;  %v208_v44 = vpack.c.bf16 %v206_v35, %v204_v42  ;;  %v3461_v32 = vcombine.high %v722_v26, %v726_v27  ;;  %v842_v34 = vld [vmem:[#allocation10 + $0x3c0] sm:$0xff] }
 0x122   :  { %v846_v35 = vld [vmem:[#allocation10 + $0x3e0] sm:$0xff] }
 0x123   :  { %v209_v43 = vpack.c.bf16 %v207_v38, %v205_v37  ;;  %v974_v37 = vld [vmem:[#allocation10 + $0x7e0] sm:$0xff]  ;;  %v3460_v38 = vcombine.low %v722_v26, %v726_v27  ;;  %v3581_v40 = vcombine.high %v842_v34, %v846_v35 }
 0x124   :  { %v3709_v41 = vcombine.high %v970_v36, %v974_v37  ;;  %v834_v42 = vld [vmem:[#allocation10 + $0x380] sm:$0xff]  ;;  %v3708_v47 = vcombine.low %v970_v36, %v974_v37 }
 0x125   :  { %648 = vmatprep.mubr.bf16.mxu1 %v209_v43  ;;  %691 = vmatprep.mubr.bf16.mxu0 %v209_v43  ;;  %v838_v43 = vld [vmem:[#allocation10 + $0x3a0] sm:$0xff] }
 0x126   :  { %649 = vmatmul.mubr.bf16.vlgmr.msra.gmra.mxu1 %v208_v44  ;;  %692 = vmatmul.mubr.bf16.vlgmr.msra.gmra.mxu0 %v208_v44  ;;  %v962_v44 = vld [vmem:[#allocation10 + $0x780] sm:$0xff]  ;;  %v3573_v48 = vcombine.high %v834_v42, %v838_v43 }
 0x127   :  { %2301 = vmatpush1.bf16.msra.mxu1 %v3516_v11  ;;  %2344 = vmatpush1.bf16.msra.mxu0 %v3644_v14  ;;  %v3484_v11 = vcombine.low %v746_v63, %v750_v0  ;;  %v3605_v14 = vcombine.high %v866_v9, %v870_v10  ;;  %v926_v27 = vld [vmem:[#allocation10 + $0x660] sm:$0xff] }
 0x128   :  { %2302 = vmatprep.subr.bf16.mxu1 %v3509_v45  ;;  %2345 = vmatprep.subr.bf16.mxu0 %v3637_v46  ;;  %v966_v45 = vld [vmem:[#allocation10 + $0x7a0] sm:$0xff]  ;;  %v3580_v46 = vcombine.low %v842_v34, %v846_v35 }
 0x129   :  { %v3701_v49 = vcombine.high %v962_v44, %v966_v45  ;;  %v3700_v55 = vcombine.low %v962_v44, %v966_v45  ;;  %v918_v35 = vld [vmem:[#allocation10 + $0x620] sm:$0xff] }
 0x12b   :  { %2303 = vmatpush1.bf16.msra.mxu1 %v3508_v51  ;;  %2346 = vmatpush1.bf16.msra.mxu0 %v3636_v52  ;;  %v830_v51 = vld [vmem:[#allocation10 + $0x360] sm:$0xff] }
 0x12c   :  { %2304 = vmatprep.subr.bf16.mxu1 %v3501_v53  ;;  %2347 = vmatprep.subr.bf16.mxu0 %v3629_v54  ;;  %v954_v52 = vld [vmem:[#allocation10 + $0x740] sm:$0xff]  ;;  %v3572_v54 = vcombine.low %v834_v42, %v838_v43  ;;  %v3565_v56 = vcombine.high %v826_v50, %v830_v51  ;;  %v4316_v43 = vld [vmem:[#allocation10 + $0x5e8] sm:$0xff] }
 0x12d   :  { %v958_v53 = vld [vmem:[#allocation10 + $0x760] sm:$0xff] }
 0x12e   :  { %v3693_v57 = vcombine.high %v954_v52, %v958_v53  ;;  %v3692_v63 = vcombine.low %v954_v52, %v958_v53 }
 0x12f   :  { %2305 = vmatpush1.bf16.msra.mxu1 %v3500_v59  ;;  %2348 = vmatpush1.bf16.msra.mxu0 %v3628_v60  ;;  %v822_v59 = vld [vmem:[#allocation10 + $0x320] sm:$0xff] }
 0x130   :  { %2306 = vmatprep.subr.bf16.mxu1 %v3493_v61  ;;  %2349 = vmatprep.subr.bf16.mxu0 %v3621_v62  ;;  %v946_v60 = vld [vmem:[#allocation10 + $0x700] sm:$0xff]  ;;  %v3564_v62 = vcombine.low %v826_v50, %v830_v51  ;;  %v3557_v0 = vcombine.high %v818_v58, %v822_v59 }
 0x131   :  { %v950_v61 = vld [vmem:[#allocation10 + $0x720] sm:$0xff] }
 0x132   :  { %v3685_v1 = vcombine.high %v946_v60, %v950_v61  ;;  %v3684_v7 = vcombine.low %v946_v60, %v950_v61 }
 0x133   :  { %2307 = vmatpush1.bf16.msra.mxu1 %v3492_v3  ;;  %2350 = vmatpush1.bf16.msra.mxu0 %v3620_v4  ;;  %v814_v3 = vld [vmem:[#allocation10 + $0x2e0] sm:$0xff] }
 0x134   :  { %2308 = vmatprep.subr.bf16.mxu1 %v3485_v5  ;;  %2351 = vmatprep.subr.bf16.mxu0 %v3613_v6  ;;  %v938_v4 = vld [vmem:[#allocation10 + $0x6c0] sm:$0xff]  ;;  %v3556_v6 = vcombine.low %v818_v58, %v822_v59  ;;  %v3549_v8 = vcombine.high %v810_v2, %v814_v3  ;;  %v3548_v10 = vcombine.low %v810_v2, %v814_v3 }
 0x135   :  { %v942_v5 = vld [vmem:[#allocation10 + $0x6e0] sm:$0xff] }
 0x136   :  { %v3677_v9 = vcombine.high %v938_v4, %v942_v5 }
 0x137   :  { %2309 = vmatpush1.bf16.msra.mxu1 %v3484_v11  ;;  %2352 = vmatpush1.bf16.msra.mxu0 %v3612_v12  ;;  %v3676_v11 = vcombine.low %v938_v4, %v942_v5  ;;  %v802_v12 = vld [vmem:[#allocation10 + $0x280] sm:$0xff] }
 0x138   :  { %2310 = vmatprep.subr.bf16.mxu1 %v3477_v13  ;;  %2353 = vmatprep.subr.bf16.mxu0 %v3605_v14  ;;  %v806_v13 = vld [vmem:[#allocation10 + $0x2a0] sm:$0xff] }
 0x139   :  { %v930_v14 = vld [vmem:[#allocation10 + $0x680] sm:$0xff]  ;;  %v3541_v15 = vcombine.high %v802_v12, %v806_v13  ;;  %v3540_v20 = vcombine.low %v802_v12, %v806_v13 }
 0x13a   :  { %v3668_v21 = vcombine.low %v930_v14, %v934_v16 }
 0x13b   :  { %2311 = vmatpush1.bf16.msra.mxu1 %v3476_v22  ;;  %2354 = vmatpush1.bf16.msra.mxu0 %v3604_v23  ;;  %v3669_v22 = vcombine.high %v930_v14, %v934_v16  ;;  %v794_v23 = vld [vmem:[#allocation10 + $0x240] sm:$0xff] }
 0x13c   :  { %2312 = vmatprep.subr.bf16.mxu1 %v3469_v24  ;;  %2355 = vmatprep.subr.bf16.mxu0 %v3597_v25  ;;  %v798_v24 = vld [vmem:[#allocation10 + $0x260] sm:$0xff] }
 0x13d   :  { %v922_v25 = vld [vmem:[#allocation10 + $0x640] sm:$0xff]  ;;  %v3533_v26 = vcombine.high %v794_v23, %v798_v24  ;;  %v3532_v28 = vcombine.low %v794_v23, %v798_v24  ;;  %v771_v23 = vld [vmem:[#allocation10 + $0x188] sm:$0xff] }
 0x13e   :  { %v3660_v29 = vcombine.low %v922_v25, %v926_v27 }
 0x13f   :  { %2313 = vmatpush1.bf16.msra.mxu1 %v3468_v30  ;;  %2356 = vmatpush1.bf16.msra.mxu0 %v3596_v31  ;;  %v3661_v30 = vcombine.high %v922_v25, %v926_v27  ;;  %v786_v31 = vld [vmem:[#allocation10 + $0x200] sm:$0xff]  ;;  %v899_v27 = vld [vmem:[#allocation10 + $0x588] sm:$0xff] }
 0x140   :  { %2314 = vmatprep.subr.bf16.mxu1 %v3461_v32  ;;  %2357 = vmatprep.subr.bf16.mxu0 %v3589_v33  ;;  %v790_v32 = vld [vmem:[#allocation10 + $0x220] sm:$0xff] }
 0x141   :  { %v914_v33 = vld [vmem:[#allocation10 + $0x600] sm:$0xff]  ;;  %v3525_v34 = vcombine.high %v786_v31, %v790_v32  ;;  %v3524_v36 = vcombine.low %v786_v31, %v790_v32 }
 0x142   :  { %v3652_v37 = vcombine.low %v914_v33, %v918_v35 }
 0x143   :  { %2315 = vmatpush1.bf16.msra.mxu1 %v3460_v38  ;;  %2358 = vmatpush1.bf16.msra.mxu0 %v3588_v39  ;;  %v3653_v38 = vcombine.high %v914_v33, %v918_v35  ;;  %v4308_v39 = vld [vmem:[#allocation10 + $0x1c8] sm:$0xff] }
 0x144   :  { %2316 = vmatprep.subr.bf16.mxu1 %v3581_v40  ;;  %2359 = vmatprep.subr.bf16.mxu0 %v3709_v41  ;;  %v4310_v40 = vld [vmem:[#allocation10 + $0x1e8] sm:$0xff] }
 0x145   :  { %v4312_v41 = vld [vmem:[#allocation10 + $0x5c8] sm:$0xff]  ;;  %v3519_v42 = vcombine.high %v4308_v39, %v4310_v40  ;;  %v3518_v44 = vcombine.low %v4308_v39, %v4310_v40 }
 0x146   :  { %v3646_v45 = vcombine.low %v4312_v41, %v4316_v43  ;;  %v763_v33 = vld [vmem:[#allocation10 + $0x148] sm:$0xff] }
 0x147   :  { %2317 = vmatpush2.bf16.msra.mxu1 %v3580_v46  ;;  %2360 = vmatpush2.bf16.msra.mxu0 %v3708_v47  ;;  %v3647_v46 = vcombine.high %v4312_v41, %v4316_v43  ;;  %v274_v47 = vld [vmem:[#allocation8] sm:$0xf]  ;;  %v755_v43 = vld [vmem:[#allocation10 + $0x108] sm:$0xff] }
 0x148   :  { %2318 = vmatprep.subr.bf16.mxu1 %v3573_v48  ;;  %2361 = vmatprep.subr.bf16.mxu0 %v3701_v49  ;;  %v290_v48 = vsub.s32 3, %v4295_v17  ;;  %v286_v49 = vsub.s32 2, %v4295_v17  ;;  %v279_v50 = vrot.slane %v274_v47, %v4301_v19  ;;  %v283_v51 = vrot.slane %v274_v47, %v4298_v18 }
 0x14a   :  { %v291_v52 = vrot.slane %v274_v47, %v290_v48 }
 0x14b   :  { %2319 = vmatpush2.bf16.msra.mxu1 %v3572_v54  ;;  %2362 = vmatpush2.bf16.msra.mxu0 %v3700_v55  ;;  %v287_v54 = vrot.slane %v274_v47, %v286_v49  ;;  %v883_v47 = vld [vmem:[#allocation10 + $0x508] sm:$0xff] }
 0x14c   :  { %2320 = vmatprep.subr.bf16.mxu1 %v3565_v56  ;;  %2363 = vmatprep.subr.bf16.mxu0 %v3693_v57 }
 0x14f   :  { %2321 = vmatpush2.bf16.msra.mxu1 %v3564_v62  ;;  %2364 = vmatpush2.bf16.msra.mxu0 %v3692_v63 }
 0x150   :  { %2322 = vmatprep.subr.bf16.mxu1 %v3557_v0  ;;  %2365 = vmatprep.subr.bf16.mxu0 %v3685_v1 }
 0x153   :  { %2323 = vmatpush2.bf16.msra.mxu1 %v3556_v6  ;;  %2366 = vmatpush2.bf16.msra.mxu0 %v3684_v7 }
 0x154   :  { %2324 = vmatprep.subr.bf16.mxu1 %v3549_v8  ;;  %2367 = vmatprep.subr.bf16.mxu0 %v3677_v9 }
 0x157   :  { %2325 = vmatpush2.bf16.msra.mxu1 %v3548_v10  ;;  %2368 = vmatpush2.bf16.msra.mxu0 %v3676_v11 }
 0x158   :  { %2326 = vmatprep.subr.bf16.mxu1 %v3541_v15  ;;  %2369 = vmatprep.subr.bf16.mxu0 %v3669_v22 }
 0x15b   :  { %2327 = vmatpush2.bf16.msra.mxu1 %v3540_v20  ;;  %2370 = vmatpush2.bf16.msra.mxu0 %v3668_v21 }
 0x15c   :  { %2328 = vmatprep.subr.bf16.mxu1 %v3533_v26  ;;  %2371 = vmatprep.subr.bf16.mxu0 %v3661_v30  ;;  %v775_v26 = vld [vmem:[#allocation10 + $0x1a8] sm:$0xff] }
 0x15d   :  { %v3510_v39 = vcombine.low %v771_v23, %v775_v26 }
 0x15f   :  { %2329 = vmatpush2.bf16.msra.mxu1 %v3532_v28  ;;  %2372 = vmatpush2.bf16.msra.mxu0 %v3660_v29  ;;  %v903_v28 = vld [vmem:[#allocation10 + $0x5a8] sm:$0xff] }
 0x160   :  { %2330 = vmatprep.subr.bf16.mxu1 %v3525_v34  ;;  %2373 = vmatprep.subr.bf16.mxu0 %v3653_v38  ;;  %v3511_v34 = vcombine.high %v771_v23, %v775_v26  ;;  %v3639_v35 = vcombine.high %v899_v27, %v903_v28  ;;  %v895_v38 = vld [vmem:[#allocation10 + $0x568] sm:$0xff]  ;;  %v3638_v40 = vcombine.low %v899_v27, %v903_v28 }
 0x161   :  { %v971_v26 = vld [vmem:[#allocation10 + $0x7c8] sm:$0xff] }
 0x162   :  { %v975_v27 = vld [vmem:[#allocation10 + $0x7e8] sm:$0xff] }
 0x163   :  { %2331 = vmatpush2.bf16.msra.mxu1 %v3524_v36  ;;  %2374 = vmatpush2.bf16.msra.mxu0 %v3652_v37  ;;  %v767_v36 = vld [vmem:[#allocation10 + $0x168] sm:$0xff] }
 0x164   :  { %2386 = vmatprep.subr.bf16.mxu1 %v3519_v42  ;;  %2429 = vmatprep.subr.bf16.mxu0 %v3647_v46  ;;  %v891_v37 = vld [vmem:[#allocation10 + $0x548] sm:$0xff]  ;;  %v3503_v41 = vcombine.high %v763_v33, %v767_v36 }
 0x165   :  { %v3631_v42 = vcombine.high %v891_v37, %v895_v38  ;;  %v759_v46 = vld [vmem:[#allocation10 + $0x128] sm:$0xff] }
 0x1e6   :  { %v650_v53 = vpop.f32.mrf.mxu1  ;;  %v693_v55 = vpop.f32.mrf.mxu0 }
 0x1e7   :  { %v651_v56 = vadd.f32 %v650_v53, %v279_v50  ;;  %v694_v61 = vadd.f32 %v693_v55, %v287_v54  ;;  %v747_v53 = vld [vmem:[#allocation10 + $0xc8] sm:$0xff] }
 0x1e8   :  { %v652_v57 = vpop.f32.mrf.mxu1  ;;  %v695_v58 = vpop.f32.mrf.mxu0  ;;  %v875_v55 = vld [vmem:[#allocation10 + $0x4c8] sm:$0xff] }
 0x1e9   :  { %v653_v59 = vadd.f32 %v652_v57, %v283_v51  ;;  %v696_v60 = vadd.f32 %v695_v58, %v291_v52  ;;  %v702_v0 = vmul.f32 0.01, %v651_v56  ;;  %v704_v9 = vmul.f32 0.01, %v694_v61 }
 0x1ea   :  { %v654_v62 = vpop.f32.mrf.mxu1  ;;  %v697_v63 = vpop.f32.mrf.mxu0  ;;  %v3494_v57 = vcombine.low %v755_v43, %v759_v46 }
 0x1eb   :  { %v655_v1 = vadd.f32 %v654_v62, %v279_v50  ;;  %v698_v2 = vadd.f32 %v697_v63, %v287_v54  ;;  %v703_v5 = vmul.f32 0.01, %v653_v59  ;;  %v705_v6 = vmul.f32 0.01, %v696_v60  ;;  %v887_v50 = vld [vmem:[#allocation10 + $0x528] sm:$0xff] }
 0x1ec   :  { %v656_v3 = vpop.f32.mrf.mxu1  ;;  %v699_v4 = vpop.f32.mrf.mxu0  ;;  %v710_v24 = vmax.f32 %v651_v56, %v702_v0  ;;  %v712_v25 = vmax.f32 %v694_v61, %v704_v9  ;;  %v751_v54 = vld [vmem:[#allocation10 + $0xe8] sm:$0xff]  ;;  %v3622_v58 = vcombine.low %v883_v47, %v887_v50 }
 0x1ed   :  { %v657_v7 = vadd.f32 %v656_v3, %v283_v51  ;;  %v700_v8 = vadd.f32 %v699_v4, %v291_v52  ;;  %v706_v10 = vmul.f32 0.01, %v655_v1  ;;  %v708_v11 = vmul.f32 0.01, %v698_v2  ;;  %v879_v56 = vld [vmem:[#allocation10 + $0x4e8] sm:$0xff] }
 0x1ee   :  { %v711_v16 = vmax.f32 %v653_v59, %v703_v5  ;;  %v713_v20 = vmax.f32 %v696_v60, %v705_v6  ;;  %v3502_v51 = vcombine.low %v763_v33, %v767_v36  ;;  %v3630_v52 = vcombine.low %v891_v37, %v895_v38  ;;  %v739_v61 = vld [vmem:[#allocation10 + $0x88] sm:$0xff] }
 0x1ef   :  { %v707_v12 = vmul.f32 0.01, %v657_v7  ;;  %v709_v13 = vmul.f32 0.01, %v700_v8  ;;  %v714_v14 = vmax.f32 %v655_v1, %v706_v10  ;;  %v716_v15 = vmax.f32 %v698_v2, %v708_v11  ;;  %v743_v62 = vld [vmem:[#allocation10 + $0xa8] sm:$0xff] }
 0x1f0   :  { %v3487_v59 = vcombine.high %v747_v53, %v751_v54  ;;  %v3615_v60 = vcombine.high %v875_v55, %v879_v56  ;;  %v867_v63 = vld [vmem:[#allocation10 + $0x488] sm:$0xff]  ;;  %v3486_v1 = vcombine.low %v747_v53, %v751_v54  ;;  %v3614_v2 = vcombine.low %v875_v55, %v879_v56 }
 0x1f1   :  { %v715_v21 = vmax.f32 %v657_v7, %v707_v12  ;;  %v717_v22 = vmax.f32 %v700_v8, %v709_v13  ;;  %v4336_v31 = vpack.c.bf16 %v714_v14, %v710_v24  ;;  %v4338_v32 = vpack.c.bf16 %v716_v15, %v712_v25  ;;  %v871_v0 = vld [vmem:[#allocation10 + $0x4a8] sm:$0xff] }
 0x1f2   :  { %v3479_v3 = vcombine.high %v739_v61, %v743_v62  ;;  %v3607_v4 = vcombine.high %v867_v63, %v871_v0  ;;  %v731_v5 = vld [vmem:[#allocation10 + $0x48] sm:$0xff]  ;;  %v3478_v9 = vcombine.low %v739_v61, %v743_v62  ;;  %v3606_v10 = vcombine.low %v867_v63, %v871_v0 }
 0x1f3   :  { %v4332_v29 = vpack.c.bf16 %v715_v21, %v711_v16  ;;  %v4334_v30 = vpack.c.bf16 %v717_v22, %v713_v20  ;;  %v735_v6 = vld [vmem:[#allocation10 + $0x68] sm:$0xff] }
 0x1f4   :  { %v859_v7 = vld [vmem:[#allocation10 + $0x448] sm:$0xff]  ;;  %v3471_v11 = vcombine.high %v731_v5, %v735_v6  ;;  %v3470_v20 = vcombine.low %v731_v5, %v735_v6 }
 0x1f5   :  { %2332 = vmatprep.mubr.bf16.mxu1 %v4332_v29  ;;  %2375 = vmatprep.mubr.bf16.mxu0 %v4334_v30  ;;  %v863_v8 = vld [vmem:[#allocation10 + $0x468] sm:$0xff] }
 0x1f6   :  { %2333 = vmatmul.mubr.bf16.vlgmr.msra.gmra.mxu1 %v4336_v31  ;;  %2376 = vmatmul.mubr.bf16.vlgmr.msra.gmra.mxu0 %v4338_v32  ;;  %v3599_v12 = vcombine.high %v859_v7, %v863_v8  ;;  %v723_v13 = vld [vmem:[#allocation10 + $0x8] sm:$0xff]  ;;  %v3598_v21 = vcombine.low %v859_v7, %v863_v8 }
 0x1f7   :  { %2387 = vmatpush1.bf16.msra.mxu1 %v3518_v44  ;;  %2430 = vmatpush1.bf16.msra.mxu0 %v3646_v45  ;;  %v3495_v44 = vcombine.high %v755_v43, %v759_v46  ;;  %v3623_v45 = vcombine.high %v883_v47, %v887_v50  ;;  %v727_v14 = vld [vmem:[#allocation10 + $0x28] sm:$0xff] }
 0x1f8   :  { %2418 = vmatprep.mubr.bf16.mxu1 %v4332_v29  ;;  %2461 = vmatprep.mubr.bf16.mxu0 %v4334_v30  ;;  %v851_v15 = vld [vmem:[#allocation10 + $0x408] sm:$0xff]  ;;  %v3463_v22 = vcombine.high %v723_v13, %v727_v14  ;;  %v3462_v28 = vcombine.low %v723_v13, %v727_v14 }
 0x1f9   :  { %2388 = vmatprep.subr.bf16.mxu1 %v3511_v34  ;;  %2431 = vmatprep.subr.bf16.mxu0 %v3639_v35  ;;  %v855_v16 = vld [vmem:[#allocation10 + $0x428] sm:$0xff]  ;;  %v3711_v35 = vcombine.high %v971_v26, %v975_v27 }
 0x1fa   :  { %v3591_v23 = vcombine.high %v851_v15, %v855_v16  ;;  %v843_v24 = vld [vmem:[#allocation10 + $0x3c8] sm:$0xff]  ;;  %v3590_v33 = vcombine.low %v851_v15, %v855_v16 }
 0x1fb   :  { %2389 = vmatpush1.bf16.msra.mxu1 %v3510_v39  ;;  %2432 = vmatpush1.bf16.msra.mxu0 %v3638_v40  ;;  %v847_v25 = vld [vmem:[#allocation10 + $0x3e8] sm:$0xff] }
 0x1fc   :  { %2390 = vmatprep.subr.bf16.mxu1 %v3503_v41  ;;  %2433 = vmatprep.subr.bf16.mxu0 %v3631_v42  ;;  %v3583_v34 = vcombine.high %v843_v24, %v847_v25  ;;  %v835_v36 = vld [vmem:[#allocation10 + $0x388] sm:$0xff]  ;;  %v3582_v40 = vcombine.low %v843_v24, %v847_v25  ;;  %v3710_v41 = vcombine.low %v971_v26, %v975_v27 }
 0x1fd   :  { %v839_v37 = vld [vmem:[#allocation10 + $0x3a8] sm:$0xff] }
 0x1fe   :  { %v963_v38 = vld [vmem:[#allocation10 + $0x788] sm:$0xff]  ;;  %v3575_v42 = vcombine.high %v835_v36, %v839_v37 }
 0x1ff   :  { %2391 = vmatpush1.bf16.msra.mxu1 %v3502_v51  ;;  %2434 = vmatpush1.bf16.msra.mxu0 %v3630_v52  ;;  %v967_v39 = vld [vmem:[#allocation10 + $0x7a8] sm:$0xff]  ;;  %v3574_v52 = vcombine.low %v835_v36, %v839_v37  ;;  %v780_v37 = vld [vmem:[#allocation10 + $0x1d0] sm:$0xff] }
 0x200   :  { %2392 = vmatprep.subr.bf16.mxu1 %v3495_v44  ;;  %2435 = vmatprep.subr.bf16.mxu0 %v3623_v45  ;;  %v3703_v43 = vcombine.high %v963_v38, %v967_v39  ;;  %v827_v46 = vld [vmem:[#allocation10 + $0x348] sm:$0xff]  ;;  %v3702_v44 = vcombine.low %v963_v38, %v967_v39  ;;  %v784_v38 = vld [vmem:[#allocation10 + $0x1f0] sm:$0xff] }
 0x201   :  { %v831_v47 = vld [vmem:[#allocation10 + $0x368] sm:$0xff]  ;;  %v908_v39 = vld [vmem:[#allocation10 + $0x5d0] sm:$0xff] }
 0x202   :  { %v955_v50 = vld [vmem:[#allocation10 + $0x748] sm:$0xff]  ;;  %v3567_v45 = vcombine.high %v827_v46, %v831_v47 }
 0x203   :  { %2393 = vmatpush1.bf16.msra.mxu1 %v3494_v57  ;;  %2436 = vmatpush1.bf16.msra.mxu0 %v3622_v58  ;;  %v959_v51 = vld [vmem:[#allocation10 + $0x768] sm:$0xff]  ;;  %v3566_v58 = vcombine.low %v827_v46, %v831_v47  ;;  %v772_v47 = vld [vmem:[#allocation10 + $0x190] sm:$0xff] }
 0x204   :  { %2394 = vmatprep.subr.bf16.mxu1 %v3487_v59  ;;  %2437 = vmatprep.subr.bf16.mxu0 %v3615_v60  ;;  %v3695_v53 = vcombine.high %v955_v50, %v959_v51  ;;  %v819_v54 = vld [vmem:[#allocation10 + $0x308] sm:$0xff]  ;;  %v3694_v59 = vcombine.low %v955_v50, %v959_v51  ;;  %v776_v50 = vld [vmem:[#allocation10 + $0x1b0] sm:$0xff] }
 0x205   :  { %v823_v55 = vld [vmem:[#allocation10 + $0x328] sm:$0xff]  ;;  %v900_v51 = vld [vmem:[#allocation10 + $0x590] sm:$0xff] }
 0x206   :  { %v947_v56 = vld [vmem:[#allocation10 + $0x708] sm:$0xff]  ;;  %v3559_v60 = vcombine.high %v819_v54, %v823_v55 }
 0x207   :  { %2395 = vmatpush1.bf16.msra.mxu1 %v3486_v1  ;;  %2438 = vmatpush1.bf16.msra.mxu0 %v3614_v2  ;;  %v951_v57 = vld [vmem:[#allocation10 + $0x728] sm:$0xff]  ;;  %v3558_v2 = vcombine.low %v819_v54, %v823_v55  ;;  %v764_v55 = vld [vmem:[#allocation10 + $0x150] sm:$0xff] }
 0x208   :  { %2396 = vmatprep.subr.bf16.mxu1 %v3479_v3  ;;  %2439 = vmatprep.subr.bf16.mxu0 %v3607_v4  ;;  %v3687_v61 = vcombine.high %v947_v56, %v951_v57  ;;  %v811_v62 = vld [vmem:[#allocation10 + $0x2c8] sm:$0xff]  ;;  %v3686_v3 = vcombine.low %v947_v56, %v951_v57  ;;  %v768_v56 = vld [vmem:[#allocation10 + $0x170] sm:$0xff] }
 0x209   :  { %v815_v63 = vld [vmem:[#allocation10 + $0x2e8] sm:$0xff]  ;;  %v892_v57 = vld [vmem:[#allocation10 + $0x550] sm:$0xff] }
 0x20a   :  { %v939_v0 = vld [vmem:[#allocation10 + $0x6c8] sm:$0xff]  ;;  %v3551_v4 = vcombine.high %v811_v62, %v815_v63 }
 0x20b   :  { %2397 = vmatpush1.bf16.msra.mxu1 %v3478_v9  ;;  %2440 = vmatpush1.bf16.msra.mxu0 %v3606_v10  ;;  %v943_v1 = vld [vmem:[#allocation10 + $0x6e8] sm:$0xff]  ;;  %v3550_v10 = vcombine.low %v811_v62, %v815_v63  ;;  %v756_v63 = vld [vmem:[#allocation10 + $0x110] sm:$0xff] }
 0x20c   :  { %2398 = vmatprep.subr.bf16.mxu1 %v3471_v11  ;;  %2441 = vmatprep.subr.bf16.mxu0 %v3599_v12  ;;  %v3679_v5 = vcombine.high %v939_v0, %v943_v1  ;;  %v803_v6 = vld [vmem:[#allocation10 + $0x288] sm:$0xff]  ;;  %v3678_v11 = vcombine.low %v939_v0, %v943_v1  ;;  %v760_v0 = vld [vmem:[#allocation10 + $0x130] sm:$0xff] }
 0x20d   :  { %v807_v7 = vld [vmem:[#allocation10 + $0x2a8] sm:$0xff]  ;;  %v884_v1 = vld [vmem:[#allocation10 + $0x510] sm:$0xff] }
 0x20e   :  { %v931_v8 = vld [vmem:[#allocation10 + $0x688] sm:$0xff]  ;;  %v3543_v12 = vcombine.high %v803_v6, %v807_v7 }
 0x20f   :  { %2399 = vmatpush1.bf16.msra.mxu1 %v3470_v20  ;;  %2442 = vmatpush1.bf16.msra.mxu0 %v3598_v21  ;;  %v935_v9 = vld [vmem:[#allocation10 + $0x6a8] sm:$0xff]  ;;  %v3542_v21 = vcombine.low %v803_v6, %v807_v7  ;;  %v748_v7 = vld [vmem:[#allocation10 + $0xd0] sm:$0xff] }
 0x210   :  { %2400 = vmatprep.subr.bf16.mxu1 %v3463_v22  ;;  %2443 = vmatprep.subr.bf16.mxu0 %v3591_v23  ;;  %v3671_v13 = vcombine.high %v931_v8, %v935_v9  ;;  %v795_v14 = vld [vmem:[#allocation10 + $0x248] sm:$0xff]  ;;  %v3670_v22 = vcombine.low %v931_v8, %v935_v9  ;;  %v752_v8 = vld [vmem:[#allocation10 + $0xf0] sm:$0xff] }
 0x211   :  { %v799_v15 = vld [vmem:[#allocation10 + $0x268] sm:$0xff]  ;;  %v876_v9 = vld [vmem:[#allocation10 + $0x4d0] sm:$0xff] }
 0x212   :  { %v923_v16 = vld [vmem:[#allocation10 + $0x648] sm:$0xff]  ;;  %v3535_v23 = vcombine.high %v795_v14, %v799_v15 }
 0x213   :  { %2401 = vmatpush1.bf16.msra.mxu1 %v3462_v28  ;;  %2444 = vmatpush1.bf16.msra.mxu0 %v3590_v33  ;;  %v927_v20 = vld [vmem:[#allocation10 + $0x668] sm:$0xff]  ;;  %v3534_v33 = vcombine.low %v795_v14, %v799_v15  ;;  %v740_v15 = vld [vmem:[#allocation10 + $0x90] sm:$0xff] }
 0x214   :  { %2402 = vmatprep.subr.bf16.mxu1 %v3583_v34  ;;  %2445 = vmatprep.subr.bf16.mxu0 %v3711_v35  ;;  %v3663_v24 = vcombine.high %v923_v16, %v927_v20  ;;  %v787_v25 = vld [vmem:[#allocation10 + $0x208] sm:$0xff]  ;;  %v3662_v34 = vcombine.low %v923_v16, %v927_v20  ;;  %v744_v16 = vld [vmem:[#allocation10 + $0xb0] sm:$0xff] }
 0x215   :  { %v791_v26 = vld [vmem:[#allocation10 + $0x228] sm:$0xff]  ;;  %v868_v20 = vld [vmem:[#allocation10 + $0x490] sm:$0xff] }
 0x216   :  { %v915_v27 = vld [vmem:[#allocation10 + $0x608] sm:$0xff]  ;;  %v3527_v35 = vcombine.high %v787_v25, %v791_v26 }
 0x217   :  { %2403 = vmatpush2.bf16.msra.mxu1 %v3582_v40  ;;  %2446 = vmatpush2.bf16.msra.mxu0 %v3710_v41  ;;  %v919_v28 = vld [vmem:[#allocation10 + $0x628] sm:$0xff]  ;;  %v912_v40 = vld [vmem:[#allocation10 + $0x5f0] sm:$0xff]  ;;  %v3526_v41 = vcombine.low %v787_v25, %v791_v26 }
 0x218   :  { %2404 = vmatprep.subr.bf16.mxu1 %v3575_v42  ;;  %2447 = vmatprep.subr.bf16.mxu0 %v3703_v43  ;;  %v3655_v36 = vcombine.high %v915_v27, %v919_v28  ;;  %v3654_v42 = vcombine.low %v915_v27, %v919_v28  ;;  %v3521_v43 = vcombine.high %v780_v37, %v784_v38  ;;  %v732_v26 = vld [vmem:[#allocation10 + $0x50] sm:$0xff] }
 0x219   :  { %v3649_v46 = vcombine.high %v908_v39, %v912_v40  ;;  %v736_v27 = vld [vmem:[#allocation10 + $0x70] sm:$0xff] }
 0x21a   :  { %v860_v28 = vld [vmem:[#allocation10 + $0x450] sm:$0xff] }
 0x21b   :  { %2405 = vmatpush2.bf16.msra.mxu1 %v3574_v52  ;;  %2448 = vmatpush2.bf16.msra.mxu0 %v3702_v44  ;;  %v904_v52 = vld [vmem:[#allocation10 + $0x5b0] sm:$0xff]  ;;  %v3520_v44 = vcombine.low %v780_v37, %v784_v38 }
 0x21c   :  { %2406 = vmatprep.subr.bf16.mxu1 %v3567_v45  ;;  %2449 = vmatprep.subr.bf16.mxu0 %v3695_v53  ;;  %v3648_v45 = vcombine.low %v908_v39, %v912_v40  ;;  %v3513_v53 = vcombine.high %v772_v47, %v776_v50  ;;  %v3641_v54 = vcombine.high %v900_v51, %v904_v52  ;;  %v724_v38 = vld [vmem:[#allocation10 + $0x10] sm:$0xff] }
 0x21d   :  { %v728_v39 = vld [vmem:[#allocation10 + $0x30] sm:$0xff] }
 0x21e   :  { %v852_v40 = vld [vmem:[#allocation10 + $0x410] sm:$0xff] }
 0x21f   :  { %2407 = vmatpush2.bf16.msra.mxu1 %v3566_v58  ;;  %2450 = vmatpush2.bf16.msra.mxu0 %v3694_v59  ;;  %v896_v58 = vld [vmem:[#allocation10 + $0x570] sm:$0xff]  ;;  %v3512_v59 = vcombine.low %v772_v47, %v776_v50 }
 0x220   :  { %2408 = vmatprep.subr.bf16.mxu1 %v3559_v60  ;;  %2451 = vmatprep.subr.bf16.mxu0 %v3687_v61  ;;  %v3640_v60 = vcombine.low %v900_v51, %v904_v52  ;;  %v3505_v61 = vcombine.high %v764_v55, %v768_v56  ;;  %v3633_v62 = vcombine.high %v892_v57, %v896_v58  ;;  %v844_v50 = vld [vmem:[#allocation10 + $0x3d0] sm:$0xff] }
 0x221   :  { %v848_v51 = vld [vmem:[#allocation10 + $0x3f0] sm:$0xff] }
 0x222   :  { %v972_v52 = vld [vmem:[#allocation10 + $0x7d0] sm:$0xff] }
 0x223   :  { %2409 = vmatpush2.bf16.msra.mxu1 %v3558_v2  ;;  %2452 = vmatpush2.bf16.msra.mxu0 %v3686_v3  ;;  %v888_v2 = vld [vmem:[#allocation10 + $0x530] sm:$0xff]  ;;  %v3504_v3 = vcombine.low %v764_v55, %v768_v56 }
 0x224   :  { %2410 = vmatprep.subr.bf16.mxu1 %v3551_v4  ;;  %2453 = vmatprep.subr.bf16.mxu0 %v3679_v5  ;;  %v3632_v4 = vcombine.low %v892_v57, %v896_v58  ;;  %v3497_v5 = vcombine.high %v756_v63, %v760_v0  ;;  %v3625_v6 = vcombine.high %v884_v1, %v888_v2  ;;  %v836_v56 = vld [vmem:[#allocation10 + $0x390] sm:$0xff] }
 0x225   :  { %v840_v57 = vld [vmem:[#allocation10 + $0x3b0] sm:$0xff] }
 0x226   :  { %v964_v58 = vld [vmem:[#allocation10 + $0x790] sm:$0xff] }
 0x227   :  { %2411 = vmatpush2.bf16.msra.mxu1 %v3550_v10  ;;  %2454 = vmatpush2.bf16.msra.mxu0 %v3678_v11  ;;  %v880_v10 = vld [vmem:[#allocation10 + $0x4f0] sm:$0xff]  ;;  %v3496_v11 = vcombine.low %v756_v63, %v760_v0 }
 0x228   :  { %2412 = vmatprep.subr.bf16.mxu1 %v3543_v12  ;;  %2455 = vmatprep.subr.bf16.mxu0 %v3671_v13  ;;  %v3624_v12 = vcombine.low %v884_v1, %v888_v2  ;;  %v3489_v13 = vcombine.high %v748_v7, %v752_v8  ;;  %v3617_v14 = vcombine.high %v876_v9, %v880_v10  ;;  %v828_v0 = vld [vmem:[#allocation10 + $0x350] sm:$0xff] }
 0x229   :  { %v832_v1 = vld [vmem:[#allocation10 + $0x370] sm:$0xff] }
 0x22a   :  { %v956_v2 = vld [vmem:[#allocation10 + $0x750] sm:$0xff] }
 0x22b   :  { %2413 = vmatpush2.bf16.msra.mxu1 %v3542_v21  ;;  %2456 = vmatpush2.bf16.msra.mxu0 %v3670_v22  ;;  %v872_v21 = vld [vmem:[#allocation10 + $0x4b0] sm:$0xff]  ;;  %v3488_v22 = vcombine.low %v748_v7, %v752_v8 }
 0x22c   :  { %2414 = vmatprep.subr.bf16.mxu1 %v3535_v23  ;;  %2457 = vmatprep.subr.bf16.mxu0 %v3663_v24  ;;  %v3616_v23 = vcombine.low %v876_v9, %v880_v10  ;;  %v3481_v24 = vcombine.high %v740_v15, %v744_v16  ;;  %v3609_v25 = vcombine.high %v868_v20, %v872_v21  ;;  %v820_v8 = vld [vmem:[#allocation10 + $0x310] sm:$0xff] }
 0x22d   :  { %v824_v9 = vld [vmem:[#allocation10 + $0x330] sm:$0xff] }
 0x22e   :  { %v948_v10 = vld [vmem:[#allocation10 + $0x710] sm:$0xff] }
 0x22f   :  { %2415 = vmatpush2.bf16.msra.mxu1 %v3534_v33  ;;  %2458 = vmatpush2.bf16.msra.mxu0 %v3662_v34  ;;  %v864_v33 = vld [vmem:[#allocation10 + $0x470] sm:$0xff]  ;;  %v3480_v34 = vcombine.low %v740_v15, %v744_v16 }
 0x230   :  { %2416 = vmatprep.subr.bf16.mxu1 %v3527_v35  ;;  %2459 = vmatprep.subr.bf16.mxu0 %v3655_v36  ;;  %v3608_v35 = vcombine.low %v868_v20, %v872_v21  ;;  %v3473_v36 = vcombine.high %v732_v26, %v736_v27  ;;  %v3601_v37 = vcombine.high %v860_v28, %v864_v33  ;;  %v812_v16 = vld [vmem:[#allocation10 + $0x2d0] sm:$0xff] }
 0x231   :  { %v816_v20 = vld [vmem:[#allocation10 + $0x2f0] sm:$0xff] }
 0x232   :  { %v940_v21 = vld [vmem:[#allocation10 + $0x6d0] sm:$0xff] }
 0x233   :  { %2417 = vmatpush2.bf16.msra.mxu1 %v3526_v41  ;;  %2460 = vmatpush2.bf16.msra.mxu0 %v3654_v42  ;;  %v856_v41 = vld [vmem:[#allocation10 + $0x430] sm:$0xff]  ;;  %v3472_v42 = vcombine.low %v732_v26, %v736_v27 }
 0x234   :  { %2472 = vmatprep.subr.bf16.mxu1 %v3521_v43  ;;  %2515 = vmatprep.subr.bf16.mxu0 %v3649_v46  ;;  %v3600_v43 = vcombine.low %v860_v28, %v864_v33  ;;  %v3465_v46 = vcombine.high %v724_v38, %v728_v39  ;;  %v3593_v47 = vcombine.high %v852_v40, %v856_v41  ;;  %v804_v27 = vld [vmem:[#allocation10 + $0x290] sm:$0xff] }
 0x235   :  { %v808_v28 = vld [vmem:[#allocation10 + $0x2b0] sm:$0xff] }
 0x236   :  { %2419 = vmatmul.mubr.bf16.vlgmr.msra.gmra.mxu1 %v4336_v31  ;;  %2462 = vmatmul.mubr.bf16.vlgmr.msra.gmra.mxu0 %v4338_v32  ;;  %v932_v33 = vld [vmem:[#allocation10 + $0x690] sm:$0xff] }
 0x237   :  { %2473 = vmatpush1.bf16.msra.mxu1 %v3520_v44  ;;  %2504 = vmatprep.mubr.bf16.mxu1 %v4332_v29  ;;  %v976_v44 = vld [vmem:[#allocation10 + $0x7f0] sm:$0xff] }
 0x238   :  { %2516 = vmatpush1.bf16.msra.mxu0 %v3648_v45  ;;  %2547 = vmatprep.mubr.bf16.mxu0 %v4334_v30  ;;  %v3464_v45 = vcombine.low %v724_v38, %v728_v39  ;;  %v3713_v55 = vcombine.high %v972_v52, %v976_v44  ;;  %v796_v39 = vld [vmem:[#allocation10 + $0x250] sm:$0xff] }
 0x239   :  { %2474 = vmatprep.subr.bf16.mxu1 %v3513_v53  ;;  %2517 = vmatprep.subr.bf16.mxu0 %v3641_v54  ;;  %v3592_v53 = vcombine.low %v852_v40, %v856_v41  ;;  %v3585_v54 = vcombine.high %v844_v50, %v848_v51  ;;  %v800_v40 = vld [vmem:[#allocation10 + $0x270] sm:$0xff] }
 0x23a   :  { %v924_v41 = vld [vmem:[#allocation10 + $0x650] sm:$0xff] }
 0x23b   :  { %2475 = vmatpush1.bf16.msra.mxu1 %v3512_v59  ;;  %v968_v59 = vld [vmem:[#allocation10 + $0x7b0] sm:$0xff] }
 0x23c   :  { %2518 = vmatpush1.bf16.msra.mxu0 %v3640_v60  ;;  %2476 = vmatprep.subr.bf16.mxu1 %v3505_v61  ;;  %v3584_v60 = vcombine.low %v844_v50, %v848_v51  ;;  %v3712_v61 = vcombine.low %v972_v52, %v976_v44  ;;  %v3705_v63 = vcombine.high %v964_v58, %v968_v59  ;;  %v788_v51 = vld [vmem:[#allocation10 + $0x210] sm:$0xff] }
 0x23d   :  { %2519 = vmatprep.subr.bf16.mxu0 %v3633_v62  ;;  %v3577_v62 = vcombine.high %v836_v56, %v840_v57  ;;  %v792_v52 = vld [vmem:[#allocation10 + $0x230] sm:$0xff] }
 0x23e   :  { %v916_v44 = vld [vmem:[#allocation10 + $0x610] sm:$0xff] }
 0x23f   :  { %2477 = vmatpush1.bf16.msra.mxu1 %v3504_v3  ;;  %v960_v3 = vld [vmem:[#allocation10 + $0x770] sm:$0xff] }
 0x240   :  { %2520 = vmatpush1.bf16.msra.mxu0 %v3632_v4  ;;  %2478 = vmatprep.subr.bf16.mxu1 %v3497_v5  ;;  %v3576_v4 = vcombine.low %v836_v56, %v840_v57  ;;  %v3704_v5 = vcombine.low %v964_v58, %v968_v59  ;;  %v3697_v7 = vcombine.high %v956_v2, %v960_v3  ;;  %v781_v57 = vld [vmem:[#allocation10 + $0x1d8] sm:$0xff] }
 0x241   :  { %2521 = vmatprep.subr.bf16.mxu0 %v3625_v6  ;;  %v3569_v6 = vcombine.high %v828_v0, %v832_v1  ;;  %v785_v58 = vld [vmem:[#allocation10 + $0x1f8] sm:$0xff] }
 0x242   :  { %v909_v59 = vld [vmem:[#allocation10 + $0x5d8] sm:$0xff] }
 0x243   :  { %2479 = vmatpush1.bf16.msra.mxu1 %v3496_v11  ;;  %v952_v11 = vld [vmem:[#allocation10 + $0x730] sm:$0xff] }
 0x244   :  { %2522 = vmatpush1.bf16.msra.mxu0 %v3624_v12  ;;  %2480 = vmatprep.subr.bf16.mxu1 %v3489_v13  ;;  %v3568_v12 = vcombine.low %v828_v0, %v832_v1  ;;  %v3696_v13 = vcombine.low %v956_v2, %v960_v3  ;;  %v3689_v15 = vcombine.high %v948_v10, %v952_v11  ;;  %v773_v1 = vld [vmem:[#allocation10 + $0x198] sm:$0xff] }
 0x245   :  { %2523 = vmatprep.subr.bf16.mxu0 %v3617_v14  ;;  %v3561_v14 = vcombine.high %v820_v8, %v824_v9  ;;  %v777_v2 = vld [vmem:[#allocation10 + $0x1b8] sm:$0xff]  ;;  %v3522_v3 = vcombine.low %v781_v57, %v785_v58 }
 0x247   :  { %2481 = vmatpush1.bf16.msra.mxu1 %v3488_v22  ;;  %v944_v22 = vld [vmem:[#allocation10 + $0x6f0] sm:$0xff] }
 0x248   :  { %2524 = vmatpush1.bf16.msra.mxu0 %v3616_v23  ;;  %2482 = vmatprep.subr.bf16.mxu1 %v3481_v24  ;;  %v3560_v23 = vcombine.low %v820_v8, %v824_v9  ;;  %v3688_v24 = vcombine.low %v948_v10, %v952_v11  ;;  %v3681_v26 = vcombine.high %v940_v21, %v944_v22  ;;  %v765_v8 = vld [vmem:[#allocation10 + $0x158] sm:$0xff] }
 0x249   :  { %2525 = vmatprep.subr.bf16.mxu0 %v3609_v25  ;;  %v3553_v25 = vcombine.high %v812_v16, %v816_v20  ;;  %v769_v9 = vld [vmem:[#allocation10 + $0x178] sm:$0xff] }
 0x24a   :  { %v893_v11 = vld [vmem:[#allocation10 + $0x558] sm:$0xff] }
 0x24b   :  { %2483 = vmatpush1.bf16.msra.mxu1 %v3480_v34  ;;  %v936_v34 = vld [vmem:[#allocation10 + $0x6b0] sm:$0xff] }
 0x24c   :  { %2526 = vmatpush1.bf16.msra.mxu0 %v3608_v35  ;;  %2484 = vmatprep.subr.bf16.mxu1 %v3473_v36  ;;  %v3552_v35 = vcombine.low %v812_v16, %v816_v20  ;;  %v3680_v36 = vcombine.low %v940_v21, %v944_v22  ;;  %v3673_v38 = vcombine.high %v932_v33, %v936_v34  ;;  %v757_v20 = vld [vmem:[#allocation10 + $0x118] sm:$0xff] }
 0x24d   :  { %2527 = vmatprep.subr.bf16.mxu0 %v3601_v37  ;;  %v3545_v37 = vcombine.high %v804_v27, %v808_v28  ;;  %v761_v21 = vld [vmem:[#allocation10 + $0x138] sm:$0xff] }
 0x24e   :  { %v885_v22 = vld [vmem:[#allocation10 + $0x518] sm:$0xff] }
 0x24f   :  { %2485 = vmatpush1.bf16.msra.mxu1 %v3472_v42  ;;  %v928_v42 = vld [vmem:[#allocation10 + $0x670] sm:$0xff] }
 0x250   :  { %2528 = vmatpush1.bf16.msra.mxu0 %v3600_v43  ;;  %2486 = vmatprep.subr.bf16.mxu1 %v3465_v46  ;;  %v3544_v43 = vcombine.low %v804_v27, %v808_v28  ;;  %v3672_v46 = vcombine.low %v932_v33, %v936_v34  ;;  %v3665_v50 = vcombine.high %v924_v41, %v928_v42  ;;  %v749_v27 = vld [vmem:[#allocation10 + $0xd8] sm:$0xff] }
 0x251   :  { %2529 = vmatprep.subr.bf16.mxu0 %v3593_v47  ;;  %v3537_v47 = vcombine.high %v796_v39, %v800_v40  ;;  %v753_v28 = vld [vmem:[#allocation10 + $0xf8] sm:$0xff] }
 0x252   :  { %v877_v33 = vld [vmem:[#allocation10 + $0x4d8] sm:$0xff] }
 0x253   :  { %2487 = vmatpush1.bf16.msra.mxu1 %v3464_v45  ;;  %v920_v45 = vld [vmem:[#allocation10 + $0x630] sm:$0xff]  ;;  %v881_v34 = vld [vmem:[#allocation10 + $0x4f8] sm:$0xff] }
 0x254   :  { %2530 = vmatpush1.bf16.msra.mxu0 %v3592_v53  ;;  %2488 = vmatprep.subr.bf16.mxu1 %v3585_v54  ;;  %v3536_v53 = vcombine.low %v796_v39, %v800_v40  ;;  %v3664_v54 = vcombine.low %v924_v41, %v928_v42  ;;  %v3657_v56 = vcombine.high %v916_v44, %v920_v45  ;;  %v745_v39 = vld [vmem:[#allocation10 + $0xb8] sm:$0xff] }
 0x255   :  { %2531 = vmatprep.subr.bf16.mxu0 %v3713_v55  ;;  %v3529_v55 = vcombine.high %v788_v51, %v792_v52  ;;  %v869_v40 = vld [vmem:[#allocation10 + $0x498] sm:$0xff]  ;;  %v3490_v42 = vcombine.low %v749_v27, %v753_v28 }
 0x256   :  { %v873_v41 = vld [vmem:[#allocation10 + $0x4b8] sm:$0xff] }
 0x257   :  { %2489 = vmatpush2.bf16.msra.mxu1 %v3584_v60  ;;  %v913_v60 = vld [vmem:[#allocation10 + $0x5f8] sm:$0xff] }
 0x258   :  { %2532 = vmatpush2.bf16.msra.mxu0 %v3712_v61  ;;  %2490 = vmatprep.subr.bf16.mxu1 %v3577_v62  ;;  %v3528_v61 = vcombine.low %v788_v51, %v792_v52  ;;  %v3656_v62 = vcombine.low %v916_v44, %v920_v45  ;;  %v3651_v0 = vcombine.high %v909_v59, %v913_v60  ;;  %v737_v51 = vld [vmem:[#allocation10 + $0x78] sm:$0xff] }
 0x259   :  { %2533 = vmatprep.subr.bf16.mxu0 %v3705_v63  ;;  %v3523_v63 = vcombine.high %v781_v57, %v785_v58  ;;  %v861_v52 = vld [vmem:[#allocation10 + $0x458] sm:$0xff] }
 0x25a   :  { %v865_v44 = vld [vmem:[#allocation10 + $0x478] sm:$0xff] }
 0x25b   :  { %2491 = vmatpush2.bf16.msra.mxu1 %v3576_v4  ;;  %v901_v4 = vld [vmem:[#allocation10 + $0x598] sm:$0xff] }
 0x25c   :  { %2534 = vmatpush2.bf16.msra.mxu0 %v3704_v5  ;;  %2492 = vmatprep.subr.bf16.mxu1 %v3569_v6  ;;  %v905_v5 = vld [vmem:[#allocation10 + $0x5b8] sm:$0xff]  ;;  %v3650_v6 = vcombine.low %v909_v59, %v913_v60 }
 0x25d   :  { %2535 = vmatprep.subr.bf16.mxu0 %v3697_v7  ;;  %v3515_v7 = vcombine.high %v773_v1, %v777_v2  ;;  %v3643_v10 = vcombine.high %v901_v4, %v905_v5  ;;  %v729_v57 = vld [vmem:[#allocation10 + $0x38] sm:$0xff] }
 0x25e   :  { %v853_v58 = vld [vmem:[#allocation10 + $0x418] sm:$0xff] }
 0x25f   :  { %2493 = vmatpush2.bf16.msra.mxu1 %v3568_v12  ;;  %v897_v12 = vld [vmem:[#allocation10 + $0x578] sm:$0xff] }
 0x260   :  { %2536 = vmatpush2.bf16.msra.mxu0 %v3696_v13  ;;  %2494 = vmatprep.subr.bf16.mxu1 %v3561_v14  ;;  %v3514_v13 = vcombine.low %v773_v1, %v777_v2  ;;  %v3642_v14 = vcombine.low %v901_v4, %v905_v5  ;;  %v3635_v16 = vcombine.high %v893_v11, %v897_v12  ;;  %v857_v59 = vld [vmem:[#allocation10 + $0x438] sm:$0xff] }
 0x261   :  { %2537 = vmatprep.subr.bf16.mxu0 %v3689_v15  ;;  %v3507_v15 = vcombine.high %v765_v8, %v769_v9  ;;  %v849_v1 = vld [vmem:[#allocation10 + $0x3f8] sm:$0xff]  ;;  %v3594_v5 = vcombine.low %v853_v58, %v857_v59 }
 0x262   :  { %v973_v2 = vld [vmem:[#allocation10 + $0x7d8] sm:$0xff] }
 0x263   :  { %2495 = vmatpush2.bf16.msra.mxu1 %v3560_v23  ;;  %v889_v23 = vld [vmem:[#allocation10 + $0x538] sm:$0xff] }
 0x264   :  { %2538 = vmatpush2.bf16.msra.mxu0 %v3688_v24  ;;  %2496 = vmatprep.subr.bf16.mxu1 %v3553_v25  ;;  %v3506_v24 = vcombine.low %v765_v8, %v769_v9  ;;  %v3634_v25 = vcombine.low %v893_v11, %v897_v12  ;;  %v837_v8 = vld [vmem:[#allocation10 + $0x398] sm:$0xff] }
 0x265   :  { %2539 = vmatprep.subr.bf16.mxu0 %v3681_v26  ;;  %v3499_v26 = vcombine.high %v757_v20, %v761_v21  ;;  %v841_v9 = vld [vmem:[#allocation10 + $0x3b8] sm:$0xff] }
 0x266   :  { %v969_v11 = vld [vmem:[#allocation10 + $0x7b8] sm:$0xff] }
 0x267   :  { %2497 = vmatpush2.bf16.msra.mxu1 %v3552_v35  ;;  %v3626_v35 = vcombine.low %v885_v22, %v889_v23 }
 0x268   :  { %2540 = vmatpush2.bf16.msra.mxu0 %v3680_v36  ;;  %2498 = vmatprep.subr.bf16.mxu1 %v3545_v37  ;;  %v3491_v36 = vcombine.high %v749_v27, %v753_v28  ;;  %v3619_v37 = vcombine.high %v877_v33, %v881_v34  ;;  %v825_v27 = vld [vmem:[#allocation10 + $0x338] sm:$0xff] }
 0x269   :  { %2541 = vmatprep.subr.bf16.mxu0 %v3673_v38  ;;  %v741_v38 = vld [vmem:[#allocation10 + $0x98] sm:$0xff] }
 0x26a   :  { %v3482_v45 = vcombine.low %v741_v38, %v745_v39  ;;  %v949_v28 = vld [vmem:[#allocation10 + $0x718] sm:$0xff] }
 0x26b   :  { %2499 = vmatpush2.bf16.msra.mxu1 %v3544_v43  ;;  %v3618_v43 = vcombine.low %v877_v33, %v881_v34  ;;  %v953_v33 = vld [vmem:[#allocation10 + $0x738] sm:$0xff] }
 0x26c   :  { %2542 = vmatpush2.bf16.msra.mxu0 %v3672_v46  ;;  %2500 = vmatprep.subr.bf16.mxu1 %v3537_v47  ;;  %v3483_v46 = vcombine.high %v741_v38, %v745_v39  ;;  %v3611_v47 = vcombine.high %v869_v40, %v873_v41  ;;  %v817_v38 = vld [vmem:[#allocation10 + $0x2f8] sm:$0xff] }
 0x26d   :  { %2543 = vmatprep.subr.bf16.mxu0 %v3665_v50  ;;  %v733_v50 = vld [vmem:[#allocation10 + $0x58] sm:$0xff] }
 0x26e   :  { %v3474_v60 = vcombine.low %v733_v50, %v737_v51  ;;  %v941_v39 = vld [vmem:[#allocation10 + $0x6d8] sm:$0xff] }
 0x26f   :  { %2501 = vmatpush2.bf16.msra.mxu1 %v3536_v53  ;;  %v3610_v53 = vcombine.low %v869_v40, %v873_v41  ;;  %v945_v40 = vld [vmem:[#allocation10 + $0x6f8] sm:$0xff] }
 0x270   :  { %2544 = vmatpush2.bf16.msra.mxu0 %v3664_v54  ;;  %2502 = vmatprep.subr.bf16.mxu1 %v3529_v55  ;;  %v3475_v54 = vcombine.high %v733_v50, %v737_v51  ;;  %v3603_v55 = vcombine.high %v861_v52, %v865_v44  ;;  %v809_v50 = vld [vmem:[#allocation10 + $0x2b8] sm:$0xff] }
 0x271   :  { %2545 = vmatprep.subr.bf16.mxu0 %v3657_v56  ;;  %v725_v56 = vld [vmem:[#allocation10 + $0x18] sm:$0xff] }
 0x272   :  { %v3466_v4 = vcombine.low %v725_v56, %v729_v57  ;;  %v933_v51 = vld [vmem:[#allocation10 + $0x698] sm:$0xff] }
 0x273   :  { %2503 = vmatpush2.bf16.msra.mxu1 %v3528_v61  ;;  %v3602_v61 = vcombine.low %v861_v52, %v865_v44  ;;  %v937_v52 = vld [vmem:[#allocation10 + $0x6b8] sm:$0xff] }
 0x274   :  { %2546 = vmatpush2.bf16.msra.mxu0 %v3656_v62  ;;  %2558 = vmatprep.subr.bf16.mxu1 %v3523_v63  ;;  %v3467_v62 = vcombine.high %v725_v56, %v729_v57  ;;  %v3595_v63 = vcombine.high %v853_v58, %v857_v59  ;;  %v801_v56 = vld [vmem:[#allocation10 + $0x278] sm:$0xff] }
 0x275   :  { %2601 = vmatprep.subr.bf16.mxu0 %v3651_v0  ;;  %v845_v0 = vld [vmem:[#allocation10 + $0x3d8] sm:$0xff] }
 0x276   :  { %2505 = vmatmul.mubr.bf16.vlgmr.msra.gmra.mxu1 %v4336_v31  ;;  %v3586_v12 = vcombine.low %v845_v0, %v849_v1  ;;  %v925_v57 = vld [vmem:[#allocation10 + $0x658] sm:$0xff] }
 0x277   :  { %2548 = vmatmul.mubr.bf16.vlgmr.msra.gmra.mxu0 %v4338_v32  ;;  %2559 = vmatpush1.bf16.msra.mxu1 %v3522_v3  ;;  %v977_v3 = vld [vmem:[#allocation10 + $0x7f8] sm:$0xff] }
 0x278   :  { %2590 = vmatprep.mubr.bf16.mxu1 %v4332_v29  ;;  %2602 = vmatpush1.bf16.msra.mxu0 %v3650_v6  ;;  %v3627_v29 = vcombine.high %v885_v22, %v889_v23  ;;  %v3587_v6 = vcombine.high %v845_v0, %v849_v1  ;;  %v961_v22 = vld [vmem:[#allocation10 + $0x778] sm:$0xff]  ;;  %v3578_v23 = vcombine.low %v837_v8, %v841_v9 }
 0x279   :  { %2633 = vmatprep.mubr.bf16.mxu0 %v4334_v30  ;;  %2560 = vmatprep.subr.bf16.mxu1 %v3515_v7  ;;  %v3498_v30 = vcombine.low %v757_v20, %v761_v21  ;;  %v3715_v7 = vcombine.high %v973_v2, %v977_v3  ;;  %v833_v20 = vld [vmem:[#allocation10 + $0x378] sm:$0xff] }
 0x27a   :  { %2603 = vmatprep.subr.bf16.mxu0 %v3643_v10  ;;  %v965_v10 = vld [vmem:[#allocation10 + $0x798] sm:$0xff] }
 0x27b   :  { %2561 = vmatpush1.bf16.msra.mxu1 %v3514_v13  ;;  %v3714_v13 = vcombine.low %v973_v2, %v977_v3  ;;  %v957_v21 = vld [vmem:[#allocation10 + $0x758] sm:$0xff] }
 0x27c   :  { %2604 = vmatpush1.bf16.msra.mxu0 %v3642_v14  ;;  %2562 = vmatprep.subr.bf16.mxu1 %v3507_v15  ;;  %v3579_v14 = vcombine.high %v837_v8, %v841_v9  ;;  %v3707_v15 = vcombine.high %v965_v10, %v969_v11  ;;  %v929_v58 = vld [vmem:[#allocation10 + $0x678] sm:$0xff] }
 0x27d   :  { %2605 = vmatprep.subr.bf16.mxu0 %v3635_v16  ;;  %v829_v16 = vld [vmem:[#allocation10 + $0x358] sm:$0xff] }
 0x27e   :  { %v3570_v34 = vcombine.low %v829_v16, %v833_v20  ;;  %v793_v0 = vld [vmem:[#allocation10 + $0x238] sm:$0xff] }
 0x27f   :  { %2563 = vmatpush1.bf16.msra.mxu1 %v3506_v24  ;;  %v3706_v24 = vcombine.low %v965_v10, %v969_v11  ;;  %v917_v1 = vld [vmem:[#allocation10 + $0x618] sm:$0xff] }
 0x280   :  { %2606 = vmatpush1.bf16.msra.mxu0 %v3634_v25  ;;  %2564 = vmatprep.subr.bf16.mxu1 %v3499_v26  ;;  %v3571_v25 = vcombine.high %v829_v16, %v833_v20  ;;  %v3699_v26 = vcombine.high %v957_v21, %v961_v22  ;;  %v921_v2 = vld [vmem:[#allocation10 + $0x638] sm:$0xff]  ;;  %v4005_v16 = vld [vmem:[#allocation11 + $0xf0] sm:$0xff]  }
 0x281   :  { %2607 = vmatprep.subr.bf16.mxu0 %v3627_v29  ;;  %v821_v29 = vld [vmem:[#allocation10 + $0x318] sm:$0xff]  ;;  %v3658_v8 = vcombine.low %v917_v1, %v921_v2 }
 0x282   :  { %v3562_v41 = vcombine.low %v821_v29, %v825_v27  ;;  %v3987_v9 = vld [vmem:[#allocation11 + $0x78] sm:$0xff]  }
 0x283   :  { %2565 = vmatpush1.bf16.msra.mxu1 %v3498_v30  ;;  %v3698_v30 = vcombine.low %v957_v21, %v961_v22  ;;  %v4003_v10 = vld [vmem:[#allocation11 + $0xf8] sm:$0xff]   ;;  %v3990_v22 = vld [vmem:[#allocation11 + $0x30] sm:$0xff]  }
 0x284   :  { %2608 = vmatpush1.bf16.msra.mxu0 %v3626_v35  ;;  %2566 = vmatprep.subr.bf16.mxu1 %v3491_v36  ;;  %v3563_v35 = vcombine.high %v821_v29, %v825_v27  ;;  %v3691_v36 = vcombine.high %v949_v28, %v953_v33  ;;  %v3988_v11 = vld [vmem:[#allocation11 + $0x38] sm:$0xff]   ;;  %v4007_v27 = vld [vmem:[#allocation11 + $0xe8] sm:$0xff]  }
 0x285   :  { %2609 = vmatprep.subr.bf16.mxu0 %v3619_v37  ;;  %v813_v37 = vld [vmem:[#allocation10 + $0x2d8] sm:$0xff] }
 0x286   :  { %v3554_v44 = vcombine.low %v813_v37, %v817_v38 }
 0x287   :  { %2567 = vmatpush1.bf16.msra.mxu1 %v3490_v42  ;;  %v3690_v42 = vcombine.low %v949_v28, %v953_v33 }
 0x288   :  { %2610 = vmatpush1.bf16.msra.mxu0 %v3618_v43  ;;  %2568 = vmatprep.subr.bf16.mxu1 %v3483_v46  ;;  %v3555_v43 = vcombine.high %v813_v37, %v817_v38  ;;  %v3683_v46 = vcombine.high %v941_v39, %v945_v40 }
 0x289   :  { %2611 = vmatprep.subr.bf16.mxu0 %v3611_v47  ;;  %v805_v47 = vld [vmem:[#allocation10 + $0x298] sm:$0xff] }
 0x28a   :  { %v3546_v59 = vcombine.low %v805_v47, %v809_v50 }
 0x28b   :  { %2569 = vmatpush1.bf16.msra.mxu1 %v3482_v45  ;;  %v3682_v45 = vcombine.low %v941_v39, %v945_v40  ;;  %v3994_v40 = vld [vmem:[#allocation11 + $0x20] sm:$0xff]  }
 0x28c   :  { %2612 = vmatpush1.bf16.msra.mxu0 %v3610_v53  ;;  %2570 = vmatprep.subr.bf16.mxu1 %v3475_v54  ;;  %v3547_v53 = vcombine.high %v805_v47, %v809_v50  ;;  %v3675_v54 = vcombine.high %v933_v51, %v937_v52 }
 0x28d   :  { %2613 = vmatprep.subr.bf16.mxu0 %v3603_v55  ;;  %v797_v55 = vld [vmem:[#allocation10 + $0x258] sm:$0xff] }
 0x28e   :  { %v3538_v3 = vcombine.low %v797_v55, %v801_v56 }
 0x28f   :  { %2571 = vmatpush1.bf16.msra.mxu1 %v3474_v60  ;;  %v3674_v60 = vcombine.low %v933_v51, %v937_v52  ;;  %v3996_v52 = vld [vmem:[#allocation11 + $0x18] sm:$0xff]  }
 0x290   :  { %2614 = vmatpush1.bf16.msra.mxu0 %v3602_v61  ;;  %2572 = vmatprep.subr.bf16.mxu1 %v3467_v62  ;;  %v3539_v61 = vcombine.high %v797_v55, %v801_v56  ;;  %v3667_v62 = vcombine.high %v925_v57, %v929_v58  ;;  %v4013_v55 = vld [vmem:[#allocation11 + $0xd0] sm:$0xff]  }
 0x291   :  { %2615 = vmatprep.subr.bf16.mxu0 %v3595_v63  ;;  %v789_v63 = vld [vmem:[#allocation10 + $0x218] sm:$0xff] }
 0x293   :  { %2573 = vmatpush1.bf16.msra.mxu1 %v3466_v4  ;;  %v3666_v4 = vcombine.low %v925_v57, %v929_v58  ;;  %v3998_v57 = vld [vmem:[#allocation11 + $0x10] sm:$0xff]  }
 0x294   :  { %2616 = vmatpush1.bf16.msra.mxu0 %v3594_v5  ;;  %2574 = vmatprep.subr.bf16.mxu1 %v3587_v6  ;;  %v3531_v5 = vcombine.high %v789_v63, %v793_v0  ;;  %v3659_v6 = vcombine.high %v917_v1, %v921_v2  ;;  %v4016_v1 = vld [vmem:[#allocation11 + $0x88] sm:$0xff]   ;;  %v4017_v2 = vld [vmem:[#allocation11 + $0xc0] sm:$0xff]  }
 0x295   :  { %2617 = vmatprep.subr.bf16.mxu0 %v3715_v7  ;;  %v3530_v7 = vcombine.low %v789_v63, %v793_v0  ;;  %v4001_v0 = vld [vmem:[#allocation11 + $0x40] sm:$0xff]  }
 0x297   :  { %2575 = vmatpush2.bf16.msra.mxu1 %v3586_v12  ;;  %v4357_v12 = vld [vmem:[%s4394_s6] sm:$0xff] }
 0x298   :  { %2618 = vmatpush2.bf16.msra.mxu0 %v3714_v13  ;;  %2576 = vmatprep.subr.bf16.mxu1 %v3579_v14  ;;  %v3989_v13 = vld [vmem:[#allocation11 + $0x70] sm:$0xff]   ;;  %v4004_v14 = vld [vmem:[#allocation11 + $0xb8] sm:$0xff]   ;;  %v983_v47 = vrot.slane %v4357_v12, %v4301_v19 }
 0x299   :  { %2619 = vmatprep.subr.bf16.mxu0 %v3707_v15  ;;  %v987_v15 = vrot.slane %v4357_v12, %v4298_v18  ;;  %v4014_v19 = vld [vmem:[#allocation11 + $0x90] sm:$0xff]  }
 0x29b   :  { %2577 = vmatpush2.bf16.msra.mxu1 %v3578_v23 }
 0x29c   :  { %2620 = vmatpush2.bf16.msra.mxu0 %v3706_v24  ;;  %2578 = vmatprep.subr.bf16.mxu1 %v3571_v25  ;;  %v3991_v25 = vld [vmem:[#allocation11 + $0x68] sm:$0xff]  }
 0x29d   :  { %2621 = vmatprep.subr.bf16.mxu0 %v3699_v26  ;;  %v4006_v26 = vld [vmem:[#allocation11 + $0xb0] sm:$0xff]  }
 0x29f   :  { %2579 = vmatpush2.bf16.msra.mxu1 %v3570_v34 }
 0x2a0   :  { %2622 = vmatpush2.bf16.msra.mxu0 %v3698_v30  ;;  %2580 = vmatprep.subr.bf16.mxu1 %v3563_v35  ;;  %v3993_v30 = vld [vmem:[#allocation11 + $0x60] sm:$0xff]  }
 0x2a1   :  { %2623 = vmatprep.subr.bf16.mxu0 %v3691_v36  ;;  %v4009_v36 = vld [vmem:[#allocation11 + $0xe0] sm:$0xff]  }
 0x2a3   :  { %2581 = vmatpush2.bf16.msra.mxu1 %v3562_v41  ;;  %v3995_v41 = vld [vmem:[#allocation11 + $0x58] sm:$0xff]  }
 0x2a4   :  { %2624 = vmatpush2.bf16.msra.mxu0 %v3690_v42  ;;  %2582 = vmatprep.subr.bf16.mxu1 %v3555_v43  ;;  %v4010_v42 = vld [vmem:[#allocation11 + $0xa0] sm:$0xff]  }
 0x2a5   :  { %2625 = vmatprep.subr.bf16.mxu0 %v3683_v46  ;;  %v4011_v46 = vld [vmem:[#allocation11 + $0xd8] sm:$0xff]  }
 0x2a7   :  { %2583 = vmatpush2.bf16.msra.mxu1 %v3554_v44 }
 0x2a8   :  { %2626 = vmatpush2.bf16.msra.mxu0 %v3682_v45  ;;  %2584 = vmatprep.subr.bf16.mxu1 %v3547_v53  ;;  %v3997_v45 = vld [vmem:[#allocation11 + $0x50] sm:$0xff]   ;;  %v4012_v53 = vld [vmem:[#allocation11 + $0x98] sm:$0xff]  }
 0x2a9   :  { %2627 = vmatprep.subr.bf16.mxu0 %v3675_v54 }
 0x2ab   :  { %2585 = vmatpush2.bf16.msra.mxu1 %v3546_v59  ;;  %v3999_v59 = vld [vmem:[#allocation11 + $0x48] sm:$0xff]  }
 0x2ac   :  { %2628 = vmatpush2.bf16.msra.mxu0 %v3674_v60  ;;  %2586 = vmatprep.subr.bf16.mxu1 %v3539_v61  ;;  %v4015_v60 = vld [vmem:[#allocation11 + $0xc8] sm:$0xff]  }
 0x2ad   :  { %2629 = vmatprep.subr.bf16.mxu0 %v3667_v62  ;;  %v4000_v62 = vld [vmem:[#allocation11 + $0x8] sm:$0xff]  }
 0x2af   :  { %2587 = vmatpush2.bf16.msra.mxu1 %v3538_v3 }
 0x2b0   :  { %2630 = vmatpush2.bf16.msra.mxu0 %v3666_v4  ;;  %2588 = vmatprep.subr.bf16.mxu1 %v3531_v5  ;;  %v4002_v4 = vld [vmem:[#allocation11] sm:$0xff]  }
 0x2b1   :  { %2631 = vmatprep.subr.bf16.mxu0 %v3659_v6  ;;  %v4018_v6 = vld [vmem:[#allocation11 + $0x80] sm:$0xff]  }
 0x2b3   :  { %2589 = vmatpush2.bf16.msra.mxu1 %v3530_v7  ;;  %v4019_v7 = vld [vmem:[#allocation11 + $0x178] sm:$0xff]  }
 0x2b4   :  { %2632 = vmatpush2.bf16.msra.mxu0 %v3658_v8  ;;  %3781 = vmatprep.subr.bf16.mxu1 %v3987_v9  ;;  %v4035_v8 = vld [vmem:[#allocation11 + $0x1f8] sm:$0xff]  }
 0x2b5   :  { %3803 = vmatprep.subr.bf16.mxu0 %v4003_v10  ;;  %v4020_v10 = vld [vmem:[#allocation11 + $0x138] sm:$0xff]  }
 0x2b6   :  { %2591 = vmatmul.mubr.bf16.vlgmr.msra.gmra.mxu1 %v4336_v31  ;;  %v2334_v20 = vpop.f32.mrf.mxu1  ;;  %v2377_v21 = vpop.f32.mrf.mxu0  ;;  %v3992_v31 = vld [vmem:[#allocation11 + $0x28] sm:$0xff]  }
 0x2b7   :  { %2634 = vmatmul.mubr.bf16.vlgmr.msra.gmra.mxu0 %v4338_v32  ;;  %3782 = vmatpush3.bf16.msra.mxu1 %v3988_v11  ;;  %v4008_v32 = vld [vmem:[#allocation11 + $0xa8] sm:$0xff]   ;;  %v2335_v56 = vadd.f32 %v2334_v20, %v983_v47  ;;  %v4025_v20 = vld [vmem:[#allocation11 + $0x160] sm:$0xff]  }
 0x2b8   :  { %v2336_v23 = vpop.f32.mrf.mxu1  ;;  %v2379_v24 = vpop.f32.mrf.mxu0  ;;  %3783 = vmatprep.subr.bf16.mxu1 %v3989_v13  ;;  %3804 = vmatpush3.bf16.msra.mxu0 %v4004_v14  ;;  %v4021_v13 = vld [vmem:[#allocation11 + $0x170] sm:$0xff]  }
 0x2b9   :  { %v2337_v29 = vadd.f32 %v2336_v23, %v987_v15  ;;  %3805 = vmatprep.subr.bf16.mxu0 %v4005_v16  ;;  %v2378_v61 = vadd.f32 %v2377_v21, %v2335_v56  ;;  %v4022_v14 = vld [vmem:[#allocation11 + $0x130] sm:$0xff]   ;;  %v4024_v16 = vld [vmem:[#allocation11 + $0x128] sm:$0xff]   ;;  %v4026_v21 = vld [vmem:[#allocation11 + $0x120] sm:$0xff]  }
 0x2ba   :  { %v2338_v18 = vpop.f32.mrf.mxu1  ;;  %v2381_v28 = vpop.f32.mrf.mxu0  ;;  %v4028_v23 = vld [vmem:[#allocation11 + $0x118] sm:$0xff]  }
 0x2bb   :  { %v2380_v33 = vadd.f32 %v2379_v24, %v2337_v29  ;;  %3784 = vmatpush3.bf16.msra.mxu1 %v3990_v22  ;;  %v2339_v44 = vadd.f32 %v2338_v18, %v983_v47  ;;  %v2644_v3 = vmul.f32 0.01, %v2378_v61  ;;  %v4027_v22 = vld [vmem:[#allocation11 + $0x158] sm:$0xff]   ;;  %v4029_v24 = vld [vmem:[#allocation11 + $0x150] sm:$0xff]   ;;  %v4032_v29 = vld [vmem:[#allocation11 + $0x108] sm:$0xff]  }
 0x2bc   :  { %v2340_v34 = vpop.f32.mrf.mxu1  ;;  %3785 = vmatprep.subr.bf16.mxu1 %v3991_v25  ;;  %3806 = vmatpush3.bf16.msra.mxu0 %v4006_v26  ;;  %v2383_v37 = vpop.f32.mrf.mxu0  ;;  %v4030_v25 = vld [vmem:[#allocation11 + $0x110] sm:$0xff]   ;;  %v4031_v26 = vld [vmem:[#allocation11 + $0x148] sm:$0xff]   ;;  %v4034_v18 = vld [vmem:[#allocation11 + $0x100] sm:$0xff]  }
 0x2bd   :  { %v2341_v35 = vadd.f32 %v2340_v34, %v987_v15  ;;  %3807 = vmatprep.subr.bf16.mxu0 %v4007_v27  ;;  %v2645_v38 = vmul.f32 0.01, %v2380_v33  ;;  %v2382_v58 = vadd.f32 %v2381_v28, %v2339_v44  ;;  %v2660_v9 = vmax.f32 %v2378_v61, %v2644_v3  ;;  %v4023_v15 = vld [vmem:[#allocation11 + $0x168] sm:$0xff]   ;;  %v4033_v27 = vld [vmem:[#allocation11 + $0x140] sm:$0xff]   ;;  %v4036_v56 = vld [vmem:[#allocation11 + $0x1b8] sm:$0xff]  }
 0x2be   :  { %v991_v28 = vrot.slane %v4357_v12, %v286_v49  ;;  %v4041_v61 = vld [vmem:[#allocation11 + $0x1e0] sm:$0xff]   ;;  %v4047_v3 = vld [vmem:[#allocation11 + $0x1c8] sm:$0xff]  }
 0x2bf   :  { %v2384_v39 = vadd.f32 %v2383_v37, %v2341_v35  ;;  %3786 = vmatpush3.bf16.msra.mxu1 %v3992_v31  ;;  %v2661_v50 = vmax.f32 %v2380_v33, %v2645_v38  ;;  %v2652_v63 = vmul.f32 0.01, %v2382_v58  ;;  %v995_v33 = vrot.slane %v4357_v12, %v290_v48 }
 0x2c0   :  { %3787 = vmatprep.subr.bf16.mxu1 %v3993_v30  ;;  %3808 = vmatpush3.bf16.msra.mxu0 %v4008_v32 }
 0x2c1   :  { %v2653_v43 = vmul.f32 0.01, %v2384_v39  ;;  %3809 = vmatprep.subr.bf16.mxu0 %v4009_v36  ;;  %v2668_v5 = vmax.f32 %v2382_v58, %v2652_v63  ;;  %v4037_v58 = vld [vmem:[#allocation11 + $0x1f0] sm:$0xff]   ;;  %v4043_v63 = vld [vmem:[#allocation11 + $0x1d8] sm:$0xff]  }
 0x2c3   :  { %v2669_v51 = vmax.f32 %v2384_v39, %v2653_v43  ;;  %3788 = vmatpush3.bf16.msra.mxu1 %v3994_v40  ;;  %v2676_v11 = vpack.c.bf16 %v2668_v5, %v2660_v9  ;;  %v4049_v5 = vld [vmem:[#allocation11 + $0x1c0] sm:$0xff]  }
 0x2c4   :  { %3789 = vmatprep.subr.bf16.mxu1 %v3995_v41  ;;  %3810 = vmatpush3.bf16.msra.mxu0 %v4010_v42 }
 0x2c5   :  { %v2677_v54 = vpack.c.bf16 %v2669_v51, %v2661_v50  ;;  %3811 = vmatprep.subr.bf16.mxu0 %v4011_v46 }
 0x2c7   :  { %3790 = vmatpush3.bf16.msra.mxu1 %v3996_v52  ;;  %3235 = vmatprep.mubr.bf16.mxu1 %v2677_v54 }
 0x2c8   :  { %3791 = vmatprep.subr.bf16.mxu1 %v3997_v45  ;;  %3812 = vmatpush3.bf16.msra.mxu0 %v4012_v53 }
 0x2c9   :  { %3813 = vmatprep.subr.bf16.mxu0 %v4013_v55 }
 0x2cb   :  { %3792 = vmatpush3.bf16.msra.mxu1 %v3998_v57 }
 0x2cc   :  { %3793 = vmatprep.subr.bf16.mxu1 %v3999_v59  ;;  %3814 = vmatpush3.bf16.msra.mxu0 %v4014_v19  ;;  %v4038_v59 = vld [vmem:[#allocation11 + $0x1b0] sm:$0xff]   ;;  %v4039_v19 = vld [vmem:[#allocation11 + $0x1e8] sm:$0xff]  }
 0x2cd   :  { %3815 = vmatprep.subr.bf16.mxu0 %v4015_v60  ;;  %v4040_v60 = vld [vmem:[#allocation11 + $0x1a8] sm:$0xff]  }
 0x2cf   :  { %3794 = vmatpush3.bf16.msra.mxu1 %v4000_v62  ;;  %v4042_v62 = vld [vmem:[#allocation11 + $0x1a0] sm:$0xff]  }
 0x2d0   :  { %3795 = vmatprep.subr.bf16.mxu1 %v4001_v0  ;;  %3816 = vmatpush3.bf16.msra.mxu0 %v4016_v1  ;;  %v4044_v0 = vld [vmem:[#allocation11 + $0x198] sm:$0xff]   ;;  %v4045_v1 = vld [vmem:[#allocation11 + $0x1d0] sm:$0xff]  }
 0x2d1   :  { %3817 = vmatprep.subr.bf16.mxu0 %v4017_v2  ;;  %v4046_v2 = vld [vmem:[#allocation11 + $0x190] sm:$0xff]  }
 0x2d3   :  { %3796 = vmatpush3.bf16.msra.mxu1 %v4002_v4  ;;  %v4048_v4 = vld [vmem:[#allocation11 + $0x188] sm:$0xff]  }
 0x2d4   :  { %3818 = vmatpush3.bf16.msra.mxu0 %v4018_v6  ;;  %3825 = vmatprep.subr.bf16.mxu1 %v4019_v7  ;;  %v4050_v6 = vld [vmem:[#allocation11 + $0x180] sm:$0xff]   ;;  %v998_v7 = vsub.s32 4, %v4295_v17 }
 0x2d5   :  { %3847 = vmatprep.subr.bf16.mxu0 %v4035_v8  ;;  %v1002_v8 = vsub.s32 5, %v4295_v17 }
 0x2d6   :  { %3236 = vmatmul.mubr.bf16.vlgmr.msra.gmra.mxu1 %v2676_v11  ;;  %v999_v9 = vrot.slane %v4357_v12, %v998_v7 }
 0x2d7   :  { %3826 = vmatpush3.bf16.msra.mxu1 %v4020_v10  ;;  %v1003_v10 = vrot.slane %v4357_v12, %v1002_v8 }
 0x2d8   :  { %3827 = vmatprep.subr.bf16.mxu1 %v4021_v13 }
 0x2db   :  { %3828 = vmatpush3.bf16.msra.mxu1 %v4022_v14 }
 0x2dc   :  { %3829 = vmatprep.subr.bf16.mxu1 %v4023_v15 }
 0x2df   :  { %3830 = vmatpush3.bf16.msra.mxu1 %v4024_v16 }
 0x2e0   :  { %3831 = vmatprep.subr.bf16.mxu1 %v4025_v20 }
 0x2e3   :  { %3832 = vmatpush3.bf16.msra.mxu1 %v4026_v21 }
 0x2e4   :  { %3833 = vmatprep.subr.bf16.mxu1 %v4027_v22 }
 0x2e7   :  { %3834 = vmatpush3.bf16.msra.mxu1 %v4028_v23 }
 0x2e8   :  { %3835 = vmatprep.subr.bf16.mxu1 %v4029_v24 }
 0x2eb   :  { %3836 = vmatpush3.bf16.msra.mxu1 %v4030_v25 }
 0x2ec   :  { %3837 = vmatprep.subr.bf16.mxu1 %v4031_v26 }
 0x2ef   :  { %3838 = vmatpush3.bf16.msra.mxu1 %v4032_v29 }
 0x2f0   :  { %3839 = vmatprep.subr.bf16.mxu1 %v4033_v27 }
 0x2f3   :  { %3840 = vmatpush3.bf16.msra.mxu1 %v4034_v18 }
 0x2f6   :  { %v2420_v31 = vpop.f32.mrf.mxu1  ;;  %v2463_v34 = vpop.f32.mrf.mxu0 }
 0x2f7   :  { %v2421_v30 = vadd.f32 %v2420_v31, %v991_v28 }
 0x2f8   :  { %v2422_v32 = vpop.f32.mrf.mxu1  ;;  %v2465_v35 = vpop.f32.mrf.mxu0 }
 0x2f9   :  { %v2423_v36 = vadd.f32 %v2422_v32, %v995_v33  ;;  %v2464_v41 = vadd.f32 %v2463_v34, %v2421_v30 }
 0x2fa   :  { %v2424_v37 = vpop.f32.mrf.mxu1  ;;  %v2467_v38 = vpop.f32.mrf.mxu0 }
 0x2fb   :  { %v2466_v39 = vadd.f32 %v2465_v35, %v2423_v36  ;;  %v2425_v40 = vadd.f32 %v2424_v37, %v991_v28  ;;  %v2646_v52 = vmul.f32 0.01, %v2464_v41 }
 0x2fc   :  { %v2426_v42 = vpop.f32.mrf.mxu1  ;;  %v2469_v47 = vpop.f32.mrf.mxu0 }
 0x2fd   :  { %v2468_v43 = vadd.f32 %v2467_v38, %v2425_v40  ;;  %v2427_v46 = vadd.f32 %v2426_v42, %v995_v33  ;;  %v2647_v49 = vmul.f32 0.01, %v2466_v39  ;;  %v2662_v54 = vmax.f32 %v2464_v41, %v2646_v52 }
 0x2fe   :  { %v1006_v40 = vsub.s32 6, %v4295_v17  ;;  %v1010_v41 = vsub.s32 7, %v4295_v17 }
 0x2ff   :  { %v2654_v50 = vmul.f32 0.01, %v2468_v43  ;;  %v2470_v51 = vadd.f32 %v2469_v47, %v2427_v46  ;;  %v2663_v45 = vmax.f32 %v2466_v39, %v2647_v49 }
 0x300   :  { %v1007_v42 = vrot.slane %v4357_v12, %v1006_v40 }
 0x301   :  { %v2655_v48 = vmul.f32 0.01, %v2470_v51  ;;  %v2670_v44 = vmax.f32 %v2468_v43, %v2654_v50  ;;  %v1011_v43 = vrot.slane %v4357_v12, %v1010_v41 }
 0x303   :  { %v2671_v53 = vmax.f32 %v2470_v51, %v2655_v48  ;;  %v2678_v57 = vpack.c.bf16 %v2670_v44, %v2662_v54 }
 0x305   :  { %v2679_v55 = vpack.c.bf16 %v2671_v53, %v2663_v45 }
 0x307   :  { %3276 = vmatprep.mubr.bf16.mxu0 %v2679_v55 }
 0x308   :  { %3277 = vmatmul.mubr.bf16.vlgmr.msra.gmra.mxu0 %v2678_v57 }
 0x309   :  { %3848 = vmatpush3.bf16.msra.mxu0 %v4036_v56 }
 0x30a   :  { %3849 = vmatprep.subr.bf16.mxu0 %v4037_v58 }
 0x30d   :  { %3850 = vmatpush3.bf16.msra.mxu0 %v4038_v59 }
 0x30e   :  { %3851 = vmatprep.subr.bf16.mxu0 %v4039_v19 }
 0x311   :  { %3852 = vmatpush3.bf16.msra.mxu0 %v4040_v60 }
 0x312   :  { %3853 = vmatprep.subr.bf16.mxu0 %v4041_v61 }
 0x315   :  { %3854 = vmatpush3.bf16.msra.mxu0 %v4042_v62 }
 0x316   :  { %3855 = vmatprep.subr.bf16.mxu0 %v4043_v63 }
 0x319   :  { %3856 = vmatpush3.bf16.msra.mxu0 %v4044_v0 }
 0x31a   :  { %3857 = vmatprep.subr.bf16.mxu0 %v4045_v1 }
 0x31d   :  { %3858 = vmatpush3.bf16.msra.mxu0 %v4046_v2 }
 0x31e   :  { %3859 = vmatprep.subr.bf16.mxu0 %v4047_v3 }
 0x321   :  { %3860 = vmatpush3.bf16.msra.mxu0 %v4048_v4 }
 0x322   :  { %3861 = vmatprep.subr.bf16.mxu0 %v4049_v5 }
 0x325   :  { %3862 = vmatpush3.bf16.msra.mxu0 %v4050_v6 }
 0x336   :  { %v2506_v11 = vpop.f32.mrf.mxu1 }
 0x337   :  { %v2549_v13 = vpop.f32.mrf.mxu0  ;;  %v2507_v14 = vadd.f32 %v2506_v11, %v999_v9 }
 0x338   :  { %v2508_v15 = vpop.f32.mrf.mxu1 }
 0x339   :  { %v2509_v16 = vadd.f32 %v2508_v15, %v1003_v10  ;;  %v2551_v20 = vpop.f32.mrf.mxu0  ;;  %v2550_v25 = vadd.f32 %v2549_v13, %v2507_v14  ;;  %v3716_v14 = vld [vmem:[%s4396_s8] ss:$0 sm:$0xff]  ;;  %s4220_s8 = smov [#allocation13]  }
 0x33a   :  { %v2510_v21 = vpop.f32.mrf.mxu1  ;;  %s3376_s1 = sshll.u32 %s4220_s8, 4  ;;  %s3377_s1 = int_to_ptr.vmem [resolvable:$true] %s3376_s1 }
 0x33b   :  { %v2552_v22 = vadd.f32 %v2551_v20, %v2509_v16  ;;  %v2511_v23 = vadd.f32 %v2510_v21, %v999_v9  ;;  %v2553_v24 = vpop.f32.mrf.mxu0  ;;  %v2648_v34 = vmul.f32 0.01, %v2550_v25  ;;  %s4175_s26 = scalar_lea.vmem %s3377_s1, 256  ;;  %p4180_p3 = scmp.lt.s32.totalorder %s3377_s1, %s3377_s1 }
 0x33c   :  { %v2512_v26 = vpop.f32.mrf.mxu1  ;;  %p4176_p2 = scmp.ne.s32.totalorder %s3377_s1, %s4175_s26  ;;  %p4181_p4 = scmp.lt.s32.totalorder %s4175_s26, %s4175_s26 }
 0x33d   :  { %v2554_v29 = vadd.f32 %v2553_v24, %v2511_v23  ;;  %v2513_v27 = vadd.f32 %v2512_v26, %v1003_v10  ;;  %v2555_v18 = vpop.f32.mrf.mxu0  ;;  %v2649_v28 = vmul.f32 0.01, %v2552_v22  ;;  %v2664_v37 = vmax.f32 %v2550_v25, %v2648_v34 }
 0x33e   :  { %p4182_p5 = por %p4181_p4, %p4180_p3 }
 0x33f   :  { %v2656_v33 = vmul.f32 0.01, %v2554_v29  ;;  %v2556_v31 = vadd.f32 %v2555_v18, %v2513_v27  ;;  %v2665_v35 = vmax.f32 %v2552_v22, %v2649_v28 }
 0x340   :  { %p4183_p6 = pnand %p4182_p5, %p4176_p2 }
 0x341   :  { %v2657_v30 = vmul.f32 0.01, %v2556_v31  ;;  %v2672_v32 = vmax.f32 %v2554_v29, %v2656_v33 }
 0x343   :  { %v2673_v36 = vmax.f32 %v2556_v31, %v2657_v30  ;;  %v2680_v39 = vpack.c.bf16 %v2672_v32, %v2664_v37 }
 0x345   :  { %v2681_v38 = vpack.c.bf16 %v2673_v36, %v2665_v35 }
 0x347   :  { %3317 = vmatprep.mubr.bf16.mxu1 %v2681_v38 }
 0x348   :  { %3318 = vmatmul.mubr.bf16.vlgmr.msra.gmra.mxu1 %v2680_v39 }
 0x376   :  { %v2592_v46 = vpop.f32.mrf.mxu1 }
 0x377   :  { %v2635_v47 = vpop.f32.mrf.mxu0  ;;  %v2593_v49 = vadd.f32 %v2592_v46, %v1007_v42 }
 0x378   :  { %v2594_v50 = vpop.f32.mrf.mxu1 }
 0x379   :  { %v2595_v51 = vadd.f32 %v2594_v50, %v1011_v43  ;;  %v2637_v52 = vpop.f32.mrf.mxu0  ;;  %v2636_v54 = vadd.f32 %v2635_v47, %v2593_v49 }
 0x37a   :  { %v2596_v48 = vpop.f32.mrf.mxu1 }
 0x37b   :  { %v2638_v44 = vadd.f32 %v2637_v52, %v2595_v51  ;;  %v2597_v45 = vadd.f32 %v2596_v48, %v1007_v42  ;;  %v2639_v53 = vpop.f32.mrf.mxu0  ;;  %v2650_v60 = vmul.f32 0.01, %v2636_v54 }
 0x37c   :  { %v2598_v55 = vpop.f32.mrf.mxu1 }
 0x37d   :  { %v2640_v56 = vadd.f32 %v2639_v53, %v2597_v45  ;;  %v2599_v57 = vadd.f32 %v2598_v55, %v1011_v43  ;;  %v2641_v58 = vpop.f32.mrf.mxu0  ;;  %v2651_v17 = vmul.f32 0.01, %v2638_v44  ;;  %v2666_v0 = vmax.f32 %v2636_v54, %v2650_v60 }
 0x37f   :  { %v2658_v59 = vmul.f32 0.01, %v2640_v56  ;;  %v2642_v19 = vadd.f32 %v2641_v58, %v2599_v57  ;;  %v2667_v62 = vmax.f32 %v2638_v44, %v2651_v17 }
 0x381   :  { %v2659_v12 = vmul.f32 0.01, %v2642_v19  ;;  %v2674_v61 = vmax.f32 %v2640_v56, %v2658_v59 }
 0x383   :  { %v2675_v63 = vmax.f32 %v2642_v19, %v2659_v12  ;;  %v2682_v2 = vpack.c.bf16 %v2674_v61, %v2666_v0 }
 0x385   :  { %v2683_v1 = vpack.c.bf16 %v2675_v63, %v2667_v62 }
 0x387   :  { %3358 = vmatprep.mubr.bf16.mxu0 %v2683_v1 }
 0x388   :  { %3359 = vmatmul.mubr.bf16.vlgmr.msra.gmra.mxu0 %v2682_v2 }
 0x396   :  { %v3797_v3 = vpop.f32.mrf.mxu1 }
 0x398   :  { %v3798_v4 = vpop.f32.mrf.mxu1 }
 0x399   :  { %v3799_v13 = vadd.f32 %v3798_v4, %v3797_v3 }
 0x39a   :  { %v3800_v5 = vpop.f32.mrf.mxu1 }
 0x39b   :  { %v3238_v21 = vadd.f32 %v3799_v13, %v3716_v14 }
 0x39c   :  { %v3801_v6 = vpop.f32.mrf.mxu1 }
 0x39d   :  { %v3802_v22 = vadd.f32 %v3801_v6, %v3800_v5 }
 0x39f   :  { %v3241_v18 = vadd.f32 %v3802_v22, %v3716_v14 }
 0x3c8   :  { %v3819_v7 = vpop.f32.mrf.mxu0 }
 0x3ca   :  { %v3820_v9 = vpop.f32.mrf.mxu0 }
 0x3cb   :  { %v3821_v16 = vadd.f32 %v3820_v9, %v3819_v7 }
 0x3cc   :  { %v3822_v11 = vpop.f32.mrf.mxu0 }
 0x3cd   :  { %v3279_v26 = vadd.f32 %v3821_v16, %v3238_v21 }
 0x3ce   :  { %v3823_v20 = vpop.f32.mrf.mxu0 }
 0x3cf   :  { %v3824_v29 = vadd.f32 %v3823_v20, %v3822_v11 }
 0x3d1   :  { %v3282_v30 = vadd.f32 %v3824_v29, %v3241_v18 }
 0x408   :  { %v3841_v8 = vpop.f32.mrf.mxu1 }
 0x40a   :  { %v3842_v10 = vpop.f32.mrf.mxu1 }
 0x40b   :  { %v3843_v23 = vadd.f32 %v3842_v10, %v3841_v8 }
 0x40c   :  { %v3844_v15 = vpop.f32.mrf.mxu1 }
 0x40d   :  { %v3320_v28 = vadd.f32 %v3843_v23, %v3279_v26 }
 0x40e   :  { %v3845_v24 = vpop.f32.mrf.mxu1 }
 0x40f   :  { %v3846_v33 = vadd.f32 %v3845_v24, %v3844_v15 }
 0x411   :  { %v3323_v36 = vadd.f32 %v3846_v33, %v3282_v30 }
 0x448   :  { %v3863_v25 = vpop.f32.mrf.mxu0 }
 0x44a   :  { %v3864_v27 = vpop.f32.mrf.mxu0 }
 0x44b   :  { %v3865_v31 = vadd.f32 %v3864_v27, %v3863_v25 }
 0x44c   :  { %v3866_v34 = vpop.f32.mrf.mxu0 }
 0x44d   :  { %v3361_v32 = vadd.f32 %v3865_v31, %v3320_v28 }
 0x44e   :  { %v3867_v35 = vpop.f32.mrf.mxu0 }
 0x44f   :  { %4051 = vtanh.f32 %v3361_v32  ;;  %v3868_v37 = vadd.f32 %v3867_v35, %v3866_v34 }
 0x451   :  { %v3364_v38 = vadd.f32 %v3868_v37, %v3323_v36 }
 0x453   :  { %4053 = vtanh.f32 %v3364_v38 }
 0x45c   :  { %v4052_v39 = vpop.eup %4051 }
 0x45d   :  { %3369 = vst [vmem:[#allocation13] sm:$0xff] %v4052_v39 }
 0x460   :  { %v4054_v40 = vpop.eup %4053 }
 0x461   :  { %3370 = vst [vmem:[#allocation13 + $0x8] sm:$0xff] %v4054_v40 }
 0x462   :  { %4186 = shalt.err (!%p4183_p6)
}
 0x463   :  { %3382 = dma.vmem_to_hbm [thread:$0]  %s3377_s1, 256, %s4397_s9, [#allocation4], %s4207_s14, %s4207_s14, %s4208_s15  }
 0x464   :  { %4203 = dma.done.wait [#allocation4], 256  }
 0x465   :  { %4204 = vsyncadd [#allocation4], 4294967040 }
 0x466   :  { %3386 = vsyncpa [#allocation3], 1 }
 0x467   :  { %3387 = vsyncpa [#allocation6], 1 }
 0x468   :  { %3388 = vsyncpa [#allocation9], 1 }
 0x469   :  { %3389 = vsyncpa [#allocation12], 1 }
 0x46a   :  { %3390 = vsyncpa [#allocation4], 1 }

</bundles_post_ra>
